<compile_context>
chip_gen: v6e
topology: v6e:2x2x1
jax: 0.10.0
libtpu: 0.0.40
codegen_flags: <defaults>
</compile_context>

<pallas_src>
import functools

import jax
import jax.numpy as jnp
from jax.experimental import pallas as pl
from jax.experimental.pallas import tpu as pltpu

EPS = 1e-5


def _round_up(v, m):
    return (v + m - 1) // m * m


def _vmem_limit():
    """Generation-aware scoped-VMEM limit (48 MiB on v7x, ~96 MiB on v5e/v6e)."""
    try:
        cap = int(pltpu.get_tpu_info().vmem_capacity_bytes)
    except Exception:
        cap = 64 * 1024 * 1024
    return min((cap * 3) // 4, 112 * 1024 * 1024)


# ---------------------------------------------------------------------------
# Kernel 1: direct 3x3 conv (9 shifted-window matmuls) + per-sample BN stats,
#           with an optionally fused 1x1 downsample branch (shares the input).
# ---------------------------------------------------------------------------
def _conv1_kernel(*refs, Ho, Wo, stride, with_ds):
    if with_ds:
        (x_ref, w_ref, wd_ref,
         y_ref, s_ref, q_ref, yd_ref, sd_ref, qd_ref) = refs
    else:
        x_ref, w_ref, y_ref, s_ref, q_ref = refs

    cin = x_ref.shape[-1]
    cout = y_ref.shape[-1]
    m = Ho * Wo

    # Load each stride-phase of the (zero-padded) activation once.
    n_phase = stride * stride
    phases = [x_ref[0, p] for p in range(n_phase)]      # each (Hq, Wq, cin) bf16

    acc = jnp.zeros((m, cout), jnp.float32)
    acc_d = jnp.zeros((m, cout), jnp.float32) if with_ds else None

    for ki in range(3):
        for kj in range(3):
            p = (ki % stride) * stride + (kj % stride)
            oi, oj = ki // stride, kj // stride
            win = phases[p][oi:oi + Ho, oj:oj + Wo, :]   # (Ho, Wo, cin), unit-stride
            win2 = win.reshape(m, cin)                   # VMEM-local only
            acc = acc + jnp.dot(win2, w_ref[ki, kj],
                                preferred_element_type=jnp.float32)
            if with_ds and ki == 1 and kj == 1:
                # fused 1x1-stride-s downsample conv: reuses the centre tap window
                acc_d = acc_d + jnp.dot(win2, wd_ref[...],
                                        preferred_element_type=jnp.float32)

    y_ref[...] = acc.reshape(1, Ho, Wo, cout).astype(y_ref.dtype)
    s_ref[...] = jnp.sum(acc, axis=0, keepdims=True)[None]
    q_ref[...] = jnp.sum(acc * acc, axis=0, keepdims=True)[None]
    if with_ds:
        yd_ref[...] = acc_d.reshape(1, Ho, Wo, cout).astype(yd_ref.dtype)
        sd_ref[...] = jnp.sum(acc_d, axis=0, keepdims=True)[None]
        qd_ref[...] = jnp.sum(acc_d * acc_d, axis=0, keepdims=True)[None]


# ---------------------------------------------------------------------------
# Kernel 2: fused BN1-affine + ReLU on the input, then direct 3x3 conv
#           (stride 1) + per-sample BN stats. Spatial zero-padding is done in a
#           VMEM scratch (re-zeroed every step so the batch axis is parallel-safe).
# ---------------------------------------------------------------------------
def _conv2_kernel(x_ref, w_ref, sc_ref, sh_ref, y_ref, s_ref, q_ref, xpad_ref,
                  *, Ho, Wo):
    cin = x_ref.shape[-1]
    cout = y_ref.shape[-1]
    m = Ho * Wo

    # BN1 affine + ReLU fused into the input path (f32 math, bf16 storage).
    h = x_ref[0].astype(jnp.float32) * sc_ref[0] + sh_ref[0]
    h = jnp.maximum(h, 0.0).astype(xpad_ref.dtype)

    xpad_ref[...] = jnp.zeros_like(xpad_ref)
    xpad_ref[1:Ho + 1, 1:Wo + 1, :] = h
    xp = xpad_ref[...]                                   # (Ho+2, Wo+2, cin)

    acc = jnp.zeros((m, cout), jnp.float32)
    for ki in range(3):
        for kj in range(3):
            win2 = xp[ki:ki + Ho, kj:kj + Wo, :].reshape(m, cin)
            acc = acc + jnp.dot(win2, w_ref[ki, kj],
                                preferred_element_type=jnp.float32)

    y_ref[...] = acc.reshape(1, Ho, Wo, cout).astype(y_ref.dtype)
    s_ref[...] = jnp.sum(acc, axis=0, keepdims=True)[None]
    q_ref[...] = jnp.sum(acc * acc, axis=0, keepdims=True)[None]


# ---------------------------------------------------------------------------
# Kernel 3: epilogue — BN2 affine + residual (optionally with its own BN
#           affine for the downsample branch) + final ReLU.
# ---------------------------------------------------------------------------
def _epilogue_kernel(*refs, with_ds):
    if with_ds:
        y_ref, sc_ref, sh_ref, r_ref, scd_ref, shd_ref, o_ref = refs
    else:
        y_ref, sc_ref, sh_ref, r_ref, o_ref = refs

    out = y_ref[0].astype(jnp.float32) * sc_ref[0] + sh_ref[0]
    if with_ds:
        res = r_ref[0].astype(jnp.float32) * scd_ref[0] + shd_ref[0]
    else:
        res = r_ref[0].astype(jnp.float32)
    o_ref[0] = jnp.maximum(out + res, 0.0)


# ---------------------------------------------------------------------------
# JAX glue: BN scale/shift from partial stats (tiny op, clamped variance)
# ---------------------------------------------------------------------------
def _bn_scale_shift(sum_nc, ssq_nc, gamma, beta, n_rows):
    cp = sum_nc.shape[-1]
    s = jnp.sum(sum_nc.reshape(-1, cp), axis=0)
    q = jnp.sum(ssq_nc.reshape(-1, cp), axis=0)
    mean = s / float(n_rows)
    var = jnp.maximum(q / float(n_rows) - mean * mean, 0.0)   # clamp: avoid NaN rsqrt
    g = jnp.pad(gamma.astype(jnp.float32), (0, cp - gamma.shape[0]))
    b = jnp.pad(beta.astype(jnp.float32), (0, cp - beta.shape[0]))
    scale = g * jax.lax.rsqrt(var + EPS)
    shift = b - mean * scale
    return scale, shift


# ---------------------------------------------------------------------------
# pallas_call wrappers
# ---------------------------------------------------------------------------
def _conv1_call(x_nhwc, w_oihw, wd_oihw, *, stride):
    N, H, W, Cin = x_nhwc.shape
    Cout = w_oihw.shape[0]
    cinp = _round_up(Cin, 128)
    coutp = _round_up(Cout, 128)
    Ho = (H + 2 - 3) // stride + 1
    Wo = (W + 2 - 3) // stride + 1
    Hp = stride * Ho + 2
    Wp = stride * Wo + 2

    # One fused pad (spatial + channel) + bf16 cast; then phase-split so every
    # in-kernel tap window is a unit-stride slice.
    xp = jnp.pad(x_nhwc.astype(jnp.float32),
                 ((0, 0), (1, Hp - H - 1), (1, Wp - W - 1), (0, cinp - Cin))
                 ).astype(jnp.bfloat16)
    if stride == 1:
        xph = xp[:, None]                                        # (N,1,Hp,Wp,Cp)
    else:
        phases = [xp[:, pi::stride, pj::stride, :]
                  for pi in range(stride) for pj in range(stride)]
        xph = jnp.stack(phases, axis=1)                          # (N,s*s,Hq,Wq,Cp)
    P2, Hq, Wq = xph.shape[1], xph.shape[2], xph.shape[3]

    w = jnp.transpose(w_oihw, (2, 3, 1, 0))                      # (3,3,Cin,Cout)
    w = jnp.pad(w, ((0, 0), (0, 0), (0, cinp - Cin), (0, coutp - Cout))
                ).astype(jnp.bfloat16)

    with_ds = wd_oihw is not None
    args = [xph, w]
    in_specs = [
        pl.BlockSpec((1, P2, Hq, Wq, cinp), lambda n: (n, 0, 0, 0, 0)),
        pl.BlockSpec((3, 3, cinp, coutp), lambda n: (0, 0, 0, 0)),
    ]
    wd_bytes = 0
    if with_ds:
        wd = jnp.pad(wd_oihw[:, :, 0, 0].T,
                     ((0, cinp - Cin), (0, coutp - Cout))).astype(jnp.bfloat16)
        args.append(wd)
        in_specs.append(pl.BlockSpec((cinp, coutp), lambda n: (0, 0)))
        wd_bytes = wd.size * 2

    out_specs = [
        pl.BlockSpec((1, Ho, Wo, coutp), lambda n: (n, 0, 0, 0)),
        pl.BlockSpec((1, 1, coutp), lambda n: (n, 0, 0)),
        pl.BlockSpec((1, 1, coutp), lambda n: (n, 0, 0)),
    ]
    out_shape = [
        jax.ShapeDtypeStruct((N, Ho, Wo, coutp), jnp.bfloat16),
        jax.ShapeDtypeStruct((N, 1, coutp), jnp.float32),
        jax.ShapeDtypeStruct((N, 1, coutp), jnp.float32),
    ]
    if with_ds:
        out_specs = out_specs * 2
        out_shape = out_shape * 2

    flops = 2 * N * Ho * Wo * 9 * cinp * coutp
    if with_ds:
        flops += 2 * N * Ho * Wo * cinp * coutp
    bytes_accessed = (xph.size * 2 + w.size * 2 + wd_bytes
                      + (2 if with_ds else 1)
                      * (N * Ho * Wo * coutp * 2 + 2 * N * coutp * 4))

    results = pl.pallas_call(
        functools.partial(_conv1_kernel, Ho=Ho, Wo=Wo, stride=stride,
                          with_ds=with_ds),
        grid_spec=pltpu.PrefetchScalarGridSpec(
            num_scalar_prefetch=0,
            grid=(N,),
            in_specs=in_specs,
            out_specs=out_specs,
        ),
        out_shape=tuple(out_shape),
        compiler_params=pltpu.CompilerParams(
            dimension_semantics=("parallel",),
            vmem_limit_bytes=_vmem_limit()),
        cost_estimate=pl.CostEstimate(flops=flops, transcendentals=0,
                                      bytes_accessed=bytes_accessed),
    )(*args)

    if with_ds:
        y, s, q, yd, sd, qd = results
        return y, s, q, (yd, sd, qd), Ho, Wo
    y, s, q = results
    return y, s, q, None, Ho, Wo


def _conv2_call(y1, w_oihw, scale1, shift1):
    N, Ho, Wo, cinp = y1.shape
    Cout, Cin = w_oihw.shape[0], w_oihw.shape[1]
    coutp = _round_up(Cout, 128)

    w = jnp.transpose(w_oihw, (2, 3, 1, 0))
    w = jnp.pad(w, ((0, 0), (0, 0), (0, cinp - Cin), (0, coutp - Cout))
                ).astype(jnp.bfloat16)
    sc = scale1.reshape(1, 1, cinp).astype(jnp.float32)
    sh = shift1.reshape(1, 1, cinp).astype(jnp.float32)

    flops = 2 * N * Ho * Wo * 9 * cinp * coutp
    bytes_accessed = (y1.size * 2 + w.size * 2 + N * Ho * Wo * coutp * 2
                      + 2 * N * coutp * 4)

    return pl.pallas_call(
        functools.partial(_conv2_kernel, Ho=Ho, Wo=Wo),
        grid_spec=pltpu.PrefetchScalarGridSpec(
            num_scalar_prefetch=0,
            grid=(N,),
            in_specs=[
                pl.BlockSpec((1, Ho, Wo, cinp), lambda n: (n, 0, 0, 0)),
                pl.BlockSpec((3, 3, cinp, coutp), lambda n: (0, 0, 0, 0)),
                pl.BlockSpec((1, 1, cinp), lambda n: (0, 0, 0)),
                pl.BlockSpec((1, 1, cinp), lambda n: (0, 0, 0)),
            ],
            out_specs=[
                pl.BlockSpec((1, Ho, Wo, coutp), lambda n: (n, 0, 0, 0)),
                pl.BlockSpec((1, 1, coutp), lambda n: (n, 0, 0)),
                pl.BlockSpec((1, 1, coutp), lambda n: (n, 0, 0)),
            ],
            scratch_shapes=[pltpu.VMEM((Ho + 2, Wo + 2, cinp), jnp.bfloat16)],
        ),
        out_shape=(
            jax.ShapeDtypeStruct((N, Ho, Wo, coutp), jnp.bfloat16),
            jax.ShapeDtypeStruct((N, 1, coutp), jnp.float32),
            jax.ShapeDtypeStruct((N, 1, coutp), jnp.float32),
        ),
        compiler_params=pltpu.CompilerParams(
            dimension_semantics=("parallel",),
            vmem_limit_bytes=_vmem_limit()),
        cost_estimate=pl.CostEstimate(flops=flops, transcendentals=0,
                                      bytes_accessed=bytes_accessed),
    )(y1, w, sc, sh)


def _epilogue_call(y2, scale2, shift2, residual, scale_d=None, shift_d=None):
    N, Ho, Wo, cp = y2.shape
    with_ds = scale_d is not None

    args = [y2, scale2.reshape(1, 1, cp), shift2.reshape(1, 1, cp), residual]
    in_specs = [
        pl.BlockSpec((1, Ho, Wo, cp), lambda n: (n, 0, 0, 0)),
        pl.BlockSpec((1, 1, cp), lambda n: (0, 0, 0)),
        pl.BlockSpec((1, 1, cp), lambda n: (0, 0, 0)),
        pl.BlockSpec((1, Ho, Wo, cp), lambda n: (n, 0, 0, 0)),
    ]
    if with_ds:
        args += [scale_d.reshape(1, 1, cp), shift_d.reshape(1, 1, cp)]
        in_specs += [pl.BlockSpec((1, 1, cp), lambda n: (0, 0, 0)),
                     pl.BlockSpec((1, 1, cp), lambda n: (0, 0, 0))]

    bytes_accessed = (y2.size * 2 + residual.size * residual.dtype.itemsize
                      + N * Ho * Wo * cp * 4)

    return pl.pallas_call(
        functools.partial(_epilogue_kernel, with_ds=with_ds),
        grid_spec=pltpu.PrefetchScalarGridSpec(
            num_scalar_prefetch=0,
            grid=(N,),
            in_specs=in_specs,
            out_specs=pl.BlockSpec((1, Ho, Wo, cp), lambda n: (n, 0, 0, 0)),
        ),
        out_shape=jax.ShapeDtypeStruct((N, Ho, Wo, cp), jnp.float32),
        compiler_params=pltpu.CompilerParams(
            dimension_semantics=("parallel",),
            vmem_limit_bytes=_vmem_limit()),
        cost_estimate=pl.CostEstimate(flops=8 * N * Ho * Wo * cp,
                                      transcendentals=0,
                                      bytes_accessed=bytes_accessed),
    )(*args)


# ---------------------------------------------------------------------------
# BasicBlock forward (NCHW in / NCHW out, like the PyTorch module)
# ---------------------------------------------------------------------------
@functools.partial(jax.jit, static_argnames=("stride", "has_ds"))
def _block_jit(arrays, x_nchw, *, stride, has_ds):
    x = jnp.transpose(x_nchw, (0, 2, 3, 1)).astype(jnp.float32)   # NHWC
    N, H, W, Cin = x.shape
    planes = arrays["conv1"].shape[0]

    wd = arrays["ds_conv"] if has_ds else None
    y1, s1, q1, ds_pack, Ho, Wo = _conv1_call(x, arrays["conv1"], wd,
                                              stride=stride)
    n_rows = N * Ho * Wo
    coutp = y1.shape[-1]

    scale1, shift1 = _bn_scale_shift(s1, q1, arrays["bn1"][0], arrays["bn1"][1],
                                     n_rows)
    y2, s2, q2 = _conv2_call(y1, arrays["conv2"], scale1, shift1)
    scale2, shift2 = _bn_scale_shift(s2, q2, arrays["bn2"][0], arrays["bn2"][1],
                                     n_rows)

    if has_ds:
        yd, sd, qd = ds_pack
        scale_d, shift_d = _bn_scale_shift(sd, qd, arrays["ds_bn"][0],
                                           arrays["ds_bn"][1], n_rows)
        out = _epilogue_call(y2, scale2, shift2, yd, scale_d, shift_d)
    else:
        resid = jnp.pad(x, ((0, 0), (0, 0), (0, 0), (0, coutp - Cin)))
        out = _epilogue_call(y2, scale2, shift2, resid)

    out = out[..., :planes]
    return jnp.transpose(out, (0, 3, 1, 2))                       # back to NCHW


def basic_block_apply(p, x_nchw):
    arrays = {k: v for k, v in p.items() if k != "stride"}
    return _block_jit(arrays, x_nchw, stride=p["stride"], has_ds="ds_conv" in p)


# ---------------------------------------------------------------------------
# Parameter construction (mirrors the PyTorch defaults)
# ---------------------------------------------------------------------------
def kaiming_conv(key, cout, cin, k):
    fan_out = cout * k * k
    std = (2.0 / fan_out) ** 0.5
    return jax.random.normal(key, (cout, cin, k, k), jnp.float32) * std


def make_basic_block_params(key, inplanes, planes, stride=1):
    k1, k2, k3 = jax.random.split(key, 3)
    p = {
        "conv1": kaiming_conv(k1, planes, inplanes, 3),
        "bn1": (jnp.ones((planes,), jnp.float32), jnp.zeros((planes,), jnp.float32)),
        "conv2": kaiming_conv(k2, planes, planes, 3),
        "bn2": (jnp.ones((planes,), jnp.float32), jnp.zeros((planes,), jnp.float32)),
        "stride": stride,
    }
    if stride != 1 or inplanes != planes:
        p["ds_conv"] = kaiming_conv(k3, planes, inplanes, 1)
        p["ds_bn"] = (jnp.ones((planes,), jnp.float32), jnp.zeros((planes,), jnp.float32))
    return p


# ---------------------------------------------------------------------------
# Pure-JAX reference (f32) for a loose numerical check
# ---------------------------------------------------------------------------
def _ref_conv_bn(x_nhwc, w_oihw, g, b, *, stride, padding, relu):
    w_hwio = jnp.transpose(w_oihw, (2, 3, 1, 0))
    y = jax.lax.conv_general_dilated(
        x_nhwc, w_hwio, window_strides=(stride, stride),
        padding=[(padding, padding), (padding, padding)],
        dimension_numbers=("NHWC", "HWIO", "NHWC"))
    mean = jnp.mean(y, axis=(0, 1, 2), keepdims=True)
    var = jnp.mean(jnp.square(y - mean), axis=(0, 1, 2), keepdims=True)
    y = g.reshape(1, 1, 1, -1) * (y - mean) * jax.lax.rsqrt(var + EPS) + b.reshape(1, 1, 1, -1)
    return jnp.maximum(y, 0.0) if relu else y


def ref_basic_block(p, x_nhwc):
    out = _ref_conv_bn(x_nhwc, p["conv1"], *p["bn1"], stride=p["stride"], padding=1, relu=True)
    out = _ref_conv_bn(out, p["conv2"], *p["bn2"], stride=1, padding=1, relu=False)
    if "ds_conv" in p:
        identity = _ref_conv_bn(x_nhwc, p["ds_conv"], *p["ds_bn"],
                                stride=p["stride"], padding=0, relu=False)
    else:
        identity = x_nhwc
    return jnp.maximum(out + identity, 0.0)


if __name__ == "__main__":
    key = jax.random.PRNGKey(0)
    kp1, kp2, kx = jax.random.split(key, 3)

    # Stage-entry block: stride 2, channel expansion, with downsample branch.
    p_ds = make_basic_block_params(kp1, inplanes=32, planes=64, stride=2)
    x = jax.random.normal(kx, (2, 32, 16, 16), jnp.float32)   # NCHW, like PyTorch

    out1 = jax.block_until_ready(basic_block_apply(p_ds, x))
    assert out1.shape == (2, 64, 8, 8), out1.shape
    assert bool(jnp.all(jnp.isfinite(out1)))

    # Identity block: stride 1, no downsample, chained on the previous output.
    p_id = make_basic_block_params(kp2, inplanes=64, planes=64, stride=1)
    out2 = jax.block_until_ready(basic_block_apply(p_id, out1))
    assert out2.shape == (2, 64, 8, 8), out2.shape
    assert bool(jnp.all(jnp.isfinite(out2)))

    # Loose check vs f32 reference (matmul operands / intermediates are bf16).
    x_nhwc = jnp.transpose(x, (0, 2, 3, 1))
    ref1 = ref_basic_block(p_ds, x_nhwc)
    err1 = float(jnp.max(jnp.abs(jnp.transpose(out1, (0, 2, 3, 1)) - ref1)))
    ref2 = ref_basic_block(p_id, jnp.transpose(out1, (0, 2, 3, 1)))
    err2 = float(jnp.max(jnp.abs(jnp.transpose(out2, (0, 2, 3, 1)) - ref2)))
    assert err1 < 0.15 and err2 < 0.15, (err1, err2)

    print("KERNEL_OK")
</pallas_src>

<mosaic_0001>
module attributes {stable_mosaic.version = 11 : i64} {
  func.func @_conv1_kernel(%arg0: i32, %arg1: memref<1x4x9x9x128xbf16, #tpu.memory_space<vmem>>, %arg2: memref<3x3x128x128xbf16, #tpu.memory_space<vmem>>, %arg3: memref<128x128xbf16, #tpu.memory_space<vmem>>, %arg4: memref<1x8x8x128xbf16, #tpu.memory_space<vmem>>, %arg5: memref<1x1x128xf32, #tpu.memory_space<vmem>>, %arg6: memref<1x1x128xf32, #tpu.memory_space<vmem>>, %arg7: memref<1x8x8x128xbf16, #tpu.memory_space<vmem>>, %arg8: memref<1x1x128xf32, #tpu.memory_space<vmem>>, %arg9: memref<1x1x128xf32, #tpu.memory_space<vmem>>) attributes {dimension_semantics = [#tpu.dimension_semantics<parallel>], iteration_bounds = array<i64: 2>, scalar_prefetch = 0 : i64, scratch_operands = 0 : i64, tpu.core_type = #tpu.core_type<tc>, window_params = [{transform_indices = @transform_0, window_bounds = array<i64: 1, 4, 9, 9, 128>}, {pipeline_mode = #tpu.pipeline_mode<synchronous>, transform_indices = @transform_1, window_bounds = array<i64: 3, 3, 128, 128>}, {pipeline_mode = #tpu.pipeline_mode<synchronous>, transform_indices = @transform_2, window_bounds = array<i64: 128, 128>}, {transform_indices = @transform_3, window_bounds = array<i64: 1, 8, 8, 128>}, {transform_indices = @transform_4, window_bounds = array<i64: 1, 1, 128>}, {transform_indices = @transform_5, window_bounds = array<i64: 1, 1, 128>}, {transform_indices = @transform_6, window_bounds = array<i64: 1, 8, 8, 128>}, {transform_indices = @transform_7, window_bounds = array<i64: 1, 1, 128>}, {transform_indices = @transform_8, window_bounds = array<i64: 1, 1, 128>}]} {
    %c0 = arith.constant 0 : index
    %c0_0 = arith.constant 0 : index
    %c0_1 = arith.constant 0 : index
    %c0_2 = arith.constant 0 : index
    %c0_3 = arith.constant 0 : index
    %0 = vector.load %arg1[%c0, %c0_0, %c0_1, %c0_2, %c0_3] : memref<1x4x9x9x128xbf16, #tpu.memory_space<vmem>>, vector<1x1x9x9x128xbf16>
    %1 = vector.shape_cast %0 : vector<1x1x9x9x128xbf16> to vector<9x9x128xbf16>
    %c0_4 = arith.constant 0 : index
    %c1 = arith.constant 1 : index
    %c0_5 = arith.constant 0 : index
    %c0_6 = arith.constant 0 : index
    %c0_7 = arith.constant 0 : index
    %2 = vector.load %arg1[%c0_4, %c1, %c0_5, %c0_6, %c0_7] : memref<1x4x9x9x128xbf16, #tpu.memory_space<vmem>>, vector<1x1x9x9x128xbf16>
    %3 = vector.shape_cast %2 : vector<1x1x9x9x128xbf16> to vector<9x9x128xbf16>
    %c0_8 = arith.constant 0 : index
    %c2 = arith.constant 2 : index
    %c0_9 = arith.constant 0 : index
    %c0_10 = arith.constant 0 : index
    %c0_11 = arith.constant 0 : index
    %4 = vector.load %arg1[%c0_8, %c2, %c0_9, %c0_10, %c0_11] : memref<1x4x9x9x128xbf16, #tpu.memory_space<vmem>>, vector<1x1x9x9x128xbf16>
    %5 = vector.shape_cast %4 : vector<1x1x9x9x128xbf16> to vector<9x9x128xbf16>
    %c0_12 = arith.constant 0 : index
    %c3 = arith.constant 3 : index
    %c0_13 = arith.constant 0 : index
    %c0_14 = arith.constant 0 : index
    %c0_15 = arith.constant 0 : index
    %6 = vector.load %arg1[%c0_12, %c3, %c0_13, %c0_14, %c0_15] : memref<1x4x9x9x128xbf16, #tpu.memory_space<vmem>>, vector<1x1x9x9x128xbf16>
    %7 = vector.shape_cast %6 : vector<1x1x9x9x128xbf16> to vector<9x9x128xbf16>
    %cst = arith.constant 0.000000e+00 : f32
    %8 = vector.broadcast %cst : f32 to vector<64x128xf32>
    %cst_16 = arith.constant 0.000000e+00 : f32
    %9 = vector.broadcast %cst_16 : f32 to vector<64x128xf32>
    %10 = vector.extract_strided_slice %1 {offsets = [0, 0, 0], sizes = [8, 8, 128], strides = [1, 1, 1]} : vector<9x9x128xbf16> to vector<8x8x128xbf16>
    %11 = vector.shape_cast %10 : vector<8x8x128xbf16> to vector<64x128xbf16>
    %c0_17 = arith.constant 0 : index
    %c0_18 = arith.constant 0 : index
    %c0_19 = arith.constant 0 : index
    %c0_20 = arith.constant 0 : index
    %12 = vector.load %arg2[%c0_17, %c0_18, %c0_19, %c0_20] : memref<3x3x128x128xbf16, #tpu.memory_space<vmem>>, vector<1x1x128x128xbf16>
    %13 = vector.shape_cast %12 : vector<1x1x128x128xbf16> to vector<128x128xbf16>
    %cst_21 = arith.constant dense<0.000000e+00> : vector<64x128xf32>
    %14 = tpu.matmul %11, %13, %cst_21 {dimension_numbers = #tpu.dot_dimension_numbers<[1], [0], [0], [1], [0, 0, 1, 1], [], []>} : vector<64x128xbf16>, vector<128x128xbf16>, vector<64x128xf32> -> vector<64x128xf32>
    %15 = arith.addf %8, %14 : vector<64x128xf32>
    %16 = vector.extract_strided_slice %3 {offsets = [0, 0, 0], sizes = [8, 8, 128], strides = [1, 1, 1]} : vector<9x9x128xbf16> to vector<8x8x128xbf16>
    %17 = vector.shape_cast %16 : vector<8x8x128xbf16> to vector<64x128xbf16>
    %c0_22 = arith.constant 0 : index
    %c1_23 = arith.constant 1 : index
    %c0_24 = arith.constant 0 : index
    %c0_25 = arith.constant 0 : index
    %18 = vector.load %arg2[%c0_22, %c1_23, %c0_24, %c0_25] : memref<3x3x128x128xbf16, #tpu.memory_space<vmem>>, vector<1x1x128x128xbf16>
    %19 = vector.shape_cast %18 : vector<1x1x128x128xbf16> to vector<128x128xbf16>
    %cst_26 = arith.constant dense<0.000000e+00> : vector<64x128xf32>
    %20 = tpu.matmul %17, %19, %cst_26 {dimension_numbers = #tpu.dot_dimension_numbers<[1], [0], [0], [1], [0, 0, 1, 1], [], []>} : vector<64x128xbf16>, vector<128x128xbf16>, vector<64x128xf32> -> vector<64x128xf32>
    %21 = arith.addf %15, %20 : vector<64x128xf32>
    %22 = vector.extract_strided_slice %1 {offsets = [0, 1, 0], sizes = [8, 8, 128], strides = [1, 1, 1]} : vector<9x9x128xbf16> to vector<8x8x128xbf16>
    %23 = vector.shape_cast %22 : vector<8x8x128xbf16> to vector<64x128xbf16>
    %c0_27 = arith.constant 0 : index
    %c2_28 = arith.constant 2 : index
    %c0_29 = arith.constant 0 : index
    %c0_30 = arith.constant 0 : index
    %24 = vector.load %arg2[%c0_27, %c2_28, %c0_29, %c0_30] : memref<3x3x128x128xbf16, #tpu.memory_space<vmem>>, vector<1x1x128x128xbf16>
    %25 = vector.shape_cast %24 : vector<1x1x128x128xbf16> to vector<128x128xbf16>
    %cst_31 = arith.constant dense<0.000000e+00> : vector<64x128xf32>
    %26 = tpu.matmul %23, %25, %cst_31 {dimension_numbers = #tpu.dot_dimension_numbers<[1], [0], [0], [1], [0, 0, 1, 1], [], []>} : vector<64x128xbf16>, vector<128x128xbf16>, vector<64x128xf32> -> vector<64x128xf32>
    %27 = arith.addf %21, %26 : vector<64x128xf32>
    %28 = vector.extract_strided_slice %5 {offsets = [0, 0, 0], sizes = [8, 8, 128], strides = [1, 1, 1]} : vector<9x9x128xbf16> to vector<8x8x128xbf16>
    %29 = vector.shape_cast %28 : vector<8x8x128xbf16> to vector<64x128xbf16>
    %c1_32 = arith.constant 1 : index
    %c0_33 = arith.constant 0 : index
    %c0_34 = arith.constant 0 : index
    %c0_35 = arith.constant 0 : index
    %30 = vector.load %arg2[%c1_32, %c0_33, %c0_34, %c0_35] : memref<3x3x128x128xbf16, #tpu.memory_space<vmem>>, vector<1x1x128x128xbf16>
    %31 = vector.shape_cast %30 : vector<1x1x128x128xbf16> to vector<128x128xbf16>
    %cst_36 = arith.constant dense<0.000000e+00> : vector<64x128xf32>
    %32 = tpu.matmul %29, %31, %cst_36 {dimension_numbers = #tpu.dot_dimension_numbers<[1], [0], [0], [1], [0, 0, 1, 1], [], []>} : vector<64x128xbf16>, vector<128x128xbf16>, vector<64x128xf32> -> vector<64x128xf32>
    %33 = arith.addf %27, %32 : vector<64x128xf32>
    %34 = vector.extract_strided_slice %7 {offsets = [0, 0, 0], sizes = [8, 8, 128], strides = [1, 1, 1]} : vector<9x9x128xbf16> to vector<8x8x128xbf16>
    %35 = vector.shape_cast %34 : vector<8x8x128xbf16> to vector<64x128xbf16>
    %c1_37 = arith.constant 1 : index
    %c1_38 = arith.constant 1 : index
    %c0_39 = arith.constant 0 : index
    %c0_40 = arith.constant 0 : index
    %36 = vector.load %arg2[%c1_37, %c1_38, %c0_39, %c0_40] : memref<3x3x128x128xbf16, #tpu.memory_space<vmem>>, vector<1x1x128x128xbf16>
    %37 = vector.shape_cast %36 : vector<1x1x128x128xbf16> to vector<128x128xbf16>
    %cst_41 = arith.constant dense<0.000000e+00> : vector<64x128xf32>
    %38 = tpu.matmul %35, %37, %cst_41 {dimension_numbers = #tpu.dot_dimension_numbers<[1], [0], [0], [1], [0, 0, 1, 1], [], []>} : vector<64x128xbf16>, vector<128x128xbf16>, vector<64x128xf32> -> vector<64x128xf32>
    %39 = arith.addf %33, %38 : vector<64x128xf32>
    %c0_42 = arith.constant 0 : index
    %c0_43 = arith.constant 0 : index
    %40 = vector.load %arg3[%c0_42, %c0_43] : memref<128x128xbf16, #tpu.memory_space<vmem>>, vector<128x128xbf16>
    %cst_44 = arith.constant dense<0.000000e+00> : vector<64x128xf32>
    %41 = tpu.matmul %35, %40, %cst_44 {dimension_numbers = #tpu.dot_dimension_numbers<[1], [0], [0], [1], [0, 0, 1, 1], [], []>} : vector<64x128xbf16>, vector<128x128xbf16>, vector<64x128xf32> -> vector<64x128xf32>
    %42 = arith.addf %9, %41 : vector<64x128xf32>
    %43 = vector.extract_strided_slice %5 {offsets = [0, 1, 0], sizes = [8, 8, 128], strides = [1, 1, 1]} : vector<9x9x128xbf16> to vector<8x8x128xbf16>
    %44 = vector.shape_cast %43 : vector<8x8x128xbf16> to vector<64x128xbf16>
    %c1_45 = arith.constant 1 : index
    %c2_46 = arith.constant 2 : index
    %c0_47 = arith.constant 0 : index
    %c0_48 = arith.constant 0 : index
    %45 = vector.load %arg2[%c1_45, %c2_46, %c0_47, %c0_48] : memref<3x3x128x128xbf16, #tpu.memory_space<vmem>>, vector<1x1x128x128xbf16>
    %46 = vector.shape_cast %45 : vector<1x1x128x128xbf16> to vector<128x128xbf16>
    %cst_49 = arith.constant dense<0.000000e+00> : vector<64x128xf32>
    %47 = tpu.matmul %44, %46, %cst_49 {dimension_numbers = #tpu.dot_dimension_numbers<[1], [0], [0], [1], [0, 0, 1, 1], [], []>} : vector<64x128xbf16>, vector<128x128xbf16>, vector<64x128xf32> -> vector<64x128xf32>
    %48 = arith.addf %39, %47 : vector<64x128xf32>
    %49 = vector.extract_strided_slice %1 {offsets = [1, 0, 0], sizes = [8, 8, 128], strides = [1, 1, 1]} : vector<9x9x128xbf16> to vector<8x8x128xbf16>
    %50 = vector.shape_cast %49 : vector<8x8x128xbf16> to vector<64x128xbf16>
    %c2_50 = arith.constant 2 : index
    %c0_51 = arith.constant 0 : index
    %c0_52 = arith.constant 0 : index
    %c0_53 = arith.constant 0 : index
    %51 = vector.load %arg2[%c2_50, %c0_51, %c0_52, %c0_53] : memref<3x3x128x128xbf16, #tpu.memory_space<vmem>>, vector<1x1x128x128xbf16>
    %52 = vector.shape_cast %51 : vector<1x1x128x128xbf16> to vector<128x128xbf16>
    %cst_54 = arith.constant dense<0.000000e+00> : vector<64x128xf32>
    %53 = tpu.matmul %50, %52, %cst_54 {dimension_numbers = #tpu.dot_dimension_numbers<[1], [0], [0], [1], [0, 0, 1, 1], [], []>} : vector<64x128xbf16>, vector<128x128xbf16>, vector<64x128xf32> -> vector<64x128xf32>
    %54 = arith.addf %48, %53 : vector<64x128xf32>
    %55 = vector.extract_strided_slice %3 {offsets = [1, 0, 0], sizes = [8, 8, 128], strides = [1, 1, 1]} : vector<9x9x128xbf16> to vector<8x8x128xbf16>
    %56 = vector.shape_cast %55 : vector<8x8x128xbf16> to vector<64x128xbf16>
    %c2_55 = arith.constant 2 : index
    %c1_56 = arith.constant 1 : index
    %c0_57 = arith.constant 0 : index
    %c0_58 = arith.constant 0 : index
    %57 = vector.load %arg2[%c2_55, %c1_56, %c0_57, %c0_58] : memref<3x3x128x128xbf16, #tpu.memory_space<vmem>>, vector<1x1x128x128xbf16>
    %58 = vector.shape_cast %57 : vector<1x1x128x128xbf16> to vector<128x128xbf16>
    %cst_59 = arith.constant dense<0.000000e+00> : vector<64x128xf32>
    %59 = tpu.matmul %56, %58, %cst_59 {dimension_numbers = #tpu.dot_dimension_numbers<[1], [0], [0], [1], [0, 0, 1, 1], [], []>} : vector<64x128xbf16>, vector<128x128xbf16>, vector<64x128xf32> -> vector<64x128xf32>
    %60 = arith.addf %54, %59 : vector<64x128xf32>
    %61 = vector.extract_strided_slice %1 {offsets = [1, 1, 0], sizes = [8, 8, 128], strides = [1, 1, 1]} : vector<9x9x128xbf16> to vector<8x8x128xbf16>
    %62 = vector.shape_cast %61 : vector<8x8x128xbf16> to vector<64x128xbf16>
    %c2_60 = arith.constant 2 : index
    %c2_61 = arith.constant 2 : index
    %c0_62 = arith.constant 0 : index
    %c0_63 = arith.constant 0 : index
    %63 = vector.load %arg2[%c2_60, %c2_61, %c0_62, %c0_63] : memref<3x3x128x128xbf16, #tpu.memory_space<vmem>>, vector<1x1x128x128xbf16>
    %64 = vector.shape_cast %63 : vector<1x1x128x128xbf16> to vector<128x128xbf16>
    %cst_64 = arith.constant dense<0.000000e+00> : vector<64x128xf32>
    %65 = tpu.matmul %62, %64, %cst_64 {dimension_numbers = #tpu.dot_dimension_numbers<[1], [0], [0], [1], [0, 0, 1, 1], [], []>} : vector<64x128xbf16>, vector<128x128xbf16>, vector<64x128xf32> -> vector<64x128xf32>
    %66 = arith.addf %60, %65 : vector<64x128xf32>
    %67 = vector.shape_cast %66 : vector<64x128xf32> to vector<1x8x8x128xf32>
    %68 = arith.truncf %67 : vector<1x8x8x128xf32> to vector<1x8x8x128xbf16>
    %c0_65 = arith.constant 0 : index
    %c0_66 = arith.constant 0 : index
    %c0_67 = arith.constant 0 : index
    %c0_68 = arith.constant 0 : index
    %69 = vector.load %arg4[%c0_65, %c0_66, %c0_67, %c0_68] : memref<1x8x8x128xbf16, #tpu.memory_space<vmem>>, vector<1x8x8x128xbf16>
    tpu.vector_store %arg4[%c0_65, %c0_66, %c0_67, %c0_68], %68 {strides = array<i32>} : memref<1x8x8x128xbf16, #tpu.memory_space<vmem>>, vector<1x8x8x128xbf16>,
    %cst_69 = arith.constant dense<0.000000e+00> : vector<128xf32>
    %70 = vector.multi_reduction <add>, %66, %cst_69 [0] : vector<64x128xf32> to vector<128xf32>
    %71 = vector.shape_cast %70 : vector<128xf32> to vector<1x128xf32>
    %72 = vector.shape_cast %71 : vector<1x128xf32> to vector<1x1x128xf32>
    %c0_70 = arith.constant 0 : index
    %c0_71 = arith.constant 0 : index
    %c0_72 = arith.constant 0 : index
    %73 = vector.load %arg5[%c0_70, %c0_71, %c0_72] : memref<1x1x128xf32, #tpu.memory_space<vmem>>, vector<1x1x128xf32>
    tpu.vector_store %arg5[%c0_70, %c0_71, %c0_72], %72 {strides = array<i32>} : memref<1x1x128xf32, #tpu.memory_space<vmem>>, vector<1x1x128xf32>,
    %74 = arith.mulf %66, %66 : vector<64x128xf32>
    %cst_73 = arith.constant dense<0.000000e+00> : vector<128xf32>
    %75 = vector.multi_reduction <add>, %74, %cst_73 [0] : vector<64x128xf32> to vector<128xf32>
    %76 = vector.shape_cast %75 : vector<128xf32> to vector<1x128xf32>
    %77 = vector.shape_cast %76 : vector<1x128xf32> to vector<1x1x128xf32>
    %c0_74 = arith.constant 0 : index
    %c0_75 = arith.constant 0 : index
    %c0_76 = arith.constant 0 : index
    %78 = vector.load %arg6[%c0_74, %c0_75, %c0_76] : memref<1x1x128xf32, #tpu.memory_space<vmem>>, vector<1x1x128xf32>
    tpu.vector_store %arg6[%c0_74, %c0_75, %c0_76], %77 {strides = array<i32>} : memref<1x1x128xf32, #tpu.memory_space<vmem>>, vector<1x1x128xf32>,
    %79 = vector.shape_cast %42 : vector<64x128xf32> to vector<1x8x8x128xf32>
    %80 = arith.truncf %79 : vector<1x8x8x128xf32> to vector<1x8x8x128xbf16>
    %c0_77 = arith.constant 0 : index
    %c0_78 = arith.constant 0 : index
    %c0_79 = arith.constant 0 : index
    %c0_80 = arith.constant 0 : index
    %81 = vector.load %arg7[%c0_77, %c0_78, %c0_79, %c0_80] : memref<1x8x8x128xbf16, #tpu.memory_space<vmem>>, vector<1x8x8x128xbf16>
    tpu.vector_store %arg7[%c0_77, %c0_78, %c0_79, %c0_80], %80 {strides = array<i32>} : memref<1x8x8x128xbf16, #tpu.memory_space<vmem>>, vector<1x8x8x128xbf16>,
    %cst_81 = arith.constant dense<0.000000e+00> : vector<128xf32>
    %82 = vector.multi_reduction <add>, %42, %cst_81 [0] : vector<64x128xf32> to vector<128xf32>
    %83 = vector.shape_cast %82 : vector<128xf32> to vector<1x128xf32>
    %84 = vector.shape_cast %83 : vector<1x128xf32> to vector<1x1x128xf32>
    %c0_82 = arith.constant 0 : index
    %c0_83 = arith.constant 0 : index
    %c0_84 = arith.constant 0 : index
    %85 = vector.load %arg8[%c0_82, %c0_83, %c0_84] : memref<1x1x128xf32, #tpu.memory_space<vmem>>, vector<1x1x128xf32>
    tpu.vector_store %arg8[%c0_82, %c0_83, %c0_84], %84 {strides = array<i32>} : memref<1x1x128xf32, #tpu.memory_space<vmem>>, vector<1x1x128xf32>,
    %86 = arith.mulf %42, %42 : vector<64x128xf32>
    %cst_85 = arith.constant dense<0.000000e+00> : vector<128xf32>
    %87 = vector.multi_reduction <add>, %86, %cst_85 [0] : vector<64x128xf32> to vector<128xf32>
    %88 = vector.shape_cast %87 : vector<128xf32> to vector<1x128xf32>
    %89 = vector.shape_cast %88 : vector<1x128xf32> to vector<1x1x128xf32>
    %c0_86 = arith.constant 0 : index
    %c0_87 = arith.constant 0 : index
    %c0_88 = arith.constant 0 : index
    %90 = vector.load %arg9[%c0_86, %c0_87, %c0_88] : memref<1x1x128xf32, #tpu.memory_space<vmem>>, vector<1x1x128xf32>
    tpu.vector_store %arg9[%c0_86, %c0_87, %c0_88], %89 {strides = array<i32>} : memref<1x1x128xf32, #tpu.memory_space<vmem>>, vector<1x1x128xf32>,
    return
  }
  func.func @transform_0(%arg0: i32) -> (i32, i32, i32, i32, i32) {
    %c0_i32 = arith.constant 0 : i32
    %c0_i32_0 = arith.constant 0 : i32
    %c0_i32_1 = arith.constant 0 : i32
    %c0_i32_2 = arith.constant 0 : i32
    %c0_i32_3 = arith.constant 0 : i32
    return %arg0, %c0_i32, %c0_i32_0, %c0_i32_1, %c0_i32_2 : i32, i32, i32, i32, i32
  }
  func.func @transform_1(%arg0: i32) -> (i32, i32, i32, i32) {
    %c0_i32 = arith.constant 0 : i32
    %c0_i32_0 = arith.constant 0 : i32
    %c0_i32_1 = arith.constant 0 : i32
    %c0_i32_2 = arith.constant 0 : i32
    %c0_i32_3 = arith.constant 0 : i32
    return %c0_i32, %c0_i32_0, %c0_i32_1, %c0_i32_2 : i32, i32, i32, i32
  }
  func.func @transform_2(%arg0: i32) -> (i32, i32) {
    %c0_i32 = arith.constant 0 : i32
    %c0_i32_0 = arith.constant 0 : i32
    %c0_i32_1 = arith.constant 0 : i32
    return %c0_i32, %c0_i32_0 : i32, i32
  }
  func.func @transform_3(%arg0: i32) -> (i32, i32, i32, i32) {
    %c0_i32 = arith.constant 0 : i32
    %c0_i32_0 = arith.constant 0 : i32
    %c0_i32_1 = arith.constant 0 : i32
    %c0_i32_2 = arith.constant 0 : i32
    return %arg0, %c0_i32, %c0_i32_0, %c0_i32_1 : i32, i32, i32, i32
  }
  func.func @transform_4(%arg0: i32) -> (i32, i32, i32) {
    %c0_i32 = arith.constant 0 : i32
    %c0_i32_0 = arith.constant 0 : i32
    %c0_i32_1 = arith.constant 0 : i32
    return %arg0, %c0_i32, %c0_i32_0 : i32, i32, i32
  }
  func.func @transform_5(%arg0: i32) -> (i32, i32, i32) {
    %c0_i32 = arith.constant 0 : i32
    %c0_i32_0 = arith.constant 0 : i32
    %c0_i32_1 = arith.constant 0 : i32
    return %arg0, %c0_i32, %c0_i32_0 : i32, i32, i32
  }
  func.func @transform_6(%arg0: i32) -> (i32, i32, i32, i32) {
    %c0_i32 = arith.constant 0 : i32
    %c0_i32_0 = arith.constant 0 : i32
    %c0_i32_1 = arith.constant 0 : i32
    %c0_i32_2 = arith.constant 0 : i32
    return %arg0, %c0_i32, %c0_i32_0, %c0_i32_1 : i32, i32, i32, i32
  }
  func.func @transform_7(%arg0: i32) -> (i32, i32, i32) {
    %c0_i32 = arith.constant 0 : i32
    %c0_i32_0 = arith.constant 0 : i32
    %c0_i32_1 = arith.constant 0 : i32
    return %arg0, %c0_i32, %c0_i32_0 : i32, i32, i32
  }
  func.func @transform_8(%arg0: i32) -> (i32, i32, i32) {
    %c0_i32 = arith.constant 0 : i32
    %c0_i32_0 = arith.constant 0 : i32
    %c0_i32_1 = arith.constant 0 : i32
    return %arg0, %c0_i32, %c0_i32_0 : i32, i32, i32
  }
}

module attributes {stable_mosaic.version = 11 : i64} {
  func.func @_conv2_kernel(%arg0: i32, %arg1: memref<1x8x8x128xbf16, #tpu.memory_space<vmem>>, %arg2: memref<3x3x128x128xbf16, #tpu.memory_space<vmem>>, %arg3: memref<1x1x128xf32, #tpu.memory_space<vmem>>, %arg4: memref<1x1x128xf32, #tpu.memory_space<vmem>>, %arg5: memref<1x8x8x128xbf16, #tpu.memory_space<vmem>>, %arg6: memref<1x1x128xf32, #tpu.memory_space<vmem>>, %arg7: memref<1x1x128xf32, #tpu.memory_space<vmem>>, %arg8: memref<10x10x128xbf16, #tpu.memory_space<vmem>>) attributes {dimension_semantics = [#tpu.dimension_semantics<parallel>], iteration_bounds = array<i64: 2>, scalar_prefetch = 0 : i64, scratch_operands = 1 : i64, tpu.core_type = #tpu.core_type<tc>, window_params = [{transform_indices = @transform_0, window_bounds = array<i64: 1, 8, 8, 128>}, {pipeline_mode = #tpu.pipeline_mode<synchronous>, transform_indices = @transform_1, window_bounds = array<i64: 3, 3, 128, 128>}, {pipeline_mode = #tpu.pipeline_mode<synchronous>, transform_indices = @transform_2, window_bounds = array<i64: 1, 1, 128>}, {pipeline_mode = #tpu.pipeline_mode<synchronous>, transform_indices = @transform_3, window_bounds = array<i64: 1, 1, 128>}, {transform_indices = @transform_4, window_bounds = array<i64: 1, 8, 8, 128>}, {transform_indices = @transform_5, window_bounds = array<i64: 1, 1, 128>}, {transform_indices = @transform_6, window_bounds = array<i64: 1, 1, 128>}]} {
    %c0 = arith.constant 0 : index
    %c0_0 = arith.constant 0 : index
    %c0_1 = arith.constant 0 : index
    %c0_2 = arith.constant 0 : index
    %0 = vector.load %arg1[%c0, %c0_0, %c0_1, %c0_2] : memref<1x8x8x128xbf16, #tpu.memory_space<vmem>>, vector<1x8x8x128xbf16>
    %1 = vector.shape_cast %0 : vector<1x8x8x128xbf16> to vector<8x8x128xbf16>
    %2 = arith.extf %1 : vector<8x8x128xbf16> to vector<8x8x128xf32>
    %c0_3 = arith.constant 0 : index
    %c0_4 = arith.constant 0 : index
    %c0_5 = arith.constant 0 : index
    %3 = vector.load %arg3[%c0_3, %c0_4, %c0_5] : memref<1x1x128xf32, #tpu.memory_space<vmem>>, vector<1x1x128xf32>
    %4 = vector.shape_cast %3 : vector<1x1x128xf32> to vector<1x128xf32>
    %5 = vector.shape_cast %4 : vector<1x128xf32> to vector<1x1x128xf32>
    %6 = vector.broadcast %5 : vector<1x1x128xf32> to vector<8x8x128xf32>
    %7 = arith.mulf %2, %6 : vector<8x8x128xf32>
    %c0_6 = arith.constant 0 : index
    %c0_7 = arith.constant 0 : index
    %c0_8 = arith.constant 0 : index
    %8 = vector.load %arg4[%c0_6, %c0_7, %c0_8] : memref<1x1x128xf32, #tpu.memory_space<vmem>>, vector<1x1x128xf32>
    %9 = vector.shape_cast %8 : vector<1x1x128xf32> to vector<1x128xf32>
    %10 = vector.shape_cast %9 : vector<1x128xf32> to vector<1x1x128xf32>
    %11 = vector.broadcast %10 : vector<1x1x128xf32> to vector<8x8x128xf32>
    %12 = arith.addf %7, %11 : vector<8x8x128xf32>
    %cst = arith.constant 0.000000e+00 : f32
    %13 = vector.broadcast %cst : f32 to vector<8x8x128xf32>
    %14 = arith.maximumf %12, %13 : vector<8x8x128xf32>
    %15 = arith.truncf %14 : vector<8x8x128xf32> to vector<8x8x128xbf16>
    %cst_9 = arith.constant 0.000000e+00 : bf16
    %16 = vector.broadcast %cst_9 : bf16 to vector<10x10x128xbf16>
    %c0_10 = arith.constant 0 : index
    %c0_11 = arith.constant 0 : index
    %c0_12 = arith.constant 0 : index
    %17 = vector.load %arg8[%c0_10, %c0_11, %c0_12] : memref<10x10x128xbf16, #tpu.memory_space<vmem>>, vector<10x10x128xbf16>
    tpu.vector_store %arg8[%c0_10, %c0_11, %c0_12], %16 {strides = array<i32>} : memref<10x10x128xbf16, #tpu.memory_space<vmem>>, vector<10x10x128xbf16>,
    %c1 = arith.constant 1 : index
    %c1_13 = arith.constant 1 : index
    %c0_14 = arith.constant 0 : index
    %18 = vector.load %arg8[%c1, %c1_13, %c0_14] : memref<10x10x128xbf16, #tpu.memory_space<vmem>>, vector<8x8x128xbf16>
    tpu.vector_store %arg8[%c1, %c1_13, %c0_14], %15 {strides = array<i32>} : memref<10x10x128xbf16, #tpu.memory_space<vmem>>, vector<8x8x128xbf16>,
    %c0_15 = arith.constant 0 : index
    %c0_16 = arith.constant 0 : index
    %c0_17 = arith.constant 0 : index
    %19 = vector.load %arg8[%c0_15, %c0_16, %c0_17] : memref<10x10x128xbf16, #tpu.memory_space<vmem>>, vector<10x10x128xbf16>
    %cst_18 = arith.constant 0.000000e+00 : f32
    %20 = vector.broadcast %cst_18 : f32 to vector<64x128xf32>
    %21 = vector.extract_strided_slice %19 {offsets = [0, 0, 0], sizes = [8, 8, 128], strides = [1, 1, 1]} : vector<10x10x128xbf16> to vector<8x8x128xbf16>
    %22 = vector.shape_cast %21 : vector<8x8x128xbf16> to vector<64x128xbf16>
    %c0_19 = arith.constant 0 : index
    %c0_20 = arith.constant 0 : index
    %c0_21 = arith.constant 0 : index
    %c0_22 = arith.constant 0 : index
    %23 = vector.load %arg2[%c0_19, %c0_20, %c0_21, %c0_22] : memref<3x3x128x128xbf16, #tpu.memory_space<vmem>>, vector<1x1x128x128xbf16>
    %24 = vector.shape_cast %23 : vector<1x1x128x128xbf16> to vector<128x128xbf16>
    %cst_23 = arith.constant dense<0.000000e+00> : vector<64x128xf32>
    %25 = tpu.matmul %22, %24, %cst_23 {dimension_numbers = #tpu.dot_dimension_numbers<[1], [0], [0], [1], [0, 0, 1, 1], [], []>} : vector<64x128xbf16>, vector<128x128xbf16>, vector<64x128xf32> -> vector<64x128xf32>
    %26 = arith.addf %20, %25 : vector<64x128xf32>
    %27 = vector.extract_strided_slice %19 {offsets = [0, 1, 0], sizes = [8, 8, 128], strides = [1, 1, 1]} : vector<10x10x128xbf16> to vector<8x8x128xbf16>
    %28 = vector.shape_cast %27 : vector<8x8x128xbf16> to vector<64x128xbf16>
    %c0_24 = arith.constant 0 : index
    %c1_25 = arith.constant 1 : index
    %c0_26 = arith.constant 0 : index
    %c0_27 = arith.constant 0 : index
    %29 = vector.load %arg2[%c0_24, %c1_25, %c0_26, %c0_27] : memref<3x3x128x128xbf16, #tpu.memory_space<vmem>>, vector<1x1x128x128xbf16>
    %30 = vector.shape_cast %29 : vector<1x1x128x128xbf16> to vector<128x128xbf16>
    %cst_28 = arith.constant dense<0.000000e+00> : vector<64x128xf32>
    %31 = tpu.matmul %28, %30, %cst_28 {dimension_numbers = #tpu.dot_dimension_numbers<[1], [0], [0], [1], [0, 0, 1, 1], [], []>} : vector<64x128xbf16>, vector<128x128xbf16>, vector<64x128xf32> -> vector<64x128xf32>
    %32 = arith.addf %26, %31 : vector<64x128xf32>
    %33 = vector.extract_strided_slice %19 {offsets = [0, 2, 0], sizes = [8, 8, 128], strides = [1, 1, 1]} : vector<10x10x128xbf16> to vector<8x8x128xbf16>
    %34 = vector.shape_cast %33 : vector<8x8x128xbf16> to vector<64x128xbf16>
    %c0_29 = arith.constant 0 : index
    %c2 = arith.constant 2 : index
    %c0_30 = arith.constant 0 : index
    %c0_31 = arith.constant 0 : index
    %35 = vector.load %arg2[%c0_29, %c2, %c0_30, %c0_31] : memref<3x3x128x128xbf16, #tpu.memory_space<vmem>>, vector<1x1x128x128xbf16>
    %36 = vector.shape_cast %35 : vector<1x1x128x128xbf16> to vector<128x128xbf16>
    %cst_32 = arith.constant dense<0.000000e+00> : vector<64x128xf32>
    %37 = tpu.matmul %34, %36, %cst_32 {dimension_numbers = #tpu.dot_dimension_numbers<[1], [0], [0], [1], [0, 0, 1, 1], [], []>} : vector<64x128xbf16>, vector<128x128xbf16>, vector<64x128xf32> -> vector<64x128xf32>
    %38 = arith.addf %32, %37 : vector<64x128xf32>
    %39 = vector.extract_strided_slice %19 {offsets = [1, 0, 0], sizes = [8, 8, 128], strides = [1, 1, 1]} : vector<10x10x128xbf16> to vector<8x8x128xbf16>
    %40 = vector.shape_cast %39 : vector<8x8x128xbf16> to vector<64x128xbf16>
    %c1_33 = arith.constant 1 : index
    %c0_34 = arith.constant 0 : index
    %c0_35 = arith.constant 0 : index
    %c0_36 = arith.constant 0 : index
    %41 = vector.load %arg2[%c1_33, %c0_34, %c0_35, %c0_36] : memref<3x3x128x128xbf16, #tpu.memory_space<vmem>>, vector<1x1x128x128xbf16>
    %42 = vector.shape_cast %41 : vector<1x1x128x128xbf16> to vector<128x128xbf16>
    %cst_37 = arith.constant dense<0.000000e+00> : vector<64x128xf32>
    %43 = tpu.matmul %40, %42, %cst_37 {dimension_numbers = #tpu.dot_dimension_numbers<[1], [0], [0], [1], [0, 0, 1, 1], [], []>} : vector<64x128xbf16>, vector<128x128xbf16>, vector<64x128xf32> -> vector<64x128xf32>
    %44 = arith.addf %38, %43 : vector<64x128xf32>
    %45 = vector.extract_strided_slice %19 {offsets = [1, 1, 0], sizes = [8, 8, 128], strides = [1, 1, 1]} : vector<10x10x128xbf16> to vector<8x8x128xbf16>
    %46 = vector.shape_cast %45 : vector<8x8x128xbf16> to vector<64x128xbf16>
    %c1_38 = arith.constant 1 : index
    %c1_39 = arith.constant 1 : index
    %c0_40 = arith.constant 0 : index
    %c0_41 = arith.constant 0 : index
    %47 = vector.load %arg2[%c1_38, %c1_39, %c0_40, %c0_41] : memref<3x3x128x128xbf16, #tpu.memory_space<vmem>>, vector<1x1x128x128xbf16>
    %48 = vector.shape_cast %47 : vector<1x1x128x128xbf16> to vector<128x128xbf16>
    %cst_42 = arith.constant dense<0.000000e+00> : vector<64x128xf32>
    %49 = tpu.matmul %46, %48, %cst_42 {dimension_numbers = #tpu.dot_dimension_numbers<[1], [0], [0], [1], [0, 0, 1, 1], [], []>} : vector<64x128xbf16>, vector<128x128xbf16>, vector<64x128xf32> -> vector<64x128xf32>
    %50 = arith.addf %44, %49 : vector<64x128xf32>
    %51 = vector.extract_strided_slice %19 {offsets = [1, 2, 0], sizes = [8, 8, 128], strides = [1, 1, 1]} : vector<10x10x128xbf16> to vector<8x8x128xbf16>
    %52 = vector.shape_cast %51 : vector<8x8x128xbf16> to vector<64x128xbf16>
    %c1_43 = arith.constant 1 : index
    %c2_44 = arith.constant 2 : index
    %c0_45 = arith.constant 0 : index
    %c0_46 = arith.constant 0 : index
    %53 = vector.load %arg2[%c1_43, %c2_44, %c0_45, %c0_46] : memref<3x3x128x128xbf16, #tpu.memory_space<vmem>>, vector<1x1x128x128xbf16>
    %54 = vector.shape_cast %53 : vector<1x1x128x128xbf16> to vector<128x128xbf16>
    %cst_47 = arith.constant dense<0.000000e+00> : vector<64x128xf32>
    %55 = tpu.matmul %52, %54, %cst_47 {dimension_numbers = #tpu.dot_dimension_numbers<[1], [0], [0], [1], [0, 0, 1, 1], [], []>} : vector<64x128xbf16>, vector<128x128xbf16>, vector<64x128xf32> -> vector<64x128xf32>
    %56 = arith.addf %50, %55 : vector<64x128xf32>
    %57 = vector.extract_strided_slice %19 {offsets = [2, 0, 0], sizes = [8, 8, 128], strides = [1, 1, 1]} : vector<10x10x128xbf16> to vector<8x8x128xbf16>
    %58 = vector.shape_cast %57 : vector<8x8x128xbf16> to vector<64x128xbf16>
    %c2_48 = arith.constant 2 : index
    %c0_49 = arith.constant 0 : index
    %c0_50 = arith.constant 0 : index
    %c0_51 = arith.constant 0 : index
    %59 = vector.load %arg2[%c2_48, %c0_49, %c0_50, %c0_51] : memref<3x3x128x128xbf16, #tpu.memory_space<vmem>>, vector<1x1x128x128xbf16>
    %60 = vector.shape_cast %59 : vector<1x1x128x128xbf16> to vector<128x128xbf16>
    %cst_52 = arith.constant dense<0.000000e+00> : vector<64x128xf32>
    %61 = tpu.matmul %58, %60, %cst_52 {dimension_numbers = #tpu.dot_dimension_numbers<[1], [0], [0], [1], [0, 0, 1, 1], [], []>} : vector<64x128xbf16>, vector<128x128xbf16>, vector<64x128xf32> -> vector<64x128xf32>
    %62 = arith.addf %56, %61 : vector<64x128xf32>
    %63 = vector.extract_strided_slice %19 {offsets = [2, 1, 0], sizes = [8, 8, 128], strides = [1, 1, 1]} : vector<10x10x128xbf16> to vector<8x8x128xbf16>
    %64 = vector.shape_cast %63 : vector<8x8x128xbf16> to vector<64x128xbf16>
    %c2_53 = arith.constant 2 : index
    %c1_54 = arith.constant 1 : index
    %c0_55 = arith.constant 0 : index
    %c0_56 = arith.constant 0 : index
    %65 = vector.load %arg2[%c2_53, %c1_54, %c0_55, %c0_56] : memref<3x3x128x128xbf16, #tpu.memory_space<vmem>>, vector<1x1x128x128xbf16>
    %66 = vector.shape_cast %65 : vector<1x1x128x128xbf16> to vector<128x128xbf16>
    %cst_57 = arith.constant dense<0.000000e+00> : vector<64x128xf32>
    %67 = tpu.matmul %64, %66, %cst_57 {dimension_numbers = #tpu.dot_dimension_numbers<[1], [0], [0], [1], [0, 0, 1, 1], [], []>} : vector<64x128xbf16>, vector<128x128xbf16>, vector<64x128xf32> -> vector<64x128xf32>
    %68 = arith.addf %62, %67 : vector<64x128xf32>
    %69 = vector.extract_strided_slice %19 {offsets = [2, 2, 0], sizes = [8, 8, 128], strides = [1, 1, 1]} : vector<10x10x128xbf16> to vector<8x8x128xbf16>
    %70 = vector.shape_cast %69 : vector<8x8x128xbf16> to vector<64x128xbf16>
    %c2_58 = arith.constant 2 : index
    %c2_59 = arith.constant 2 : index
    %c0_60 = arith.constant 0 : index
    %c0_61 = arith.constant 0 : index
    %71 = vector.load %arg2[%c2_58, %c2_59, %c0_60, %c0_61] : memref<3x3x128x128xbf16, #tpu.memory_space<vmem>>, vector<1x1x128x128xbf16>
    %72 = vector.shape_cast %71 : vector<1x1x128x128xbf16> to vector<128x128xbf16>
    %cst_62 = arith.constant dense<0.000000e+00> : vector<64x128xf32>
    %73 = tpu.matmul %70, %72, %cst_62 {dimension_numbers = #tpu.dot_dimension_numbers<[1], [0], [0], [1], [0, 0, 1, 1], [], []>} : vector<64x128xbf16>, vector<128x128xbf16>, vector<64x128xf32> -> vector<64x128xf32>
    %74 = arith.addf %68, %73 : vector<64x128xf32>
    %75 = vector.shape_cast %74 : vector<64x128xf32> to vector<1x8x8x128xf32>
    %76 = arith.truncf %75 : vector<1x8x8x128xf32> to vector<1x8x8x128xbf16>
    %c0_63 = arith.constant 0 : index
    %c0_64 = arith.constant 0 : index
    %c0_65 = arith.constant 0 : index
    %c0_66 = arith.constant 0 : index
    %77 = vector.load %arg5[%c0_63, %c0_64, %c0_65, %c0_66] : memref<1x8x8x128xbf16, #tpu.memory_space<vmem>>, vector<1x8x8x128xbf16>
    tpu.vector_store %arg5[%c0_63, %c0_64, %c0_65, %c0_66], %76 {strides = array<i32>} : memref<1x8x8x128xbf16, #tpu.memory_space<vmem>>, vector<1x8x8x128xbf16>,
    %cst_67 = arith.constant dense<0.000000e+00> : vector<128xf32>
    %78 = vector.multi_reduction <add>, %74, %cst_67 [0] : vector<64x128xf32> to vector<128xf32>
    %79 = vector.shape_cast %78 : vector<128xf32> to vector<1x128xf32>
    %80 = vector.shape_cast %79 : vector<1x128xf32> to vector<1x1x128xf32>
    %c0_68 = arith.constant 0 : index
    %c0_69 = arith.constant 0 : index
    %c0_70 = arith.constant 0 : index
    %81 = vector.load %arg6[%c0_68, %c0_69, %c0_70] : memref<1x1x128xf32, #tpu.memory_space<vmem>>, vector<1x1x128xf32>
    tpu.vector_store %arg6[%c0_68, %c0_69, %c0_70], %80 {strides = array<i32>} : memref<1x1x128xf32, #tpu.memory_space<vmem>>, vector<1x1x128xf32>,
    %82 = arith.mulf %74, %74 : vector<64x128xf32>
    %cst_71 = arith.constant dense<0.000000e+00> : vector<128xf32>
    %83 = vector.multi_reduction <add>, %82, %cst_71 [0] : vector<64x128xf32> to vector<128xf32>
    %84 = vector.shape_cast %83 : vector<128xf32> to vector<1x128xf32>
    %85 = vector.shape_cast %84 : vector<1x128xf32> to vector<1x1x128xf32>
    %c0_72 = arith.constant 0 : index
    %c0_73 = arith.constant 0 : index
    %c0_74 = arith.constant 0 : index
    %86 = vector.load %arg7[%c0_72, %c0_73, %c0_74] : memref<1x1x128xf32, #tpu.memory_space<vmem>>, vector<1x1x128xf32>
    tpu.vector_store %arg7[%c0_72, %c0_73, %c0_74], %85 {strides = array<i32>} : memref<1x1x128xf32, #tpu.memory_space<vmem>>, vector<1x1x128xf32>,
    return
  }
  func.func @transform_0(%arg0: i32) -> (i32, i32, i32, i32) {
    %c0_i32 = arith.constant 0 : i32
    %c0_i32_0 = arith.constant 0 : i32
    %c0_i32_1 = arith.constant 0 : i32
    %c0_i32_2 = arith.constant 0 : i32
    return %arg0, %c0_i32, %c0_i32_0, %c0_i32_1 : i32, i32, i32, i32
  }
  func.func @transform_1(%arg0: i32) -> (i32, i32, i32, i32) {
    %c0_i32 = arith.constant 0 : i32
    %c0_i32_0 = arith.constant 0 : i32
    %c0_i32_1 = arith.constant 0 : i32
    %c0_i32_2 = arith.constant 0 : i32
    %c0_i32_3 = arith.constant 0 : i32
    return %c0_i32, %c0_i32_0, %c0_i32_1, %c0_i32_2 : i32, i32, i32, i32
  }
  func.func @transform_2(%arg0: i32) -> (i32, i32, i32) {
    %c0_i32 = arith.constant 0 : i32
    %c0_i32_0 = arith.constant 0 : i32
    %c0_i32_1 = arith.constant 0 : i32
    %c0_i32_2 = arith.constant 0 : i32
    return %c0_i32, %c0_i32_0, %c0_i32_1 : i32, i32, i32
  }
  func.func @transform_3(%arg0: i32) -> (i32, i32, i32) {
    %c0_i32 = arith.constant 0 : i32
    %c0_i32_0 = arith.constant 0 : i32
    %c0_i32_1 = arith.constant 0 : i32
    %c0_i32_2 = arith.constant 0 : i32
    return %c0_i32, %c0_i32_0, %c0_i32_1 : i32, i32, i32
  }
  func.func @transform_4(%arg0: i32) -> (i32, i32, i32, i32) {
    %c0_i32 = arith.constant 0 : i32
    %c0_i32_0 = arith.constant 0 : i32
    %c0_i32_1 = arith.constant 0 : i32
    %c0_i32_2 = arith.constant 0 : i32
    return %arg0, %c0_i32, %c0_i32_0, %c0_i32_1 : i32, i32, i32, i32
  }
  func.func @transform_5(%arg0: i32) -> (i32, i32, i32) {
    %c0_i32 = arith.constant 0 : i32
    %c0_i32_0 = arith.constant 0 : i32
    %c0_i32_1 = arith.constant 0 : i32
    return %arg0, %c0_i32, %c0_i32_0 : i32, i32, i32
  }
  func.func @transform_6(%arg0: i32) -> (i32, i32, i32) {
    %c0_i32 = arith.constant 0 : i32
    %c0_i32_0 = arith.constant 0 : i32
    %c0_i32_1 = arith.constant 0 : i32
    return %arg0, %c0_i32, %c0_i32_0 : i32, i32, i32
  }
}

module attributes {stable_mosaic.version = 11 : i64} {
  func.func @_epilogue_kernel(%arg0: i32, %arg1: memref<1x8x8x128xbf16, #tpu.memory_space<vmem>>, %arg2: memref<1x1x128xf32, #tpu.memory_space<vmem>>, %arg3: memref<1x1x128xf32, #tpu.memory_space<vmem>>, %arg4: memref<1x8x8x128xbf16, #tpu.memory_space<vmem>>, %arg5: memref<1x1x128xf32, #tpu.memory_space<vmem>>, %arg6: memref<1x1x128xf32, #tpu.memory_space<vmem>>, %arg7: memref<1x8x8x128xf32, #tpu.memory_space<vmem>>) attributes {dimension_semantics = [#tpu.dimension_semantics<parallel>], iteration_bounds = array<i64: 2>, scalar_prefetch = 0 : i64, scratch_operands = 0 : i64, tpu.core_type = #tpu.core_type<tc>, window_params = [{transform_indices = @transform_0, window_bounds = array<i64: 1, 8, 8, 128>}, {pipeline_mode = #tpu.pipeline_mode<synchronous>, transform_indices = @transform_1, window_bounds = array<i64: 1, 1, 128>}, {pipeline_mode = #tpu.pipeline_mode<synchronous>, transform_indices = @transform_2, window_bounds = array<i64: 1, 1, 128>}, {transform_indices = @transform_3, window_bounds = array<i64: 1, 8, 8, 128>}, {pipeline_mode = #tpu.pipeline_mode<synchronous>, transform_indices = @transform_4, window_bounds = array<i64: 1, 1, 128>}, {pipeline_mode = #tpu.pipeline_mode<synchronous>, transform_indices = @transform_5, window_bounds = array<i64: 1, 1, 128>}, {transform_indices = @transform_6, window_bounds = array<i64: 1, 8, 8, 128>}]} {
    %c0 = arith.constant 0 : index
    %c0_0 = arith.constant 0 : index
    %c0_1 = arith.constant 0 : index
    %c0_2 = arith.constant 0 : index
    %0 = vector.load %arg1[%c0, %c0_0, %c0_1, %c0_2] : memref<1x8x8x128xbf16, #tpu.memory_space<vmem>>, vector<1x8x8x128xbf16>
    %1 = vector.shape_cast %0 : vector<1x8x8x128xbf16> to vector<8x8x128xbf16>
    %2 = arith.extf %1 : vector<8x8x128xbf16> to vector<8x8x128xf32>
    %c0_3 = arith.constant 0 : index
    %c0_4 = arith.constant 0 : index
    %c0_5 = arith.constant 0 : index
    %3 = vector.load %arg2[%c0_3, %c0_4, %c0_5] : memref<1x1x128xf32, #tpu.memory_space<vmem>>, vector<1x1x128xf32>
    %4 = vector.shape_cast %3 : vector<1x1x128xf32> to vector<1x128xf32>
    %5 = vector.shape_cast %4 : vector<1x128xf32> to vector<1x1x128xf32>
    %6 = vector.broadcast %5 : vector<1x1x128xf32> to vector<8x8x128xf32>
    %7 = arith.mulf %2, %6 : vector<8x8x128xf32>
    %c0_6 = arith.constant 0 : index
    %c0_7 = arith.constant 0 : index
    %c0_8 = arith.constant 0 : index
    %8 = vector.load %arg3[%c0_6, %c0_7, %c0_8] : memref<1x1x128xf32, #tpu.memory_space<vmem>>, vector<1x1x128xf32>
    %9 = vector.shape_cast %8 : vector<1x1x128xf32> to vector<1x128xf32>
    %10 = vector.shape_cast %9 : vector<1x128xf32> to vector<1x1x128xf32>
    %11 = vector.broadcast %10 : vector<1x1x128xf32> to vector<8x8x128xf32>
    %12 = arith.addf %7, %11 : vector<8x8x128xf32>
    %c0_9 = arith.constant 0 : index
    %c0_10 = arith.constant 0 : index
    %c0_11 = arith.constant 0 : index
    %c0_12 = arith.constant 0 : index
    %13 = vector.load %arg4[%c0_9, %c0_10, %c0_11, %c0_12] : memref<1x8x8x128xbf16, #tpu.memory_space<vmem>>, vector<1x8x8x128xbf16>
    %14 = vector.shape_cast %13 : vector<1x8x8x128xbf16> to vector<8x8x128xbf16>
    %15 = arith.extf %14 : vector<8x8x128xbf16> to vector<8x8x128xf32>
    %c0_13 = arith.constant 0 : index
    %c0_14 = arith.constant 0 : index
    %c0_15 = arith.constant 0 : index
    %16 = vector.load %arg5[%c0_13, %c0_14, %c0_15] : memref<1x1x128xf32, #tpu.memory_space<vmem>>, vector<1x1x128xf32>
    %17 = vector.shape_cast %16 : vector<1x1x128xf32> to vector<1x128xf32>
    %18 = vector.shape_cast %17 : vector<1x128xf32> to vector<1x1x128xf32>
    %19 = vector.broadcast %18 : vector<1x1x128xf32> to vector<8x8x128xf32>
    %20 = arith.mulf %15, %19 : vector<8x8x128xf32>
    %c0_16 = arith.constant 0 : index
    %c0_17 = arith.constant 0 : index
    %c0_18 = arith.constant 0 : index
    %21 = vector.load %arg6[%c0_16, %c0_17, %c0_18] : memref<1x1x128xf32, #tpu.memory_space<vmem>>, vector<1x1x128xf32>
    %22 = vector.shape_cast %21 : vector<1x1x128xf32> to vector<1x128xf32>
    %23 = vector.shape_cast %22 : vector<1x128xf32> to vector<1x1x128xf32>
    %24 = vector.broadcast %23 : vector<1x1x128xf32> to vector<8x8x128xf32>
    %25 = arith.addf %20, %24 : vector<8x8x128xf32>
    %26 = arith.addf %12, %25 : vector<8x8x128xf32>
    %cst = arith.constant 0.000000e+00 : f32
    %27 = vector.broadcast %cst : f32 to vector<8x8x128xf32>
    %28 = arith.maximumf %26, %27 : vector<8x8x128xf32>
    %c0_19 = arith.constant 0 : index
    %c0_20 = arith.constant 0 : index
    %c0_21 = arith.constant 0 : index
    %c0_22 = arith.constant 0 : index
    %29 = vector.load %arg7[%c0_19, %c0_20, %c0_21, %c0_22] : memref<1x8x8x128xf32, #tpu.memory_space<vmem>>, vector<1x8x8x128xf32>
    %30 = vector.shape_cast %29 : vector<1x8x8x128xf32> to vector<8x8x128xf32>
    %31 = vector.shape_cast %28 : vector<8x8x128xf32> to vector<1x8x8x128xf32>
    tpu.vector_store %arg7[%c0_19, %c0_20, %c0_21, %c0_22], %31 {strides = array<i32>} : memref<1x8x8x128xf32, #tpu.memory_space<vmem>>, vector<1x8x8x128xf32>,
    return
  }
  func.func @transform_0(%arg0: i32) -> (i32, i32, i32, i32) {
    %c0_i32 = arith.constant 0 : i32
    %c0_i32_0 = arith.constant 0 : i32
    %c0_i32_1 = arith.constant 0 : i32
    %c0_i32_2 = arith.constant 0 : i32
    return %arg0, %c0_i32, %c0_i32_0, %c0_i32_1 : i32, i32, i32, i32
  }
  func.func @transform_1(%arg0: i32) -> (i32, i32, i32) {
    %c0_i32 = arith.constant 0 : i32
    %c0_i32_0 = arith.constant 0 : i32
    %c0_i32_1 = arith.constant 0 : i32
    %c0_i32_2 = arith.constant 0 : i32
    return %c0_i32, %c0_i32_0, %c0_i32_1 : i32, i32, i32
  }
  func.func @transform_2(%arg0: i32) -> (i32, i32, i32) {
    %c0_i32 = arith.constant 0 : i32
    %c0_i32_0 = arith.constant 0 : i32
    %c0_i32_1 = arith.constant 0 : i32
    %c0_i32_2 = arith.constant 0 : i32
    return %c0_i32, %c0_i32_0, %c0_i32_1 : i32, i32, i32
  }
  func.func @transform_3(%arg0: i32) -> (i32, i32, i32, i32) {
    %c0_i32 = arith.constant 0 : i32
    %c0_i32_0 = arith.constant 0 : i32
    %c0_i32_1 = arith.constant 0 : i32
    %c0_i32_2 = arith.constant 0 : i32
    return %arg0, %c0_i32, %c0_i32_0, %c0_i32_1 : i32, i32, i32, i32
  }
  func.func @transform_4(%arg0: i32) -> (i32, i32, i32) {
    %c0_i32 = arith.constant 0 : i32
    %c0_i32_0 = arith.constant 0 : i32
    %c0_i32_1 = arith.constant 0 : i32
    %c0_i32_2 = arith.constant 0 : i32
    return %c0_i32, %c0_i32_0, %c0_i32_1 : i32, i32, i32
  }
  func.func @transform_5(%arg0: i32) -> (i32, i32, i32) {
    %c0_i32 = arith.constant 0 : i32
    %c0_i32_0 = arith.constant 0 : i32
    %c0_i32_1 = arith.constant 0 : i32
    %c0_i32_2 = arith.constant 0 : i32
    return %c0_i32, %c0_i32_0, %c0_i32_1 : i32, i32, i32
  }
  func.func @transform_6(%arg0: i32) -> (i32, i32, i32, i32) {
    %c0_i32 = arith.constant 0 : i32
    %c0_i32_0 = arith.constant 0 : i32
    %c0_i32_1 = arith.constant 0 : i32
    %c0_i32_2 = arith.constant 0 : i32
    return %arg0, %c0_i32, %c0_i32_0, %c0_i32_1 : i32, i32, i32, i32
  }
}

</mosaic_0001>

<bundles_post_ra>
// kernel: _block_jit.5
= control target key start
LH: loop header
LB: loop body
LE: loop exit
PB: predicated region body
PF: predicated region fallthrough
CT: control target
= control target key end

     0   :  { %s564_s21 = smov 0   ;;  %s662_s0 = inlined_call_operand.vmem [shape: bf16[2,8,8,128], index: 0, kind: input, shape index: {}]   ;;  %s663_s1 = inlined_call_operand.vmem [shape: f32[1,1,128], index: 1, kind: input, shape index: {}]   ;;  %s664_s2 = inlined_call_operand.vmem [shape: f32[1,1,128], index: 2, kind: input, shape index: {}]   ;;  %s665_s3 = inlined_call_operand.vmem [shape: bf16[2,8,8,128], index: 3, kind: input, shape index: {}]   ;;  %s666_s4 = inlined_call_operand.vmem [shape: f32[1,1,128], index: 4, kind: input, shape index: {}]   ;;  %s667_s5 = inlined_call_operand.vmem [shape: f32[1,1,128], index: 5, kind: input, shape index: {}]   ;;  %s668_s6 = inlined_call_operand.vmem [shape: f32[2,8,8,128], index: 6, kind: output, shape index: {}]  }
   0x1 LB: > { %s455_s22 = sadd.s32 4294967295, %s527_s21   ;;  %p459_p0 = scmp.ge.s32.totalorder %s527_s21, 1  ;;  %s527_s21 = sphi %s564_s21, %s16_s21  }
   0x2   : > { %p222_p1 = scmp.lt.s32.totalorder %s527_s21, 3 }
   0x4   : > { %p223_p2 = pnand %p459_p0, %p222_p1 }
   0x5   : > { %p257_p3 = scmp.lt.s32.totalorder (!%p223_p2), %s455_s22, 1 }
   0x6   : > { %226 = sbr.rel (%p223_p2) target bundleno = 37 (0x25), region = 44 }
   0xb   : > { %s670_s22 = smov (!%p257_p3, %s455_s22), 1  ;;  %v588_v0 = vld [vmem:[%s663_s1] ss:$0 sm:$0xff] }
   0xc   : > { %s472_s23 = sshll.u32 %s670_s22, 5  ;;  %v593_v1 = vld [vmem:[%s666_s4] ss:$0 sm:$0xff]  ;;  %s474_s14 = sshll.u32 %s670_s22, 6 }
   0xd   : > { %s578_s26 = scalar_lea.vmem %s662_s0, %s472_s23  ;;  %s583_s29 = scalar_lea.vmem %s665_s3, %s472_s23  ;;  %v602_v10 = vld [vmem:[%s664_s2] ss:$0 sm:$0xff] }
   0xe   : > { %v476_v2 = vld [vmem:[%s578_s26] sm:$0xff]   ;;  %v507_v4 = vld [vmem:[%s578_s26 + $0x8] sm:$0xff]   ;;  %v508_v24 = vld [vmem:[%s578_s26 + $0x10] sm:$0xff]   ;;  %s631_s17 = scalar_lea.vmem %s668_s6, %s474_s14 }
   0xf   : > { %v492_v3 = vld [vmem:[%s583_s29] sm:$0xff]   ;;  %v477_v5 = vunpack.c.l.bf16 %v476_v2  ;;  %v478_v7 = vunpack.c.h.bf16 %v476_v2  ;;  %v510_v9 = vld [vmem:[%s583_s29 + $0x8] sm:$0xff]   ;;  %v481_v12 = vunpack.c.l.bf16 %v507_v4  ;;  %v482_v14 = vunpack.c.h.bf16 %v507_v4  ;;  %v511_v25 = vld [vmem:[%s583_s29 + $0x10] sm:$0xff]  }
  0x10   : > { %v493_v6 = vunpack.c.l.bf16 %v492_v3  ;;  %v494_v8 = vunpack.c.h.bf16 %v492_v3  ;;  %v607_v11 = vld [vmem:[%s667_s5] ss:$0 sm:$0xff]  ;;  %v497_v13 = vunpack.c.l.bf16 %v510_v9  ;;  %v498_v15 = vunpack.c.h.bf16 %v510_v9  ;;  %v509_v42 = vld [vmem:[%s578_s26 + $0x18] sm:$0xff]  }
  0x11   : > { %v295_v16 = vmul.f32 %v477_v5, %v588_v0  ;;  %v296_v18 = vmul.f32 %v478_v7, %v588_v0  ;;  %v297_v20 = vmul.f32 %v481_v12, %v588_v0  ;;  %v298_v22 = vmul.f32 %v482_v14, %v588_v0  ;;  %v512_v43 = vld [vmem:[%s583_s29 + $0x18] sm:$0xff]  }
  0x12   : > { %v341_v17 = vmul.f32 %v493_v6, %v593_v1  ;;  %v342_v19 = vmul.f32 %v494_v8, %v593_v1  ;;  %v343_v21 = vmul.f32 %v497_v13, %v593_v1  ;;  %v344_v23 = vmul.f32 %v498_v15, %v593_v1 }
  0x13   : > { %v310_v26 = vadd.f32 %v602_v10, %v295_v16  ;;  %v311_v28 = vadd.f32 %v602_v10, %v296_v18  ;;  %v312_v30 = vadd.f32 %v602_v10, %v297_v20  ;;  %v313_v32 = vadd.f32 %v602_v10, %v298_v22 }
  0x14   : > { %v356_v27 = vadd.f32 %v607_v11, %v341_v17  ;;  %v357_v29 = vadd.f32 %v607_v11, %v342_v19  ;;  %v358_v31 = vadd.f32 %v607_v11, %v343_v21  ;;  %v359_v33 = vadd.f32 %v607_v11, %v344_v23 }
  0x15   : > { %v485_v36 = vunpack.c.l.bf16 %v508_v24  ;;  %v501_v37 = vunpack.c.l.bf16 %v511_v25  ;;  %v486_v40 = vunpack.c.h.bf16 %v508_v24  ;;  %v502_v41 = vunpack.c.h.bf16 %v511_v25 }
  0x16   : > { %v364_v34 = vadd.f32 %v356_v27, %v310_v26  ;;  %v365_v35 = vadd.f32 %v357_v29, %v311_v28  ;;  %v366_v38 = vadd.f32 %v358_v31, %v312_v30  ;;  %v367_v39 = vadd.f32 %v359_v33, %v313_v32 }
  0x17   : > { %v299_v46 = vmul.f32 %v485_v36, %v588_v0  ;;  %v345_v47 = vmul.f32 %v501_v37, %v593_v1  ;;  %v300_v50 = vmul.f32 %v486_v40, %v588_v0  ;;  %v346_v51 = vmul.f32 %v502_v41, %v593_v1 }
  0x18   : > { %v372_v44 = vmax.f32 %v364_v34, 0.0  ;;  %v373_v45 = vmax.f32 %v365_v35, 0.0  ;;  %v374_v48 = vmax.f32 %v366_v38, 0.0  ;;  %v375_v49 = vmax.f32 %v367_v39, 0.0 }
  0x19   : > { %v314_v52 = vadd.f32 %v602_v10, %v299_v46  ;;  %v360_v53 = vadd.f32 %v607_v11, %v345_v47  ;;  %v489_v54 = vunpack.c.l.bf16 %v509_v42  ;;  %v505_v55 = vunpack.c.l.bf16 %v512_v43 }
  0x1a   : > { %380 = vst [vmem:[%s631_s17] sm:$0xff] %v372_v44  ;;  %381 = vst [vmem:[%s631_s17 + $0x8] sm:$0xff] %v373_v45  ;;  %v315_v56 = vadd.f32 %v602_v10, %v300_v50  ;;  %v361_v57 = vadd.f32 %v607_v11, %v346_v51  ;;  %v490_v58 = vunpack.c.h.bf16 %v509_v42  ;;  %v506_v59 = vunpack.c.h.bf16 %v512_v43 }
  0x1b   : > { %382 = vst [vmem:[%s631_s17 + $0x10] sm:$0xff] %v374_v48  ;;  %383 = vst [vmem:[%s631_s17 + $0x18] sm:$0xff] %v375_v49  ;;  %v368_v60 = vadd.f32 %v360_v53, %v314_v52  ;;  %v301_v61 = vmul.f32 %v489_v54, %v588_v0  ;;  %v347_v62 = vmul.f32 %v505_v55, %v593_v1 }
  0x1c   : > { %v369_v63 = vadd.f32 %v361_v57, %v315_v56  ;;  %v302_v2 = vmul.f32 %v490_v58, %v588_v0  ;;  %v348_v3 = vmul.f32 %v506_v59, %v593_v1 }
  0x1d   : > { %v376_v4 = vmax.f32 %v368_v60, 0.0  ;;  %v316_v5 = vadd.f32 %v602_v10, %v301_v61  ;;  %v362_v6 = vadd.f32 %v607_v11, %v347_v62 }
  0x1e   : > { %v377_v7 = vmax.f32 %v369_v63, 0.0  ;;  %v317_v8 = vadd.f32 %v602_v10, %v302_v2  ;;  %v363_v9 = vadd.f32 %v607_v11, %v348_v3 }
  0x1f   : > { %384 = vst [vmem:[%s631_s17 + $0x20] sm:$0xff] %v376_v4  ;;  %v370_v12 = vadd.f32 %v362_v6, %v316_v5 }
  0x20   : > { %385 = vst [vmem:[%s631_s17 + $0x28] sm:$0xff] %v377_v7  ;;  %v371_v13 = vadd.f32 %v363_v9, %v317_v8 }
  0x21   : > { %v378_v14 = vmax.f32 %v370_v12, 0.0 }
  0x22   : > { %v379_v15 = vmax.f32 %v371_v13, 0.0 }
  0x23   : > { %386 = vst [vmem:[%s631_s17 + $0x30] sm:$0xff] %v378_v14 }
  0x24   : > { %387 = vst [vmem:[%s631_s17 + $0x38] sm:$0xff] %v379_v15 }
  0x25 PF: > { %s16_s21 = sadd.s32 1, %s527_s21  }
  0x26   : > { %p13_p4 = scmp.ge.s32.totalorder %s16_s21, 4  }
  0x28   :  { %15 = sbr.rel (!%p13_p4) target bundleno = 1 (0x1), region = 77 }

// kernel: _block_jit.3
= control target key start
LH: loop header
LB: loop body
LE: loop exit
PB: predicated region body
PF: predicated region fallthrough
CT: control target
= control target key end

     0   :  { %s3314_s27 = smov 0   ;;  %s3898_s0 = inlined_call_operand.vmem [shape: bf16[2,4,9,9,128], index: 0, kind: input, shape index: {}]   ;;  %s3899_s1 = inlined_call_operand.vmem [shape: bf16[3,3,128,128], index: 1, kind: input, shape index: {}]   ;;  %s3900_s2 = inlined_call_operand.vmem [shape: bf16[128,128], index: 2, kind: input, shape index: {}]   ;;  %s3901_s3 = inlined_call_operand.vmem [shape: bf16[2,8,8,128], index: 3, kind: output, shape index: {0}]   ;;  %s3902_s4 = inlined_call_operand.vmem [shape: f32[2,1,128], index: 4, kind: output, shape index: {1}]   ;;  %s3903_s5 = inlined_call_operand.vmem [shape: f32[2,1,128], index: 5, kind: output, shape index: {2}]   ;;  %s3904_s6 = inlined_call_operand.vmem [shape: bf16[2,8,8,128], index: 6, kind: output, shape index: {3}]   ;;  %s3905_s7 = inlined_call_operand.vmem [shape: f32[2,1,128], index: 7, kind: output, shape index: {4}]   ;;  %s3906_s8 = inlined_call_operand.vmem [shape: f32[2,1,128], index: 8, kind: output, shape index: {5}]  }
   0x1 LB: > { %s2450_s28 = sadd.s32 4294967295, %s3267_s27   ;;  %p2454_p0 = scmp.ge.s32.totalorder %s3267_s27, 1  ;;  %s3267_s27 = sphi %s3314_s27, %s19_s27  }
   0x2   : > { %p273_p1 = scmp.lt.s32.totalorder %s3267_s27, 3 }
   0x4   : > { %p274_p2 = pnand %p2454_p0, %p273_p1 }
   0x5   : > { %p324_p3 = scmp.lt.s32.totalorder (!%p274_p2), %s2450_s28, 1 }
   0x6   : > { %277 = sbr.rel (%p274_p2) target bundleno = 404 (0x194), region = 32 }
   0xb   : > { %v3156_v0 = vld [vmem:[%s3899_s1 + $0x78] sm:$0xff]   ;;  %v3158_v2 = vld [vmem:[%s3899_s1 + $0x70] sm:$0xff]   ;;  %v3160_v4 = vld [vmem:[%s3899_s1 + $0x68] sm:$0xff]   ;;  %s3910_s28 = smov (!%p324_p3, %s2450_s28), 1  ;;  %vm713_vm0 = vsmask.f32 3328 }
   0xc   : > { %v3157_v1 = vld [vmem:[%s3899_s1 + $0x38] sm:$0xff]   ;;  %2907 = vmatprep.subr.bf16.mxu0 %v3156_v0  ;;  %v3159_v3 = vld [vmem:[%s3899_s1 + $0x30] sm:$0xff]   ;;  %v3161_v5 = vld [vmem:[%s3899_s1 + $0x28] sm:$0xff]   ;;  %s3147_s23 = smul.u32 288, %s3910_s28  ;;  %vm714_vm1 = vsmask.f32 7440  ;;  %s350_s26 = scalar_lea.vmem %s3906_s8, %s3910_s28 }
   0xd   : > { %2931 = vmatprep.subr.bf16.mxu1 %v3157_v1  ;;  %2908 = vmatpush3.bf16.msra.mxu0 %v3156_v0  ;;  %v3162_v6 = vld [vmem:[%s3899_s1 + $0x60] sm:$0xff]   ;;  %v3164_v8 = vld [vmem:[%s3899_s1 + $0x58] sm:$0xff]   ;;  %v3166_v10 = vld [vmem:[%s3899_s1 + $0x50] sm:$0xff]   ;;  %s336_s13 = scalar_lea.vmem %s3902_s4, %s3910_s28  ;;  %s339_s16 = scalar_lea.vmem %s3903_s5, %s3910_s28 }
   0xe   : > { %2932 = vmatpush3.bf16.msra.mxu1 %v3157_v1  ;;  %2909 = vmatprep.subr.bf16.mxu0 %v3158_v2  ;;  %v3163_v7 = vld [vmem:[%s3899_s1 + $0x20] sm:$0xff]   ;;  %v3165_v9 = vld [vmem:[%s3899_s1 + $0x18] sm:$0xff]   ;;  %s3358_s10 = scalar_lea.vmem %s3898_s0, %s3147_s23  ;;  %v3167_v14 = vld [vmem:[%s3899_s1 + $0x10] sm:$0xff]   ;;  %s347_s23 = scalar_lea.vmem %s3905_s7, %s3910_s28 }
   0xf   : > { %2933 = vmatprep.subr.bf16.mxu1 %v3159_v3  ;;  %v2460_v11 = vld [vmem:[%s3358_s10 + $0x48] sm:$0xf]  ;;  %v3365_v12 = vld [vmem:[%s3358_s10 + $0x50] sm:$0xf]  ;;  %v3368_v13 = vld [vmem:[%s3358_s10 + $0x58] sm:$0xf] }
  0x10   : > { %v2509_v15 = vcombine.low %v2460_v11, %v3365_v12  ;;  %v2697_v16 = vcombine.low %v3365_v12, %v3368_v13  ;;  %v352_v17 = vld [vmem:[%s3358_s10] sm:$0xf]  ;;  %v3378_v18 = vld [vmem:[%s3358_s10 + $0x8] sm:$0xf]  ;;  %v3388_v22 = vld [vmem:[%s3358_s10 + $0x10] sm:$0xf] }
  0x11   : > { %2910 = vmatpush3.bf16.msra.mxu0 %v3158_v2  ;;  %v2521_v19 = vcombine.low %v352_v17, %v3378_v18  ;;  %v3168_v20 = vld [vmem:[%s3899_s1 + $0x48] sm:$0xff]   ;;  %v3170_v23 = vld [vmem:[%s3899_s1 + $0x40] sm:$0xff]   ;;  %v2669_v24 = vcombine.low %v3378_v18, %v3388_v22  ;;  %v717_v26 = vshrl.u32 %v352_v17, 16  ;;  %v720_v27 = vshll.u32 %v352_v17, 16  ;;  %v3404_v31 = vld [vmem:[%s3358_s10 + $0x18] sm:$0xf] }
  0x12   : > { %2934 = vmatpush3.bf16.msra.mxu1 %v3159_v3  ;;  %2911 = vmatprep.subr.bf16.mxu0 %v3160_v4  ;;  %v3169_v21 = vld [vmem:[%s3899_s1 + $0x8] sm:$0xff]   ;;  %v3171_v25 = vld [vmem:[%s3899_s1] sm:$0xff]   ;;  %v731_v28 = vshrl.u32 %v3378_v18, 16  ;;  %v734_v29 = vshll.u32 %v3378_v18, 16  ;;  %v3177_v32 = vld [vmem:[%s3899_s1 + $0xb8] sm:$0xff]   ;;  %v745_v33 = vshrl.u32 %v3388_v22, 16  ;;  %v2522_v42 = vcombine.low %v3388_v22, %v3404_v31 }
  0x13   : > { %2935 = vmatprep.subr.bf16.mxu1 %v3161_v5  ;;  %2923 = vmatprep.mubr.bf16.mxu0 %v2509_v15  ;;  %v3401_v30 = vld [vmem:[%s3358_s10 + $0x60] sm:$0xf]  ;;  %v748_v34 = vshll.u32 %v3388_v22, 16  ;;  %v719_v35 = vrot.slane %v717_v26, 4  ;;  %v722_v36 = vrot.slane %v720_v27, 5  ;;  %v759_v37 = vshrl.u32 %v3404_v31, 16  ;;  %vm3487_vm2 = vmor %vm713_vm0, %vm714_vm1 }
  0x14   : > { %2947 = vmatprep.mubr.bf16.mxu1 %v2521_v19  ;;  %v3178_v38 = vld [vmem:[%s3899_s1 + $0xf8] sm:$0xff]   ;;  %v733_v39 = vrot.slane %v731_v28, 4  ;;  %v2510_v40 = vcombine.low %v3368_v13, %v3401_v30  ;;  %v3418_v41 = vld [vmem:[%s3358_s10 + $0x68] sm:$0xf]  ;;  %v3423_v43 = vld [vmem:[%s3358_s10 + $0x70] sm:$0xf] }
  0x15   : > { %2912 = vmatpush3.bf16.msra.mxu0 %v3160_v4  ;;  %v2698_v44 = vcombine.low %v3401_v30, %v3418_v41  ;;  %v3428_v45 = vld [vmem:[%s3358_s10 + $0x20] sm:$0xf]  ;;  %v3431_v46 = vld [vmem:[%s3358_s10 + $0x28] sm:$0xf]  ;;  %v723_v47 = vor.u32 %v722_v36, %v719_v35  ;;  %v736_v48 = vrot.slane %v734_v29, 5  ;;  %v3433_v49 = vrot.slane %v745_v33, 4 }
  0x16   : > { %2936 = vmatpush3.bf16.msra.mxu1 %v3161_v5  ;;  %2913 = vmatprep.subr.bf16.mxu0 %v3162_v6  ;;  %v3435_v50 = vrot.slane %v748_v34, 5  ;;  %v3179_v51 = vld [vmem:[%s3899_s1 + $0xb0] sm:$0xff]   ;;  %v3440_v52 = vrot.slane %v759_v37, 4  ;;  %v762_v53 = vshll.u32 %v3404_v31, 16  ;;  %v2511_v55 = vcombine.low %v3418_v41, %v3423_v43  ;;  %v3449_v56 = vld [vmem:[%s3358_s10 + $0x78] sm:$0xf] }
  0x17   : > { %2937 = vmatprep.subr.bf16.mxu1 %v3163_v7  ;;  %v3180_v54 = vld [vmem:[%s3899_s1 + $0xf0] sm:$0xff]   ;;  %v2670_v57 = vcombine.low %v3404_v31, %v3428_v45  ;;  %v3181_v58 = vld [vmem:[%s3899_s1 + $0xa8] sm:$0xff]   ;;  %v2523_v59 = vcombine.low %v3428_v45, %v3431_v46  ;;  %v2467_v60 = vld [vmem:[%s3358_s10 + $0x80] sm:$0xf]  ;;  %v2699_v0 = vcombine.low %v3423_v43, %v3449_v56  ;;  %v737_v1 = vor.u32 %v736_v48, %v733_v39 }
  0x18   : > { %v3460_v61 = vld [vmem:[%s3358_s10 + $0x30] sm:$0xf]  ;;  %v3463_v62 = vld [vmem:[%s3358_s10 + $0x38] sm:$0xf]  ;;  %v724_v2 = vrot.slane %v723_v47, 4  ;;  %v3182_v3 = vld [vmem:[%s3899_s1 + $0xe8] sm:$0xff]  }
  0x19   : > { %2914 = vmatpush3.bf16.msra.mxu0 %v3162_v6  ;;  %v2671_v63 = vcombine.low %v3431_v46, %v3460_v61  ;;  %v773_v4 = vshrl.u32 %v3428_v45, 16  ;;  %v776_v5 = vshll.u32 %v3428_v45, 16  ;;  %v2512_v6 = vcombine.low %v3449_v56, %v2467_v60  ;;  %v3184_v11 = vld [vmem:[%s3899_s1 + $0xe0] sm:$0xff]   ;;  %v355_v15 = vld [vmem:[%s3358_s10 + $0xc] sm:$0x1]  ;;  %v3185_v35 = vld [vmem:[%s3899_s1 + $0x98] sm:$0xff]  }
  0x1a   : > { %2938 = vmatpush3.bf16.msra.mxu1 %v3163_v7  ;;  %2915 = vmatprep.subr.bf16.mxu0 %v3164_v8  ;;  %v764_v7 = vrot.slane %v762_v53, 5  ;;  %v738_v17 = vrot.slane %v737_v1, 4  ;;  %v357_v34 = vld [vmem:[%s3358_s10 + $0x14] sm:$0x1]  ;;  %v787_v36 = vshrl.u32 %v3431_v46, 16  ;;  %v790_v37 = vshll.u32 %v3431_v46, 16 }
  0x1b   : > { %2939 = vmatprep.subr.bf16.mxu1 %v3165_v9  ;;  %v775_v26 = vrot.slane %v773_v4, 4  ;;  %v778_v27 = vrot.slane %v776_v5, 5  ;;  %v754_v39 = vshll.u32 %v357_v34, 16  ;;  %v3194_v4 = vld [vmem:[%s3899_s1 + $0x88] sm:$0xff]   ;;  %v3196_v34 = vld [vmem:[%s3899_s1 + $0x80] sm:$0xff]   ;;  %v3250_v46 = vld [vmem:[%s3899_s1 + $0x1d8] sm:$0xff]  }
  0x1c   : > { %v765_v28 = vor.u32 %v764_v7, %v3440_v52  ;;  %v789_v60 = vrot.slane %v787_v36, 4  ;;  %v792_v1 = vrot.slane %v790_v37, 5  ;;  %v3245_v31 = vld [vmem:[%s3899_s1 + $0x228] sm:$0xff]  }
  0x1d   : > { %2916 = vmatpush3.bf16.msra.mxu0 %v3164_v8  ;;  %v3183_v8 = vld [vmem:[%s3899_s1 + $0xa0] sm:$0xff]   ;;  %v779_v52 = vor.u32 %v778_v27, %v775_v26 }
  0x1e   : > { %2940 = vmatpush3.bf16.msra.mxu1 %v3165_v9  ;;  %2917 = vmatprep.subr.bf16.mxu0 %v3166_v10  ;;  %v2524_v9 = vcombine.low %v3460_v61, %v3463_v62  ;;  %v766_v53 = vrot.slane %v765_v28, 4 }
  0x1f   : > { %2941 = vmatprep.subr.bf16.mxu1 %v3167_v14  ;;  %v780_v7 = vrot.slane %v779_v52, 4 }
  0x21   : > { %2918 = vmatpush3.bf16.msra.mxu0 %v3166_v10  ;;  %v751_v10 = vor.u32 %v3435_v50, %v3433_v49  ;;  %v801_v49 = vshrl.u32 %v3460_v61, 16 }
  0x22   : > { %2942 = vmatpush3.bf16.msra.mxu1 %v3167_v14  ;;  %2919 = vmatprep.subr.bf16.mxu0 %v3168_v20  ;;  %v353_v14 = vld [vmem:[%s3358_s10 + $0x4] sm:$0x1] }
  0x23   : > { %2943 = vmatprep.subr.bf16.mxu1 %v3169_v21  ;;  %v726_v19 = vshll.u32 %v353_v14, 16 }
  0x25   : > { %2920 = vmatpush3.bf16.msra.mxu0 %v3168_v20  ;;  %v740_v20 = vshll.u32 %v355_v15, 16  ;;  %v728_v29 = vrot.slane %v726_v19, 5  ;;  %v793_v15 = vor.u32 %v792_v1, %v789_v60  ;;  %v3202_v1 = vld [vmem:[%s3899_s1 + $0x130] sm:$0xff]  }
  0x26   : > { %2944 = vmatpush3.bf16.msra.mxu1 %v3169_v21  ;;  %2921 = vmatprep.subr.bf16.mxu0 %v3170_v23 }
  0x27   : > { %2945 = vmatprep.subr.bf16.mxu1 %v3171_v25  ;;  %v729_v47 = vsel %vm3487_vm2, %v724_v2, %v728_v29  ;;  %v818_v2 = vshll.u32 %v3463_v62, 16  ;;  %v794_v37 = vrot.slane %v793_v15, 4 }
  0x29   : > { %2922 = vmatpush3.bf16.msra.mxu0 %v3170_v23  ;;  %v3492_v23 = vld [vmem:[%s3358_s10 + $0x90] sm:$0xf] }
  0x2a   : > { %2946 = vmatpush3.bf16.msra.mxu1 %v3171_v25  ;;  %2955 = vmatprep.subr.bf16.mxu0 %v3177_v32  ;;  %v3495_v25 = vld [vmem:[%s3358_s10 + $0x98] sm:$0xf] }
  0x2b   : > { %2979 = vmatprep.subr.bf16.mxu1 %v3178_v38  ;;  %v2577_v33 = vcombine.low %v3492_v23, %v3495_v25 }
  0x2c   : > { %2924 = vmatmul.mubr.bf16.vlgmr.msra.gmra.mxu0 %v2510_v40  ;;  %v752_v40 = vrot.slane %v751_v10, 4 }
  0x2d   : > { %2948 = vmatmul.mubr.bf16.vlgmr.msra.gmra.mxu1 %v2522_v42  ;;  %2956 = vmatpush3.bf16.msra.mxu0 %v3177_v32  ;;  %v742_v32 = vrot.slane %v740_v20, 5  ;;  %v3186_v42 = vld [vmem:[%s3899_s1 + $0xd8] sm:$0xff]   ;;  %v3195_v20 = vld [vmem:[%s3899_s1 + $0xc8] sm:$0xff]  }
  0x2e   : > { %2980 = vmatpush3.bf16.msra.mxu1 %v3178_v38  ;;  %2957 = vmatprep.subr.bf16.mxu0 %v3179_v51  ;;  %v359_v38 = vld [vmem:[%s3358_s10 + $0x1c] sm:$0x1] }
  0x2f   : > { %2981 = vmatprep.subr.bf16.mxu1 %v3180_v54  ;;  %2927 = vmatprep.mubr.bf16.mxu0 %v2511_v55  ;;  %v3514_v48 = vsel %vm3487_vm2, %v738_v17, %v742_v32  ;;  %v756_v55 = vrot.slane %v754_v39, 5  ;;  %v365_v17 = vld [vmem:[%s3358_s10 + $0x34] sm:$0x1]  ;;  %v3197_v39 = vld [vmem:[%s3899_s1 + $0xc0] sm:$0xff]  }
  0x30   : > { %2951 = vmatprep.mubr.bf16.mxu1 %v2523_v59  ;;  %v2549_v50 = vcombine.low %v729_v47, %v3514_v48  ;;  %v3192_v59 = vld [vmem:[%s3899_s1 + $0x90] sm:$0xff]   ;;  %v810_v27 = vshll.u32 %v365_v17, 16 }
  0x31   : > { %2958 = vmatpush3.bf16.msra.mxu0 %v3179_v51  ;;  %v768_v51 = vshll.u32 %v359_v38, 16  ;;  %v3532_v5 = vsel %vm3487_vm2, %v752_v40, %v756_v55  ;;  %v367_v38 = vld [vmem:[%s3358_s10 + $0x3c] sm:$0x1] }
  0x32   : > { %2982 = vmatpush3.bf16.msra.mxu1 %v3180_v54  ;;  %2959 = vmatprep.subr.bf16.mxu0 %v3181_v58  ;;  %v804_v54 = vshll.u32 %v3460_v61, 16  ;;  %v2725_v10 = vcombine.low %v3514_v48, %v3532_v5  ;;  %v3201_v55 = vld [vmem:[%s3900_s2 + $0x38] sm:$0xff]   ;;  %v3255_v48 = vld [vmem:[%s3899_s1 + $0x208] sm:$0xff]  }
  0x33   : > { %2983 = vmatprep.subr.bf16.mxu1 %v3182_v3  ;;  %v3251_v61 = vld [vmem:[%s3899_s1 + $0x218] sm:$0xff]  }
  0x34   : > { %2928 = vmatmul.mubr.bf16.gmra.mxu0 %v2512_v6  ;;  %v770_v6 = vrot.slane %v768_v51, 5  ;;  %v806_v19 = vrot.slane %v804_v54, 5  ;;  %v3200_v51 = vld [vmem:[%s3899_s1 + $0x138] sm:$0xff]   ;;  %v3566_v54 = vld [vmem:[%s3358_s10 + $0xa8] sm:$0xf] }
  0x35   : > { %2960 = vmatpush3.bf16.msra.mxu0 %v3181_v58  ;;  %2952 = vmatmul.mubr.bf16.gmra.mxu1 %v2524_v9  ;;  %v815_v58 = vshrl.u32 %v3463_v62, 16  ;;  %v361_v9 = vld [vmem:[%s3358_s10 + $0x24] sm:$0x1] }
  0x36   : > { %2984 = vmatpush3.bf16.msra.mxu1 %v3182_v3  ;;  %2961 = vmatprep.subr.bf16.mxu0 %v3183_v8  ;;  %v3193_v3 = vld [vmem:[%s3899_s1 + $0xd0] sm:$0xff]   ;;  %v782_v14 = vshll.u32 %v361_v9, 16 }
  0x37   : > { %2985 = vmatprep.subr.bf16.mxu1 %v3184_v11  ;;  %2995 = vmatprep.mubr.bf16.mxu1 %v2577_v33  ;;  %v817_v32 = vrot.slane %v815_v58, 4  ;;  %v820_v33 = vrot.slane %v818_v2, 5  ;;  %v3585_v2 = vld [vmem:[%s3358_s10 + $0xb0] sm:$0xf] }
  0x38   : > { %2971 = vmatprep.mubr.bf16.mxu0 %v2549_v50  ;;  %v784_v28 = vrot.slane %v782_v14, 5  ;;  %v3560_v50 = vld [vmem:[%s3358_s10 + $0xa0] sm:$0xf]  ;;  %v3203_v9 = vld [vmem:[%s3900_s2 + $0x30] sm:$0xff]   ;;  %v3204_v14 = vld [vmem:[%s3899_s1 + $0x128] sm:$0xff]  }
  0x39   : > { %2962 = vmatpush3.bf16.msra.mxu0 %v3183_v8  ;;  %v803_v8 = vrot.slane %v801_v49, 4  ;;  %v812_v49 = vrot.slane %v810_v27, 5  ;;  %v821_v52 = vor.u32 %v820_v33, %v817_v32  ;;  %v3209_v32 = vld [vmem:[%s3900_s2 + $0x20] sm:$0xff]  }
  0x3a   : > { %2986 = vmatpush3.bf16.msra.mxu1 %v3184_v11  ;;  %2963 = vmatprep.subr.bf16.mxu0 %v3185_v35  ;;  %v363_v11 = vld [vmem:[%s3358_s10 + $0x2c] sm:$0x1]  ;;  %v3551_v36 = vsel %vm3487_vm2, %v780_v7, %v784_v28  ;;  %v3218_v33 = vld [vmem:[%s3358_s10 + $0xd8] ss:$8 sps:$4 sm:$0xff]  }
  0x3b   : > { %2987 = vmatprep.subr.bf16.mxu1 %v3186_v42  ;;  %v796_v26 = vshll.u32 %v363_v11, 16  ;;  %v807_v29 = vor.u32 %v806_v19, %v803_v8  ;;  %v3592_v8 = vld [vmem:[%s3358_s10 + $0xb8] sm:$0xf]  ;;  %v3609_v19 = vld [vmem:[%s3358_s10 + $0xc0] sm:$0xf] }
  0x3c   : > { %v2579_v15 = vcombine.low %v3585_v2, %v3592_v8  ;;  %v1523_v18 = vshll.u32 %v3609_v19, 16 }
  0x3d   : > { %2964 = vmatpush3.bf16.msra.mxu0 %v3185_v35  ;;  %v3547_v35 = vsel %vm3487_vm2, %v766_v53, %v770_v6  ;;  %v798_v40 = vrot.slane %v796_v26, 5  ;;  %v808_v47 = vrot.slane %v807_v29, 4  ;;  %v824_v53 = vshll.u32 %v367_v38, 16  ;;  %v3205_v26 = vld [vmem:[%s3900_s2 + $0x28] sm:$0xff]   ;;  %v3208_v29 = vld [vmem:[%s3899_s1 + $0x120] sm:$0xff]   ;;  %v3212_v38 = vld [vmem:[%s3899_s1 + $0x110] sm:$0xff]  }
  0x3e   : > { %2988 = vmatpush3.bf16.msra.mxu1 %v3186_v42  ;;  %2965 = vmatprep.subr.bf16.mxu0 %v3192_v59  ;;  %v2726_v42 = vcombine.low %v3547_v35, %v3551_v36  ;;  %v2550_v60 = vcombine.low %v3532_v5, %v3547_v35  ;;  %v822_v6 = vrot.slane %v821_v52, 4  ;;  %v1453_v52 = vshll.u32 %v3495_v25, 16 }
  0x3f   : > { %2989 = vmatprep.subr.bf16.mxu1 %v3193_v3  ;;  %v3573_v58 = vsel %vm3487_vm2, %v794_v37, %v798_v40  ;;  %v826_v7 = vrot.slane %v824_v53, 5  ;;  %v3211_v37 = vld [vmem:[%s3900_s2 + $0x18] sm:$0xff]   ;;  %v1436_v40 = vshrl.u32 %v3492_v23, 16  ;;  %v3215_v53 = vld [vmem:[%s3900_s2 + $0x8] sm:$0xff]  }
  0x40   : > { %v2551_v11 = vcombine.low %v3551_v36, %v3573_v58 }
  0x41   : > { %2966 = vmatpush3.bf16.msra.mxu0 %v3192_v59  ;;  %v3577_v59 = vsel %vm3487_vm2, %v808_v47, %v812_v49  ;;  %v3606_v17 = vsel %vm3487_vm2, %v822_v6, %v826_v7  ;;  %v1439_v47 = vshll.u32 %v3492_v23, 16  ;;  %v1450_v49 = vshrl.u32 %v3495_v25, 16  ;;  %v3217_v25 = vld [vmem:[%s3900_s2] sm:$0xff]   ;;  %v2470_v6 = vld [vmem:[%s3358_s10 + $0x94] sm:$0x1] }
  0x42   : > { %2990 = vmatpush3.bf16.msra.mxu1 %v3193_v3  ;;  %2967 = vmatprep.subr.bf16.mxu0 %v3194_v4  ;;  %v2727_v3 = vcombine.low %v3573_v58, %v3577_v59  ;;  %v2552_v27 = vcombine.low %v3577_v59, %v3606_v17  ;;  %v2472_v7 = vld [vmem:[%s3358_s10 + $0x9c] sm:$0x1] }
  0x43   : > { %2991 = vmatprep.subr.bf16.mxu1 %v3195_v20  ;;  %v1441_v23 = vrot.slane %v1439_v47, 5  ;;  %v3227_v47 = vld [vmem:[%s3899_s1 + $0x1a8] sm:$0xff]  }
  0x45   : > { %2968 = vmatpush3.bf16.msra.mxu0 %v3194_v4  ;;  %v2578_v4 = vcombine.low %v3560_v50, %v3566_v54 }
  0x46   : > { %2992 = vmatpush3.bf16.msra.mxu1 %v3195_v20  ;;  %2969 = vmatprep.subr.bf16.mxu0 %v3196_v34  ;;  %v3612_v20 = vld [vmem:[%s3358_s10 + $0xc8] sm:$0xf] }
  0x47   : > { %2993 = vmatprep.subr.bf16.mxu1 %v3197_v39  ;;  %v2580_v28 = vcombine.low %v3609_v19, %v3612_v20  ;;  %v1534_v22 = vshrl.u32 %v3612_v20, 16 }
  0x49   : > { %2970 = vmatpush3.bf16.msra.mxu0 %v3196_v34  ;;  %v3210_v34 = vld [vmem:[%s3899_s1 + $0x118] sm:$0xff]  }
  0x4a   : > { %2994 = vmatpush3.bf16.msra.mxu1 %v3197_v39  ;;  %3003 = vmatprep.subr.bf16.mxu0 %v3200_v51  ;;  %v3213_v39 = vld [vmem:[%s3900_s2 + $0x10] sm:$0xff]  }
  0x4b   : > { %3027 = vmatprep.subr.bf16.mxu1 %v3201_v55 }
  0x4c   : > { %2972 = vmatmul.mubr.bf16.vlgmr.msra.gmra.mxu0 %v2550_v60  ;;  %v3216_v60 = vld [vmem:[%s3899_s1 + $0x100] sm:$0xff]  }
  0x4d   : > { %2996 = vmatmul.mubr.bf16.vlgmr.msra.gmra.mxu1 %v2578_v4  ;;  %3004 = vmatpush3.bf16.msra.mxu0 %v3200_v51  ;;  %v3214_v51 = vld [vmem:[%s3899_s1 + $0x108] sm:$0xff]   ;;  %v1455_v4 = vrot.slane %v1453_v52, 5 }
  0x4e   : > { %3028 = vmatpush3.bf16.msra.mxu1 %v3201_v55  ;;  %3005 = vmatprep.subr.bf16.mxu0 %v3202_v1  ;;  %v1438_v55 = vrot.slane %v1436_v40, 4  ;;  %v3226_v40 = vld [vmem:[%s3899_s1 + $0x168] sm:$0xff]  }
  0x4f   : > { %3029 = vmatprep.subr.bf16.mxu1 %v3203_v9  ;;  %2975 = vmatprep.mubr.bf16.mxu0 %v2551_v11 }
  0x50   : > { %2999 = vmatprep.mubr.bf16.mxu1 %v2579_v15  ;;  %v1442_v11 = vor.u32 %v1441_v23, %v1438_v55  ;;  %v3221_v15 = vld [vmem:[%s3899_s1 + $0x1b8] sm:$0xff]   ;;  %v3229_v55 = vld [vmem:[%s3899_s1 + $0x1a0] sm:$0xff]  }
  0x51   : > { %3006 = vmatpush3.bf16.msra.mxu0 %v3202_v1  ;;  %v1452_v1 = vrot.slane %v1450_v49, 4  ;;  %v3225_v49 = vld [vmem:[%s3358_s10 + $0x108] ss:$8 sps:$4 sm:$0xff]  }
  0x52   : > { %3030 = vmatpush3.bf16.msra.mxu1 %v3203_v9  ;;  %3007 = vmatprep.subr.bf16.mxu0 %v3204_v14  ;;  %v3220_v9 = vld [vmem:[%s3899_s1 + $0x178] sm:$0xff]  }
  0x53   : > { %3031 = vmatprep.subr.bf16.mxu1 %v3205_v26 }
  0x54   : > { %2976 = vmatmul.mubr.bf16.gmra.mxu0 %v2552_v27  ;;  %v1445_v27 = vshll.u32 %v2470_v6, 16  ;;  %v3230_v6 = vld [vmem:[%s3899_s1 + $0x158] sm:$0xff]  }
  0x55   : > { %3008 = vmatpush3.bf16.msra.mxu0 %v3204_v14  ;;  %3000 = vmatmul.mubr.bf16.gmra.mxu1 %v2580_v28  ;;  %v3219_v14 = vld [vmem:[%s3358_s10 + $0xe8] ss:$8 sps:$4 sm:$0xff]   ;;  %v1459_v28 = vshll.u32 %v2472_v7, 16  ;;  %v3231_v7 = vld [vmem:[%s3899_s1 + $0x198] sm:$0xff]  }
  0x56   : > { %3032 = vmatpush3.bf16.msra.mxu1 %v3205_v26  ;;  %3009 = vmatprep.subr.bf16.mxu0 %v3208_v29  ;;  %v1456_v26 = vor.u32 %v1455_v4, %v1452_v1  ;;  %v1467_v1 = vshll.u32 %v3560_v50, 16  ;;  %v1478_v4 = vshrl.u32 %v3566_v54, 16 }
  0x57   : > { %3033 = vmatprep.subr.bf16.mxu1 %v3209_v32  ;;  %3019 = vmatprep.mubr.bf16.mxu0 %v3218_v33 }
  0x58   : > { %3043 = vmatprep.mubr.bf16.mxu1 %v3218_v33  ;;  %v3223_v33 = vld [vmem:[%s3899_s1 + $0x1b0] sm:$0xff]  }
  0x59   : > { %3010 = vmatpush3.bf16.msra.mxu0 %v3208_v29  ;;  %v3222_v29 = vld [vmem:[%s3899_s1 + $0x170] sm:$0xff]  }
  0x5a   : > { %3034 = vmatpush3.bf16.msra.mxu1 %v3209_v32  ;;  %3011 = vmatprep.subr.bf16.mxu0 %v3210_v34  ;;  %v1443_v32 = vrot.slane %v1442_v11, 4  ;;  %v1509_v11 = vshll.u32 %v3592_v8, 16 }
  0x5b   : > { %3035 = vmatprep.subr.bf16.mxu1 %v3211_v37 }
  0x5d   : > { %3012 = vmatpush3.bf16.msra.mxu0 %v3210_v34  ;;  %v3224_v34 = vld [vmem:[%s3358_s10 + $0xf8] ss:$8 sps:$4 sm:$0xff]  }
  0x5e   : > { %3036 = vmatpush3.bf16.msra.mxu1 %v3211_v37  ;;  %3013 = vmatprep.subr.bf16.mxu0 %v3212_v38  ;;  %v1457_v37 = vrot.slane %v1456_v26, 4  ;;  %v1480_v26 = vrot.slane %v1478_v4, 4 }
  0x5f   : > { %3037 = vmatprep.subr.bf16.mxu1 %v3213_v39 }
  0x61   : > { %3014 = vmatpush3.bf16.msra.mxu0 %v3212_v38  ;;  %v1447_v38 = vrot.slane %v1445_v27, 5 }
  0x62   : > { %3038 = vmatpush3.bf16.msra.mxu1 %v3213_v39  ;;  %3015 = vmatprep.subr.bf16.mxu0 %v3214_v51  ;;  %v1461_v39 = vrot.slane %v1459_v28, 5  ;;  %v3232_v28 = vld [vmem:[%s3899_s1 + $0x150] sm:$0xff]  }
  0x63   : > { %3039 = vmatprep.subr.bf16.mxu1 %v3215_v53 }
  0x64   : > { %v1462_v52 = vsel %vm3487_vm2, %v1457_v37, %v1461_v39 }
  0x65   : > { %3016 = vmatpush3.bf16.msra.mxu0 %v3214_v51  ;;  %v1448_v51 = vsel %vm3487_vm2, %v1443_v32, %v1447_v38  ;;  %v3233_v32 = vld [vmem:[%s3899_s1 + $0x190] sm:$0xff]   ;;  %v1511_v38 = vrot.slane %v1509_v11, 5  ;;  %v3236_v11 = vld [vmem:[%s3899_s1 + $0x140] sm:$0xff]  }
  0x66   : > { %3040 = vmatpush3.bf16.msra.mxu1 %v3215_v53  ;;  %3017 = vmatprep.subr.bf16.mxu0 %v3216_v60  ;;  %v3228_v53 = vld [vmem:[%s3899_s1 + $0x160] sm:$0xff]   ;;  %v2641_v23 = vcombine.low %v1448_v51, %v1462_v52  ;;  %v2478_v51 = vld [vmem:[%s3358_s10 + $0xb4] sm:$0x1] }
  0x67   : > { %3041 = vmatprep.subr.bf16.mxu1 %v3217_v25  ;;  %v1501_v4 = vshll.u32 %v2478_v51, 16 }
  0x69   : > { %3018 = vmatpush3.bf16.msra.mxu0 %v3216_v60  ;;  %v1464_v60 = vshrl.u32 %v3560_v50, 16  ;;  %v1492_v50 = vshrl.u32 %v3585_v2, 16 }
  0x6a   : > { %3042 = vmatpush3.bf16.msra.mxu1 %v3217_v25  ;;  %3051 = vmatprep.subr.bf16.mxu0 %v3220_v9  ;;  %v1481_v25 = vshll.u32 %v3566_v54, 16  ;;  %v1495_v54 = vshll.u32 %v3585_v2, 16  ;;  %v2474_v2 = vld [vmem:[%s3358_s10 + $0xa4] sm:$0x1] }
  0x6b   : > { %3075 = vmatprep.subr.bf16.mxu1 %v3221_v15 }
  0x6c   : > { %3020 = vmatmul.mubr.bf16.vlgmr.msra.gmra.mxu0 %v3219_v14  ;;  %v1483_v27 = vrot.slane %v1481_v25, 5 }
  0x6d   : > { %3044 = vmatmul.mubr.bf16.vlgmr.msra.gmra.mxu1 %v3219_v14  ;;  %3052 = vmatpush3.bf16.msra.mxu0 %v3220_v9  ;;  %v1506_v9 = vshrl.u32 %v3592_v8, 16  ;;  %v1466_v14 = vrot.slane %v1464_v60, 4  ;;  %v1520_v8 = vshrl.u32 %v3609_v19, 16  ;;  %v2480_v19 = vld [vmem:[%s3358_s10 + $0xbc] sm:$0x1]  ;;  %v3235_v60 = vld [vmem:[%s3899_s1 + $0x188] sm:$0xff]  }
  0x6e   : > { %3076 = vmatpush3.bf16.msra.mxu1 %v3221_v15  ;;  %3053 = vmatprep.subr.bf16.mxu0 %v3222_v29  ;;  %v1469_v15 = vrot.slane %v1467_v1, 5 }
  0x6f   : > { %3077 = vmatprep.subr.bf16.mxu1 %v3223_v33  ;;  %3023 = vmatprep.mubr.bf16.mxu0 %v3224_v34  ;;  %v1508_v37 = vrot.slane %v1506_v9, 4  ;;  %v1522_v52 = vrot.slane %v1520_v8, 4 }
  0x70   : > { %3047 = vmatprep.mubr.bf16.mxu1 %v3224_v34  ;;  %v1497_v34 = vrot.slane %v1495_v54, 5  ;;  %v1470_v39 = vor.u32 %v1469_v15, %v1466_v14  ;;  %v2482_v14 = vld [vmem:[%s3358_s10 + $0xc4] sm:$0x1]  ;;  %v2484_v15 = vld [vmem:[%s3358_s10 + $0xcc] sm:$0x1] }
  0x71   : > { %3054 = vmatpush3.bf16.msra.mxu0 %v3222_v29  ;;  %v2476_v29 = vld [vmem:[%s3358_s10 + $0xac] sm:$0x1]  ;;  %v1512_v25 = vor.u32 %v1511_v38, %v1508_v37  ;;  %v3241_v37 = vld [vmem:[%s3899_s1 + $0x238] sm:$0xff]  }
  0x72   : > { %3078 = vmatpush3.bf16.msra.mxu1 %v3223_v33  ;;  %3055 = vmatprep.subr.bf16.mxu0 %v3226_v40  ;;  %v1494_v33 = vrot.slane %v1492_v50, 4 }
  0x73   : > { %3079 = vmatprep.subr.bf16.mxu1 %v3227_v47  ;;  %v1513_v8 = vrot.slane %v1512_v25, 4  ;;  %v3249_v25 = vld [vmem:[%s3899_s1 + $0x220] sm:$0xff]  }
  0x74   : > { %3024 = vmatmul.mubr.bf16.gmra.mxu0 %v3225_v49  ;;  %v1498_v1 = vor.u32 %v1497_v34, %v1494_v33  ;;  %v1543_v33 = vshll.u32 %v2484_v15, 16  ;;  %v3240_v34 = vld [vmem:[%s3899_s1 + $0x1f8] sm:$0xff]   ;;  %v2468_v15 = vld [vmem:[%s3358_s10 + $0x88] sm:$0xf] }
  0x75   : > { %3048 = vmatmul.mubr.bf16.gmra.mxu1 %v3225_v49  ;;  %3056 = vmatpush3.bf16.msra.mxu0 %v3226_v40  ;;  %v1473_v40 = vshll.u32 %v2474_v2, 16  ;;  %v1487_v49 = vshll.u32 %v2476_v29, 16  ;;  %v1503_v29 = vrot.slane %v1501_v4, 5  ;;  %v3248_v4 = vld [vmem:[%s3899_s1 + $0x1e0] sm:$0xff]  }
  0x76   : > { %3080 = vmatpush3.bf16.msra.mxu1 %v3227_v47  ;;  %3057 = vmatprep.subr.bf16.mxu0 %v3228_v53  ;;  %v1484_v47 = vor.u32 %v1483_v27, %v1480_v26  ;;  %v3237_v26 = vld [vmem:[%s3899_s1 + $0x180] sm:$0xff]  }
  0x77   : > { %3081 = vmatprep.subr.bf16.mxu1 %v3229_v55  ;;  %3067 = vmatprep.mubr.bf16.mxu0 %v2641_v23  ;;  %v1475_v50 = vrot.slane %v1473_v40, 5  ;;  %v1489_v9 = vrot.slane %v1487_v49, 5 }
  0x78   : > { %3091 = vmatprep.mubr.bf16.mxu1 %v2669_v24  ;;  %v1537_v24 = vshll.u32 %v3612_v20, 16  ;;  %v3234_v20 = vld [vmem:[%s3899_s1 + $0x148] sm:$0xff]   ;;  %v1485_v54 = vrot.slane %v1484_v47, 4 }
  0x79   : > { %3058 = vmatpush3.bf16.msra.mxu0 %v3228_v53  ;;  %v1525_v53 = vrot.slane %v1523_v18, 5 }
  0x7a   : > { %3082 = vmatpush3.bf16.msra.mxu1 %v3229_v55  ;;  %3059 = vmatprep.subr.bf16.mxu0 %v3230_v6  ;;  %v1536_v55 = vrot.slane %v1534_v22, 4  ;;  %v1539_v23 = vrot.slane %v1537_v24, 5  ;;  %v1490_v24 = vsel %vm3487_vm2, %v1485_v54, %v1489_v9 }
  0x7b   : > { %3083 = vmatprep.subr.bf16.mxu1 %v3231_v7  ;;  %v1526_v27 = vor.u32 %v1525_v53, %v1522_v52  ;;  %v3243_v52 = vld [vmem:[%s3899_s1 + $0x230] sm:$0xff]  }
  0x7c   : > { %v1540_v2 = vor.u32 %v1539_v23, %v1536_v55 }
  0x7d   : > { %3060 = vmatpush3.bf16.msra.mxu0 %v3230_v6  ;;  %v1515_v6 = vshll.u32 %v2480_v19, 16  ;;  %v1527_v47 = vrot.slane %v1526_v27, 4  ;;  %v1545_v19 = vrot.slane %v1543_v33, 5  ;;  %v3260_v27 = vld [vmem:[%s3358_s10 + $0x80] sm:$0xf] }
  0x7e   : > { %3084 = vmatpush3.bf16.msra.mxu1 %v3231_v7  ;;  %3061 = vmatprep.subr.bf16.mxu0 %v3232_v28  ;;  %v1471_v7 = vrot.slane %v1470_v39, 4  ;;  %v1541_v51 = vrot.slane %v1540_v2, 4  ;;  %v2700_v2 = vcombine.low %v3260_v27, %v2468_v15 }
  0x7f   : > { %3085 = vmatprep.subr.bf16.mxu1 %v3233_v32  ;;  %v1517_v18 = vrot.slane %v1515_v6, 5  ;;  %v3256_v6 = vld [vmem:[%s3899_s1 + $0x1c0] sm:$0xff]  }
  0x80   : > { %v1476_v22 = vsel %vm3487_vm2, %v1471_v7, %v1475_v50  ;;  %v1546_v23 = vsel %vm3487_vm2, %v1541_v51, %v1545_v19  ;;  %v3257_v7 = vld [vmem:[%s3899_s1 + $0x200] sm:$0xff]  }
  0x81   : > { %3062 = vmatpush3.bf16.msra.mxu0 %v3232_v28  ;;  %v1499_v28 = vrot.slane %v1498_v1, 4  ;;  %v2642_v38 = vcombine.low %v1476_v22, %v1490_v24  ;;  %v1518_v40 = vsel %vm3487_vm2, %v1513_v8, %v1517_v18  ;;  %v368_v1 = vld [vmem:[%s3358_s10 + $0x40] sm:$0xf]  ;;  %v369_v50 = vld [vmem:[%s3358_s10 + $0x44] sm:$0x1]  ;;  %s2739_s10 = sshll.u32 %s3910_s28, 5 }
  0x82   : > { %3086 = vmatpush3.bf16.msra.mxu1 %v3233_v32  ;;  %3063 = vmatprep.subr.bf16.mxu0 %v3234_v20  ;;  %v1529_v32 = vshll.u32 %v2482_v14, 16  ;;  %v1998_v12 = vshrl.u32 %v368_v1, 16  ;;  %v2001_v13 = vshll.u32 %v368_v1, 16  ;;  %v2007_v9 = vshll.u32 %v369_v50, 16  ;;  %s3850_s20 = scalar_lea.vmem %s3904_s6, %s2739_s10  ;;  %s3881_s9 = scalar_lea.vmem %s3901_s3, %s2739_s10 }
  0x83   : > { %3087 = vmatprep.subr.bf16.mxu1 %v3235_v60  ;;  %v1504_v39 = vsel %vm3487_vm2, %v1499_v28, %v1503_v29 }
  0x84   : > { %v1531_v49 = vrot.slane %v1529_v32, 5  ;;  %v2643_v53 = vcombine.low %v1504_v39, %v1518_v40  ;;  %v2000_v5 = vrot.slane %v1998_v12, 4  ;;  %v2009_v14 = vrot.slane %v2007_v9, 5 }
  0x85   : > { %3064 = vmatpush3.bf16.msra.mxu0 %v3234_v20  ;;  %v3242_v20 = vld [vmem:[%s3899_s1 + $0x1f0] sm:$0xff]  }
  0x86   : > { %3088 = vmatpush3.bf16.msra.mxu1 %v3235_v60  ;;  %3065 = vmatprep.subr.bf16.mxu0 %v3236_v11  ;;  %v1532_v55 = vsel %vm3487_vm2, %v1527_v47, %v1531_v49  ;;  %v3244_v60 = vld [vmem:[%s3899_s1 + $0x1e8] sm:$0xff]  }
  0x87   : > { %3089 = vmatprep.subr.bf16.mxu1 %v3237_v26  ;;  %v2644_v45 = vcombine.low %v1532_v55, %v1546_v23 }
  0x89   : > { %3066 = vmatpush3.bf16.msra.mxu0 %v3236_v11 }
  0x8a   : > { %3090 = vmatpush3.bf16.msra.mxu1 %v3237_v26  ;;  %3099 = vmatprep.subr.bf16.mxu0 %v3240_v34 }
  0x8b   : > { %3123 = vmatprep.subr.bf16.mxu1 %v3241_v37 }
  0x8c   : > { %3068 = vmatmul.mubr.bf16.vlgmr.msra.gmra.mxu0 %v2642_v38 }
  0x8d   : > { %3092 = vmatmul.mubr.bf16.vlgmr.msra.gmra.mxu1 %v2670_v57  ;;  %3100 = vmatpush3.bf16.msra.mxu0 %v3240_v34  ;;  %v2672_v57 = vcombine.low %v3463_v62, %v368_v1  ;;  %v3252_v62 = vld [vmem:[%s3899_s1 + $0x1d0] sm:$0xff]  }
  0x8e   : > { %3124 = vmatpush3.bf16.msra.mxu1 %v3241_v37  ;;  %3101 = vmatprep.subr.bf16.mxu0 %v3242_v20 }
  0x8f   : > { %3125 = vmatprep.subr.bf16.mxu1 %v3243_v52  ;;  %3071 = vmatprep.mubr.bf16.mxu0 %v2643_v53 }
  0x90   : > { %3095 = vmatprep.mubr.bf16.mxu1 %v2671_v63  ;;  %v3253_v63 = vld [vmem:[%s3899_s1 + $0x210] sm:$0xff]  }
  0x91   : > { %3102 = vmatpush3.bf16.msra.mxu0 %v3242_v20 }
  0x92   : > { %3126 = vmatpush3.bf16.msra.mxu1 %v3243_v52  ;;  %3103 = vmatprep.subr.bf16.mxu0 %v3244_v60 }
  0x93   : > { %3127 = vmatprep.subr.bf16.mxu1 %v3245_v31 }
  0x94   : > { %3072 = vmatmul.mubr.bf16.gmra.mxu0 %v2644_v45 }
  0x95   : > { %3104 = vmatpush3.bf16.msra.mxu0 %v3244_v60  ;;  %3096 = vmatmul.mubr.bf16.gmra.mxu1 %v2672_v57 }
  0x96   : > { %3128 = vmatpush3.bf16.msra.mxu1 %v3245_v31  ;;  %3105 = vmatprep.subr.bf16.mxu0 %v3248_v4 }
  0x97   : > { %3129 = vmatprep.subr.bf16.mxu1 %v3249_v25  ;;  %3115 = vmatprep.mubr.bf16.mxu0 %v2697_v16  ;;  %v3254_v16 = vld [vmem:[%s3899_s1 + $0x1c8] sm:$0xff]  }
  0x98   : > { %3139 = vmatprep.mubr.bf16.mxu1 %v2725_v10  ;;  %v2003_v10 = vrot.slane %v2001_v13, 5 }
  0x99   : > { %3106 = vmatpush3.bf16.msra.mxu0 %v3248_v4 }
  0x9a   : > { %3130 = vmatpush3.bf16.msra.mxu1 %v3249_v25  ;;  %3107 = vmatprep.subr.bf16.mxu0 %v3250_v46  ;;  %v2004_v54 = vor.u32 %v2003_v10, %v2000_v5 }
  0x9b   : > { %3131 = vmatprep.subr.bf16.mxu1 %v3251_v61 }
  0x9c   : > { %v2005_v11 = vrot.slane %v2004_v54, 4 }
  0x9d   : > { %3108 = vmatpush3.bf16.msra.mxu0 %v3250_v46 }
  0x9e   : > { %3132 = vmatpush3.bf16.msra.mxu1 %v3251_v61  ;;  %3109 = vmatprep.subr.bf16.mxu0 %v3252_v62  ;;  %v2010_v26 = vsel %vm3487_vm2, %v2005_v11, %v2009_v14 }
  0x9f   : > { %3133 = vmatprep.subr.bf16.mxu1 %v3253_v63  ;;  %v2728_v30 = vcombine.low %v3606_v17, %v2010_v26 }
  0xa1   : > { %3110 = vmatpush3.bf16.msra.mxu0 %v3252_v62 }
  0xa2   : > { %3134 = vmatpush3.bf16.msra.mxu1 %v3253_v63  ;;  %3111 = vmatprep.subr.bf16.mxu0 %v3254_v16 }
  0xa3   : > { %3135 = vmatprep.subr.bf16.mxu1 %v3255_v48 }
  0xa5   : > { %3112 = vmatpush3.bf16.msra.mxu0 %v3254_v16 }
  0xa6   : > { %3136 = vmatpush3.bf16.msra.mxu1 %v3255_v48  ;;  %3113 = vmatprep.subr.bf16.mxu0 %v3256_v6 }
  0xa7   : > { %3137 = vmatprep.subr.bf16.mxu1 %v3257_v7 }
  0xa9   : > { %3114 = vmatpush3.bf16.msra.mxu0 %v3256_v6 }
  0xaa   : > { %3138 = vmatpush3.bf16.msra.mxu1 %v3257_v7 }
  0xac   : > { %3116 = vmatmul.mubr.bf16.vlgmr.msra.gmra.mxu0 %v2698_v44 }
  0xad   : > { %3140 = vmatmul.mubr.bf16.vlgmr.msra.gmra.mxu1 %v2726_v42  ;;  %3119 = vmatprep.mubr.bf16.mxu0 %v2699_v0 }
  0xae   : > { %3143 = vmatprep.mubr.bf16.mxu1 %v2727_v3 }
  0xb4   : > { %3120 = vmatmul.mubr.bf16.gmra.mxu0 %v2700_v2 }
  0xb5   : > { %3144 = vmatmul.mubr.bf16.gmra.mxu1 %v2728_v30 }
  0xec   : > { %v2925_v41 = vpop.f32.mrf.mxu0 }
  0xed   : > { %v2949_v44 = vpop.f32.mrf.mxu1 }
  0xee   : > { %v545_v35 = vpop.f32.mrf.mxu0  ;;  %v691_v18 = vadd.f32 %v2949_v44, %v2925_v41 }
  0xef   : > { %v682_v36 = vpop.f32.mrf.mxu1 }
  0xf0   : > { %v2926_v43 = vpop.f32.mrf.mxu0  ;;  %v683_v24 = vadd.f32 %v682_v36, %v545_v35 }
  0xf1   : > { %v2950_v56 = vpop.f32.mrf.mxu1 }
  0xf2   : > { %v548_v0 = vpop.f32.mrf.mxu0  ;;  %v694_v37 = vadd.f32 %v2950_v56, %v2926_v43 }
  0xf3   : > { %v685_v42 = vpop.f32.mrf.mxu1 }
  0xf4   : > { %v2929_v28 = vpop.f32.mrf.mxu0  ;;  %v686_v49 = vadd.f32 %v685_v42, %v548_v0 }
  0xf5   : > { %v2953_v58 = vpop.f32.mrf.mxu1 }
  0xf6   : > { %v561_v59 = vpop.f32.mrf.mxu0  ;;  %v707_v53 = vadd.f32 %v2953_v58, %v2929_v28 }
  0xf7   : > { %v698_v3 = vpop.f32.mrf.mxu1 }
  0xf8   : > { %v2930_v21 = vpop.f32.mrf.mxu0  ;;  %v699_v31 = vadd.f32 %v698_v3, %v561_v59 }
  0xf9   : > { %v2954_v29 = vpop.f32.mrf.mxu1 }
  0xfa   : > { %v564_v8 = vpop.f32.mrf.mxu0  ;;  %v710_v46 = vadd.f32 %v2954_v29, %v2930_v21 }
  0xfb   : > { %v701_v22 = vpop.f32.mrf.mxu1 }
  0xfc   : > { %v702_v13 = vadd.f32 %v701_v22, %v564_v8 }
 0x10c   : > { %v2973_v17 = vpop.f32.mrf.mxu0 }
 0x10d   : > { %v976_v32 = vadd.f32 %v2973_v17, %v691_v18  ;;  %v2997_v33 = vpop.f32.mrf.mxu1 }
 0x10e   : > { %v943_v34 = vpop.f32.mrf.mxu0 }
 0x10f   : > { %v3826_v38 = vadd.f32 %v2997_v33, %v976_v32  ;;  %v974_v39 = vadd.f32 %v943_v34, %v683_v24  ;;  %v1105_v40 = vpop.f32.mrf.mxu1 }
 0x110   : > { %v2974_v47 = vpop.f32.mrf.mxu0 }
 0x111   : > { %v3828_v51 = vadd.f32 %v1105_v40, %v974_v39  ;;  %v977_v19 = vadd.f32 %v2974_v47, %v694_v37  ;;  %v2998_v20 = vpop.f32.mrf.mxu1 }
 0x112   : > { %v946_v52 = vpop.f32.mrf.mxu0 }
 0x113   : > { %v3830_v55 = vadd.f32 %v2998_v20, %v977_v19  ;;  %v975_v23 = vadd.f32 %v946_v52, %v686_v49  ;;  %v1108_v60 = vpop.f32.mrf.mxu1 }
 0x114   : > { %v2977_v1 = vpop.f32.mrf.mxu0 }
 0x115   : > { %v3832_v45 = vadd.f32 %v1108_v60, %v975_v23  ;;  %v980_v57 = vadd.f32 %v2977_v1, %v707_v53  ;;  %v3001_v4 = vpop.f32.mrf.mxu1 }
 0x116   : > { %v959_v25 = vpop.f32.mrf.mxu0 }
 0x117   : > { %v978_v61 = vadd.f32 %v959_v25, %v699_v31  ;;  %v3834_v62 = vadd.f32 %v3001_v4, %v980_v57  ;;  %v1121_v63 = vpop.f32.mrf.mxu1 }
 0x118   : > { %v2978_v12 = vpop.f32.mrf.mxu0 }
 0x119   : > { %v981_v16 = vadd.f32 %v2978_v12, %v710_v46  ;;  %v3836_v48 = vadd.f32 %v1121_v63, %v978_v61  ;;  %v3002_v5 = vpop.f32.mrf.mxu1 }
 0x11a   : > { %v962_v10 = vpop.f32.mrf.mxu0 }
 0x11b   : > { %v979_v6 = vadd.f32 %v962_v10, %v702_v13  ;;  %v3838_v7 = vadd.f32 %v3002_v5, %v981_v16  ;;  %v1124_v50 = vpop.f32.mrf.mxu1 }
 0x11d   : > { %v3840_v54 = vadd.f32 %v1124_v50, %v979_v6 }
 0x12c   : > { %v3843_v14 = vpop.f32.mrf.mxu0 }
 0x12d   : > { %v3045_v9 = vpop.f32.mrf.mxu1 }
 0x12e   : > { %v3852_v2 = vpop.f32.mrf.mxu0  ;;  %v2242_v43 = vmul.f32 %v3045_v9, %v3045_v9 }
 0x12f   : > { %v1404_v11 = vpop.f32.mrf.mxu1 }
 0x130   : > { %v2240_v30 = vmul.f32 %v1404_v11, %v1404_v11  ;;  %v3022_v28 = vpop.f32.mrf.mxu0 }
 0x131   : > { %v3046_v15 = vpop.f32.mrf.mxu1 }
 0x132   : > { %v2769_v26 = vpack.c.bf16 %v3046_v15, %v3045_v9  ;;  %v2243_v58 = vmul.f32 %v3046_v15, %v3046_v15  ;;  %v1270_v32 = vpop.f32.mrf.mxu0 }
 0x133   : > { %v1407_v27 = vpop.f32.mrf.mxu1 }
 0x134   : > { %2784 = vst [vmem:[%s3850_s20 + $0x8] sm:$0xff] %v2769_v26   ;;  %v2764_v41 = vpack.c.bf16 %v1407_v27, %v1404_v11  ;;  %v2226_v44 = vadd.f32 %v1407_v27, %v1404_v11  ;;  %v2241_v35 = vmul.f32 %v1407_v27, %v1407_v27  ;;  %v3025_v19 = vpop.f32.mrf.mxu0 }
 0x135   : > { %v3049_v36 = vpop.f32.mrf.mxu1 }
 0x136   : > { %2765 = vst [vmem:[%s3850_s20] sm:$0xff] %v2764_v41   ;;  %v2227_v56 = vadd.f32 %v3045_v9, %v2226_v44  ;;  %v2248_v0 = vadd.f32 %v2241_v35, %v2240_v30  ;;  %v2246_v17 = vmul.f32 %v3049_v36, %v3049_v36  ;;  %v1283_v60 = vpop.f32.mrf.mxu0 }
 0x137   : > { %v1420_v42 = vpop.f32.mrf.mxu1 }
 0x138   : > { %v2249_v59 = vadd.f32 %v2248_v0, %v2242_v43  ;;  %v2228_v3 = vadd.f32 %v3046_v15, %v2227_v56  ;;  %v2244_v21 = vmul.f32 %v1420_v42, %v1420_v42  ;;  %v3026_v25 = vpop.f32.mrf.mxu0  ;;  %v1300_v56 = vadd.f32 %v3843_v14, %v3826_v38 }
 0x139   : > { %v3050_v29 = vpop.f32.mrf.mxu1  ;;  %v1298_v0 = vadd.f32 %v3852_v2, %v3828_v51  ;;  %v1304_v38 = vadd.f32 %v3025_v19, %v3834_v62 }
 0x13a   : > { %v2229_v8 = vadd.f32 %v2228_v3, %v1420_v42  ;;  %v2250_v18 = vadd.f32 %v2249_v59, %v2243_v58  ;;  %v2779_v22 = vpack.c.bf16 %v3050_v29, %v3049_v36  ;;  %v2247_v40 = vmul.f32 %v3050_v29, %v3050_v29  ;;  %v1286_v13 = vpop.f32.mrf.mxu0 }
 0x13b   : > { %v1423_v24 = vpop.f32.mrf.mxu1  ;;  %v1301_v58 = vadd.f32 %v3022_v28, %v3830_v55  ;;  %v1302_v55 = vadd.f32 %v1283_v60, %v3836_v48  ;;  %v1305_v28 = vadd.f32 %v3026_v25, %v3838_v7 }
 0x13c   : > { %v2251_v33 = vadd.f32 %v2250_v18, %v2244_v21  ;;  %2786 = vst [vmem:[%s3850_s20 + $0x18] sm:$0xff] %v2779_v22   ;;  %v2774_v34 = vpack.c.bf16 %v1423_v24, %v1420_v42  ;;  %v2230_v37 = vadd.f32 %v2229_v8, %v1423_v24  ;;  %v2245_v39 = vmul.f32 %v1423_v24, %v1423_v24 }
 0x13e   : > { %2785 = vst [vmem:[%s3850_s20 + $0x10] sm:$0xff] %v2774_v34   ;;  %v2231_v47 = vadd.f32 %v3049_v36, %v2230_v37  ;;  %v2252_v49 = vadd.f32 %v2251_v33, %v2245_v39 }
 0x140   : > { %v2232_v20 = vadd.f32 %v3050_v29, %v2231_v47  ;;  %v2253_v52 = vadd.f32 %v2252_v49, %v2246_v17  ;;  %v1299_v29 = vadd.f32 %v1270_v32, %v3832_v45 }
 0x142   : > { %v2233_v53 = vrot.slane %v2232_v20, 4  ;;  %v2254_v23 = vadd.f32 %v2253_v52, %v2247_v40 }
 0x144   : > { %v2234_v1 = vadd.f32 %v2233_v53, %v2232_v20  ;;  %v2255_v31 = vrot.slane %v2254_v23, 4  ;;  %v1303_v20 = vadd.f32 %v1286_v13, %v3840_v54 }
 0x146   : > { %v2235_v57 = vrot.slane %v2234_v1, 2  ;;  %v2256_v4 = vadd.f32 %v2255_v31, %v2254_v23 }
 0x148   : > { %v2236_v46 = vadd.f32 %v2235_v57, %v2234_v1  ;;  %v2257_v61 = vrot.slane %v2256_v4, 2 }
 0x14a   : > { %v2237_v63 = vrot.slane %v2236_v46, 1  ;;  %v2258_v12 = vadd.f32 %v2257_v61, %v2256_v4 }
 0x14c   : > { %v2238_v16 = vadd.f32 %v2237_v63, %v2236_v46  ;;  %v2259_v5 = vrot.slane %v2258_v12, 1  ;;  %v3069_v6 = vpop.f32.mrf.mxu0 }
 0x14d   : > { %v3093_v50 = vpop.f32.mrf.mxu1  ;;  %v1695_v59 = vadd.f32 %v3069_v6, %v1300_v56 }
 0x14e   : > { %2239 = vst [vmem:[%s347_s23] sm:$0x1] %v2238_v16  ;;  %v2260_v10 = vadd.f32 %v2259_v5, %v2258_v12  ;;  %v1662_v9 = vpop.f32.mrf.mxu0 }
 0x14f   : > { %v1810_v11 = vpop.f32.mrf.mxu1  ;;  %v1693_v3 = vadd.f32 %v1662_v9, %v1298_v0  ;;  %v1843_v17 = vadd.f32 %v3093_v50, %v1695_v59 }
 0x150   : > { %2261 = vst [vmem:[%s350_s26] sm:$0x1] %v2260_v10  ;;  %v3070_v15 = vpop.f32.mrf.mxu0 }
 0x151   : > { %v3094_v26 = vpop.f32.mrf.mxu1  ;;  %v1696_v8 = vadd.f32 %v3070_v15, %v1301_v58  ;;  %v1841_v24 = vadd.f32 %v1810_v11, %v1693_v3 }
 0x152   : > { %v1665_v27 = vpop.f32.mrf.mxu0 }
 0x153   : > { %v1813_v30 = vpop.f32.mrf.mxu1  ;;  %v1694_v33 = vadd.f32 %v1665_v27, %v1299_v29  ;;  %v1844_v37 = vadd.f32 %v3094_v26, %v1696_v8 }
 0x154   : > { %v3073_v41 = vpop.f32.mrf.mxu0 }
 0x155   : > { %v3097_v44 = vpop.f32.mrf.mxu1  ;;  %v1699_v40 = vadd.f32 %v3073_v41, %v1304_v38  ;;  %v1842_v32 = vadd.f32 %v1813_v30, %v1694_v33 }
 0x156   : > { %v1678_v35 = vpop.f32.mrf.mxu0 }
 0x157   : > { %v1826_v36 = vpop.f32.mrf.mxu1  ;;  %v1697_v52 = vadd.f32 %v1678_v35, %v1302_v55  ;;  %v1847_v4 = vadd.f32 %v3097_v44, %v1699_v40 }
 0x158   : > { %v3074_v43 = vpop.f32.mrf.mxu0 }
 0x159   : > { %v3098_v42 = vpop.f32.mrf.mxu1  ;;  %v1700_v53 = vadd.f32 %v3074_v43, %v1305_v28  ;;  %v1845_v46 = vadd.f32 %v1826_v36, %v1697_v52 }
 0x15a   : > { %v1681_v21 = vpop.f32.mrf.mxu0 }
 0x15b   : > { %v1829_v18 = vpop.f32.mrf.mxu1  ;;  %v1698_v48 = vadd.f32 %v1681_v21, %v1303_v20  ;;  %v1848_v61 = vadd.f32 %v3098_v42, %v1700_v53 }
 0x15d   : > { %v1846_v50 = vadd.f32 %v1829_v18, %v1698_v48 }
 0x16c   : > { %v3117_v22 = vpop.f32.mrf.mxu0 }
 0x16d   : > { %v3141_v34 = vpop.f32.mrf.mxu1  ;;  %v1991_v51 = vadd.f32 %v3117_v22, %v1843_v17 }
 0x16e   : > { %v1958_v14 = vpop.f32.mrf.mxu0 }
 0x16f   : > { %v1989_v2 = vadd.f32 %v1958_v14, %v1841_v24  ;;  %v2119_v39 = vpop.f32.mrf.mxu1  ;;  %v2152_v19 = vadd.f32 %v3141_v34, %v1991_v51 }
 0x170   : > { %v3118_v45 = vpop.f32.mrf.mxu0 }
 0x171   : > { %v1992_v47 = vadd.f32 %v3118_v45, %v1844_v37  ;;  %v3142_v49 = vpop.f32.mrf.mxu1  ;;  %v2150_v23 = vadd.f32 %v2119_v39, %v1989_v2  ;;  %v2190_v15 = vmul.f32 %v2152_v19, %v2152_v19 }
 0x172   : > { %v1961_v62 = vpop.f32.mrf.mxu0 }
 0x173   : > { %v2153_v1 = vadd.f32 %v3142_v49, %v1992_v47  ;;  %v1990_v31 = vadd.f32 %v1961_v62, %v1842_v32  ;;  %v2122_v57 = vpop.f32.mrf.mxu1  ;;  %v2188_v13 = vmul.f32 %v2150_v23, %v2150_v23 }
 0x174   : > { %v3121_v7 = vpop.f32.mrf.mxu0 }
 0x175   : > { %v2749_v60 = vpack.c.bf16 %v2153_v1, %v2152_v19  ;;  %v2151_v54 = vadd.f32 %v2122_v57, %v1990_v31  ;;  %v3145_v25 = vpop.f32.mrf.mxu1  ;;  %v1995_v63 = vadd.f32 %v3121_v7, %v1847_v4  ;;  %v2191_v44 = vmul.f32 %v2153_v1, %v2153_v1 }
 0x176   : > { %v1974_v12 = vpop.f32.mrf.mxu0 }
 0x177   : > { %2781 = vst [vmem:[%s3881_s9 + $0x8] sm:$0xff] %v2749_v60   ;;  %v2744_v16 = vpack.c.bf16 %v2151_v54, %v2150_v23  ;;  %v2174_v5 = vadd.f32 %v2151_v54, %v2150_v23  ;;  %v2189_v10 = vmul.f32 %v2151_v54, %v2151_v54  ;;  %v2135_v6 = vpop.f32.mrf.mxu1  ;;  %v1993_v9 = vadd.f32 %v1974_v12, %v1845_v46 }
 0x178   : > { %v3122_v11 = vpop.f32.mrf.mxu0  ;;  %v2156_v35 = vadd.f32 %v3145_v25, %v1995_v63 }
 0x179   : > { %2745 = vst [vmem:[%s3881_s9] sm:$0xff] %v2744_v16   ;;  %v2175_v26 = vadd.f32 %v2174_v5, %v2152_v19  ;;  %v2196_v27 = vadd.f32 %v2189_v10, %v2188_v13  ;;  %v1996_v30 = vadd.f32 %v3122_v11, %v1848_v61  ;;  %v3146_v41 = vpop.f32.mrf.mxu1  ;;  %v2154_v36 = vadd.f32 %v2135_v6, %v1993_v9 }
 0x17a   : > { %v1977_v43 = vpop.f32.mrf.mxu0  ;;  %v2194_v34 = vmul.f32 %v2156_v35, %v2156_v35 }
 0x17b   : > { %v2197_v56 = vadd.f32 %v2196_v27, %v2190_v15  ;;  %v2176_v0 = vadd.f32 %v2175_v26, %v2153_v1  ;;  %v2157_v42 = vadd.f32 %v3146_v41, %v1996_v30  ;;  %v1994_v58 = vadd.f32 %v1977_v43, %v1846_v50  ;;  %v2138_v8 = vpop.f32.mrf.mxu1 }
 0x17c   : > { %v2192_v3 = vmul.f32 %v2154_v36, %v2154_v36 }
 0x17d   : > { %v2177_v59 = vadd.f32 %v2176_v0, %v2154_v36  ;;  %v2198_v21 = vadd.f32 %v2197_v56, %v2191_v44  ;;  %v2759_v29 = vpack.c.bf16 %v2157_v42, %v2156_v35  ;;  %v2155_v18 = vadd.f32 %v2138_v8, %v1994_v58 }
 0x17e   : > { %v2195_v37 = vmul.f32 %v2157_v42, %v2157_v42 }
 0x17f   : > { %v2199_v22 = vadd.f32 %v2198_v21, %v2192_v3  ;;  %2783 = vst [vmem:[%s3881_s9 + $0x18] sm:$0xff] %v2759_v29   ;;  %v2754_v17 = vpack.c.bf16 %v2155_v18, %v2154_v36  ;;  %v2178_v24 = vadd.f32 %v2177_v59, %v2155_v18  ;;  %v2193_v33 = vmul.f32 %v2155_v18, %v2155_v18 }
 0x181   : > { %2782 = vst [vmem:[%s3881_s9 + $0x10] sm:$0xff] %v2754_v17   ;;  %v2179_v38 = vadd.f32 %v2178_v24, %v2156_v35  ;;  %v2200_v14 = vadd.f32 %v2199_v22, %v2193_v33 }
 0x183   : > { %v2180_v51 = vadd.f32 %v2179_v38, %v2157_v42  ;;  %v2201_v2 = vadd.f32 %v2200_v14, %v2194_v34 }
 0x185   : > { %v2181_v39 = vrot.slane %v2180_v51, 4  ;;  %v2202_v55 = vadd.f32 %v2201_v2, %v2195_v37 }
 0x187   : > { %v2182_v28 = vadd.f32 %v2181_v39, %v2180_v51  ;;  %v2203_v40 = vrot.slane %v2202_v55, 4 }
 0x189   : > { %v2183_v45 = vrot.slane %v2182_v28, 2  ;;  %v2204_v32 = vadd.f32 %v2203_v40, %v2202_v55 }
 0x18b   : > { %v2184_v47 = vadd.f32 %v2183_v45, %v2182_v28  ;;  %v2205_v49 = vrot.slane %v2204_v32, 2 }
 0x18d   : > { %v2185_v20 = vrot.slane %v2184_v47, 1  ;;  %v2206_v52 = vadd.f32 %v2205_v49, %v2204_v32 }
 0x18f   : > { %v2186_v53 = vadd.f32 %v2185_v20, %v2184_v47  ;;  %v2207_v62 = vrot.slane %v2206_v52, 1 }
 0x191   : > { %2187 = vst [vmem:[%s336_s13] sm:$0x1] %v2186_v53  ;;  %v2208_v19 = vadd.f32 %v2207_v62, %v2206_v52 }
 0x193   : > { %2209 = vst [vmem:[%s339_s16] sm:$0x1] %v2208_v19 }
 0x194 PF: > { %s19_s27 = sadd.s32 1, %s3267_s27  }
 0x195   : > { %p16_p4 = scmp.ge.s32.totalorder %s19_s27, 4  }
 0x197   :  { %18 = sbr.rel (!%p16_p4) target bundleno = 1 (0x1), region = 133 }

// kernel: _block_jit.4
= control target key start
LH: loop header
LB: loop body
LE: loop exit
PB: predicated region body
PF: predicated region fallthrough
CT: control target
= control target key end

     0   :  { %s2982_s21 = smov 0   ;;  %s3681_s0 = inlined_call_operand.vmem [shape: bf16[2,8,8,128], index: 0, kind: input, shape index: {}]   ;;  %s3682_s1 = inlined_call_operand.vmem [shape: bf16[3,3,128,128], index: 1, kind: input, shape index: {}]   ;;  %s3683_s2 = inlined_call_operand.vmem [shape: f32[1,1,128], index: 2, kind: input, shape index: {}]   ;;  %s3684_s3 = inlined_call_operand.vmem [shape: f32[1,1,128], index: 3, kind: input, shape index: {}]   ;;  %s3685_s4 = inlined_call_operand.vmem [shape: bf16[2,8,8,128], index: 4, kind: output, shape index: {0}]   ;;  %s3686_s5 = inlined_call_operand.vmem [shape: f32[2,1,128], index: 5, kind: output, shape index: {1}]   ;;  %s3687_s6 = inlined_call_operand.vmem [shape: f32[2,1,128], index: 6, kind: output, shape index: {2}]  }
   0x1 LB: > { %s2203_s22 = sadd.s32 4294967295, %s2944_s21   ;;  %p2207_p0 = scmp.ge.s32.totalorder %s2944_s21, 1  ;;  %s2944_s21 = sphi %s2982_s21, %s17_s21  }
   0x2   : > { %p217_p1 = scmp.lt.s32.totalorder %s2944_s21, 3 }
   0x4   : > { %p218_p2 = pnand %p2207_p0, %p217_p1 }
   0x6   : > { %221 = sbr.rel (%p218_p2) target bundleno = 415 (0x19f), region = 36 }
   0xb   : > { %v2862_v0 = vld [vmem:[%s3682_s1 + $0x38] sm:$0xff]   ;;  %p2995_p3 = scmp.lt.s32.totalorder %s2203_s22, 1  ;;  %v2863_v1 = vld [vmem:[%s3682_s1 + $0x30] sm:$0xff]   ;;  %v2946_v3 = vmov 0   ;;  %v2865_v4 = vld [vmem:[%s3682_s1 + $0x28] sm:$0xff]   ;;  %vm457_vm0 = vcmask 1043456  }
   0xc   : > { %2645 = vmatprep.subr.bf16.mxu1 %v2862_v0  ;;  %v2864_v2 = vld [vmem:[%s3682_s1 + $0x78] sm:$0xff]   ;;  %332 = vst [vmem:[#allocation2] sm:$0xf] %v2946_v3  ;;  %334 = vst [vmem:[#allocation2 + $0x8] sm:$0xf] %v2946_v3  ;;  %v2866_v5 = vld [vmem:[%s3682_s1 + $0x70] sm:$0xff]  }
   0xd   : > { %333 = vst [vmem:[#allocation2 + $0x4] sm:$0x1] %v2946_v3  ;;  %335 = vst [vmem:[#allocation2 + $0xc] sm:$0x1] %v2946_v3  ;;  %2646 = vmatpush3.bf16.msra.mxu1 %v2862_v0  ;;  %2621 = vmatprep.subr.bf16.mxu0 %v2864_v2  ;;  %s3718_s22 = smov (!%p2995_p3, %s2203_s22), 1  ;;  %v2868_v6 = vld [vmem:[%s3682_s1 + $0x68] sm:$0xff]  }
   0xe   : > { %336 = vst [vmem:[#allocation2 + $0x10] sm:$0xf] %v2946_v3  ;;  %337 = vst [vmem:[#allocation2 + $0x14] sm:$0x1] %v2946_v3  ;;  %2647 = vmatprep.subr.bf16.mxu1 %v2863_v1  ;;  %2622 = vmatpush3.bf16.msra.mxu0 %v2864_v2  ;;  %v2867_v7 = vld [vmem:[%s3682_s1 + $0x20] sm:$0xff]   ;;  %s2461_s14 = sshll.u32 %s3718_s22, 5  ;;  %s265_s8 = scalar_lea.vmem %s3686_s5, %s3718_s22 }
   0xf   : > { %338 = vst [vmem:[#allocation2 + $0x18] sm:$0xf] %v2946_v3  ;;  %339 = vst [vmem:[#allocation2 + $0x1c] sm:$0x1] %v2946_v3  ;;  %2623 = vmatprep.subr.bf16.mxu0 %v2866_v5  ;;  %v2870_v8 = vld [vmem:[%s3682_s1 + $0x60] sm:$0xff]   ;;  %v2869_v9 = vld [vmem:[%s3682_s1 + $0x18] sm:$0xff]   ;;  %s3035_s23 = scalar_lea.vmem %s3681_s0, %s2461_s14  ;;  %s3654_s30 = scalar_lea.vmem %s3685_s4, %s2461_s14 }
  0x10   : > { %340 = vst [vmem:[#allocation2 + $0x20] sm:$0xf] %v2946_v3  ;;  %341 = vst [vmem:[#allocation2 + $0x24] sm:$0x1] %v2946_v3  ;;  %v2872_v10 = vld [vmem:[%s3682_s1 + $0x58] sm:$0xff]   ;;  %v2472_v11 = vld [vmem:[%s3035_s23] sm:$0xff]   ;;  %s268_s11 = scalar_lea.vmem %s3687_s6, %s3718_s22 }
  0x11   : > { %342 = vst [vmem:[#allocation2 + $0x28] sm:$0xf] %v2946_v3  ;;  %343 = vst [vmem:[#allocation2 + $0x2c] sm:$0x1] %v2946_v3  ;;  %2648 = vmatpush3.bf16.msra.mxu1 %v2863_v1  ;;  %v3044_v12 = vld [vmem:[%s3683_s2] ss:$0 sm:$0xff]  ;;  %v2473_v14 = vunpack.c.l.bf16 %v2472_v11  ;;  %v2474_v15 = vunpack.c.h.bf16 %v2472_v11 }
  0x12   : > { %344 = vst [vmem:[#allocation2 + $0x30] sm:$0xf] %v2946_v3  ;;  %345 = vst [vmem:[#allocation2 + $0x34] sm:$0x1] %v2946_v3  ;;  %2649 = vmatprep.subr.bf16.mxu1 %v2865_v4  ;;  %2624 = vmatpush3.bf16.msra.mxu0 %v2866_v5  ;;  %v2871_v13 = vld [vmem:[%s3682_s1 + $0x10] sm:$0xff]   ;;  %v2507_v20 = vld [vmem:[%s3035_s23 + $0x8] sm:$0xff]  }
  0x13   : > { %346 = vst [vmem:[#allocation2 + $0x38] sm:$0xf] %v2946_v3  ;;  %347 = vst [vmem:[#allocation2 + $0x3c] sm:$0x1] %v2946_v3  ;;  %2625 = vmatprep.subr.bf16.mxu0 %v2868_v6  ;;  %v3052_v16 = vld [vmem:[%s3684_s3] ss:$0 sm:$0xff]  ;;  %v293_v19 = vmul.f32 %v2473_v14, %v3044_v12  ;;  %v294_v21 = vmul.f32 %v2474_v15, %v3044_v12  ;;  %v2477_v22 = vunpack.c.l.bf16 %v2507_v20  ;;  %v2478_v29 = vunpack.c.h.bf16 %v2507_v20 }
  0x14   : > { %348 = vst [vmem:[#allocation2 + $0x40] sm:$0xf] %v2946_v3  ;;  %349 = vst [vmem:[#allocation2 + $0x44] sm:$0x1] %v2946_v3  ;;  %v3054_v17 = vld [vmem:[#allocation2] sm:$0xf] }
  0x15   : > { %350 = vst [vmem:[#allocation2 + $0x48] sm:$0xf] %v2946_v3  ;;  %351 = vst [vmem:[#allocation2 + $0x4c] sm:$0x1] %v2946_v3  ;;  %2650 = vmatpush3.bf16.msra.mxu1 %v2865_v4  ;;  %v2874_v18 = vld [vmem:[%s3682_s1 + $0x50] sm:$0xff]   ;;  %v2873_v23 = vld [vmem:[%s3682_s1 + $0x8] sm:$0xff]   ;;  %v308_v24 = vadd.f32 %v3052_v16, %v293_v19  ;;  %v309_v26 = vadd.f32 %v3052_v16, %v294_v21  ;;  %v295_v28 = vmul.f32 %v2477_v22, %v3044_v12 }
  0x16   : > { %2651 = vmatprep.subr.bf16.mxu1 %v2867_v7  ;;  %2626 = vmatpush3.bf16.msra.mxu0 %v2868_v6  ;;  %v551_v25 = vshrl.u32 %v3054_v17, 16  ;;  %v554_v27 = vshll.u32 %v3054_v17, 16  ;;  %v2876_v30 = vld [vmem:[%s3682_s1 + $0x48] sm:$0xff]   ;;  %vm458_vm1 = vsmask.f32 7938  ;;  %vm463_vm2 = vcmask 1040384  }
  0x17   : > { %2627 = vmatprep.subr.bf16.mxu0 %v2870_v8  ;;  %v316_v31 = vmax.f32 %v308_v24, 0.0  ;;  %v317_v32 = vmax.f32 %v309_v26, 0.0  ;;  %v310_v33 = vadd.f32 %v3052_v16, %v295_v28  ;;  %v2875_v34 = vld [vmem:[%s3682_s1] sm:$0xff]   ;;  %vm464_vm3 = vsmask.f32 256  ;;  %v3081_v43 = vld [vmem:[%s3682_s1 + $0xf8] sm:$0xff]   ;;  %vm3090_vm4 = vmand %vm457_vm0, %vm458_vm1 }
  0x18   : > { %v553_v37 = vrot.slane %v551_v25, 4  ;;  %v556_v39 = vrot.slane %v554_v27, 5  ;;  %v296_v40 = vmul.f32 %v2478_v29, %v3044_v12  ;;  %v2880_v46 = vld [vmem:[%s3682_s1 + $0x40] sm:$0xff]   ;;  %v460_v47 = vld [vmem:[#allocation2 + $0x8] sm:$0xf]  ;;  %v3097_v56 = vld [vmem:[%s3682_s1 + $0xb8] sm:$0xff]  }
  0x19   : > { %2652 = vmatpush3.bf16.msra.mxu1 %v2867_v7  ;;  %v2463_v35 = vpack.c.bf16 %v316_v31, %v316_v31  ;;  %v2464_v36 = vpack.c.bf16 %v317_v32, %v317_v32  ;;  %v318_v38 = vmax.f32 %v310_v33, 0.0  ;;  %v469_v49 = vld [vmem:[#allocation2 + $0x10] sm:$0xf]  ;;  %v466_v50 = vld [vmem:[#allocation2 + $0xc] sm:$0x1]  ;;  %vm3101_vm5 = vmand %vm463_vm2, %vm464_vm3  ;;  %vm953_vm9 = vcmask 1042432  }
  0x1a   : > { %2653 = vmatprep.subr.bf16.mxu1 %v2869_v9  ;;  %2628 = vmatpush3.bf16.msra.mxu0 %v2870_v8  ;;  %v472_v51 = vld [vmem:[#allocation2 + $0x14] sm:$0x1]  ;;  %v3086_v52 = vld [vmem:[#allocation2 + $0x4] sm:$0x1]  ;;  %v311_v60 = vadd.f32 %v3052_v16, %v296_v40  ;;  %v475_v63 = vld [vmem:[#allocation2 + $0x18] sm:$0xf]  ;;  %v557_v4 = vor.u32 %v556_v39, %v553_v37 }
  0x1b   : > { %2629 = vmatprep.subr.bf16.mxu0 %v2872_v10  ;;  %v377_v41 = vshrl.u32 %v2463_v35, 16  ;;  %v380_v42 = vshll.u32 %v2463_v35, 16  ;;  %v385_v44 = vshrl.u32 %v2464_v36, 16  ;;  %v388_v45 = vshll.u32 %v2464_v36, 16  ;;  %v478_v2 = vld [vmem:[#allocation2 + $0x1c] sm:$0x1] }
  0x1c   : > { %v2465_v48 = vpack.c.bf16 %v318_v38, %v318_v38  ;;  %v560_v5 = vshll.u32 %v3086_v52, 16  ;;  %v319_v14 = vmax.f32 %v311_v60, 0.0  ;;  %vm547_vm6 = vsmask.f32 3328  ;;  %v3128_v26 = vld [vmem:[%s3035_s23 + $0x18] sm:$0xff]   ;;  %v2903_v59 = vld [vmem:[%s3682_s1 + $0x160] sm:$0xff]  }
  0x1d   : > { %2654 = vmatpush3.bf16.msra.mxu1 %v2869_v9  ;;  %v379_v53 = vrot.slane %v377_v41, 7  ;;  %v387_v55 = vrot.slane %v385_v44, 7  ;;  %vm548_vm7 = vsmask.f32 7440  ;;  %v558_v21 = vrot.slane %v557_v4, 4  ;;  %v2900_v54 = vld [vmem:[%s3682_s1 + $0x138] sm:$0xff]  }
  0x1e   : > { %2655 = vmatprep.subr.bf16.mxu1 %v2871_v13  ;;  %2630 = vmatpush3.bf16.msra.mxu0 %v2872_v10  ;;  %v393_v57 = vshrl.u32 %v2465_v48, 16  ;;  %v396_v58 = vshll.u32 %v2465_v48, 16  ;;  %v2466_v20 = vpack.c.bf16 %v319_v14, %v319_v14  ;;  %v562_v22 = vrot.slane %v560_v5, 5  ;;  %vm3122_vm8 = vmor %vm547_vm6, %vm548_vm7  ;;  %v2934_v24 = vld [vmem:[%s3682_s1 + $0x218] sm:$0xff]  }
  0x1f   : > { %2631 = vmatprep.subr.bf16.mxu0 %v2874_v18  ;;  %v382_v61 = vor.u32 %v380_v42, %v379_v53  ;;  %v390_v62 = vor.u32 %v388_v45, %v387_v55  ;;  %v383_v0 = vrot.slane %v379_v53, 4  ;;  %v391_v1 = vrot.slane %v387_v55, 4  ;;  %v481_v55 = vld [vmem:[#allocation2 + $0x20] sm:$0xf] }
  0x20   : > { %v395_v3 = vrot.slane %v393_v57, 7  ;;  %v401_v27 = vshrl.u32 %v2466_v20, 16  ;;  %v563_v31 = vsel %vm3122_vm8, %v558_v21, %v562_v22  ;;  %v2485_v32 = vunpack.c.l.bf16 %v3128_v26  ;;  %v2885_v21 = vld [vmem:[%s3682_s1 + $0xe0] sm:$0xff]  }
  0x21   : > { %2656 = vmatpush3.bf16.msra.mxu1 %v2871_v13  ;;  %v461_v6 = vsel %vm3090_vm4, %v382_v61, %v460_v47  ;;  %v470_v7 = vsel %vm3090_vm4, %v390_v62, %v469_v49  ;;  %v467_v8 = vsel %vm3101_vm5, %v383_v0, %v466_v50  ;;  %v473_v9 = vsel %vm3101_vm5, %v391_v1, %v472_v51  ;;  %v2508_v13 = vld [vmem:[%s3035_s23 + $0x10] sm:$0xff]   ;;  %v2883_v1 = vld [vmem:[%s3682_s1 + $0xe8] sm:$0xff]  }
  0x22   : > { %2657 = vmatprep.subr.bf16.mxu1 %v2873_v23  ;;  %2632 = vmatpush3.bf16.msra.mxu0 %v2874_v18  ;;  %462 = vst [vmem:[#allocation2 + $0x8] sm:$0xf] %v461_v6  ;;  %v398_v10 = vor.u32 %v396_v58, %v395_v3  ;;  %471 = vst [vmem:[#allocation2 + $0x10] sm:$0xf] %v470_v7  ;;  %v399_v11 = vrot.slane %v395_v3, 4  ;;  %v2481_v15 = vunpack.c.l.bf16 %v2508_v13  ;;  %v403_v47 = vrot.slane %v401_v27, 7 }
  0x23   : > { %2633 = vmatprep.subr.bf16.mxu0 %v2876_v30  ;;  %468 = vst [vmem:[#allocation2 + $0xc] sm:$0x1] %v467_v8  ;;  %474 = vst [vmem:[#allocation2 + $0x14] sm:$0x1] %v473_v9  ;;  %v404_v48 = vshll.u32 %v2466_v20, 16  ;;  %v2881_v50 = vld [vmem:[%s3682_s1 + $0xf0] sm:$0xff]   ;;  %v299_v57 = vmul.f32 %v2485_v32, %v3044_v12 }
  0x24   : > { %v476_v18 = vsel %vm3090_vm4, %v398_v10, %v475_v63  ;;  %v479_v19 = vsel %vm3101_vm5, %v399_v11, %v478_v2  ;;  %v297_v25 = vmul.f32 %v2481_v15, %v3044_v12  ;;  %v487_v27 = vld [vmem:[#allocation2 + $0x28] sm:$0xf]  ;;  %vm954_vm10 = vcmask 1046532  }
  0x25   : > { %2658 = vmatpush3.bf16.msra.mxu1 %v2873_v23  ;;  %477 = vst [vmem:[#allocation2 + $0x18] sm:$0xf] %v476_v18  ;;  %480 = vst [vmem:[#allocation2 + $0x1c] sm:$0x1] %v479_v19  ;;  %v2482_v23 = vunpack.c.h.bf16 %v2508_v13  ;;  %v406_v8 = vor.u32 %v404_v48, %v403_v47  ;;  %v314_v13 = vadd.f32 %v3052_v16, %v299_v57  ;;  %v493_v48 = vld [vmem:[#allocation2 + $0x30] sm:$0xf] }
  0x26   : > { %2659 = vmatprep.subr.bf16.mxu1 %v2875_v34  ;;  %2634 = vmatpush3.bf16.msra.mxu0 %v2876_v30  ;;  %v312_v38 = vadd.f32 %v3052_v16, %v297_v25  ;;  %v484_v25 = vld [vmem:[#allocation2 + $0x24] sm:$0x1]  ;;  %vm3293_vm11 = vmor %vm953_vm9, %vm954_vm10 }
  0x27   : > { %2635 = vmatprep.subr.bf16.mxu0 %v2880_v46  ;;  %v298_v33 = vmul.f32 %v2482_v23, %v3044_v12  ;;  %v482_v18 = vsel %vm3090_vm4, %v406_v8, %v481_v55  ;;  %v322_v32 = vmax.f32 %v314_v13, 0.0  ;;  %v2887_v55 = vld [vmem:[%s3682_s1 + $0xd8] sm:$0xff]  }
  0x28   : > { %v320_v4 = vmax.f32 %v312_v38, 0.0  ;;  %483 = vst [vmem:[#allocation2 + $0x20] sm:$0xf] %v482_v18  ;;  %v490_v38 = vld [vmem:[#allocation2 + $0x2c] sm:$0x1] }
  0x29   : > { %2660 = vmatpush3.bf16.msra.mxu1 %v2875_v34  ;;  %v3130_v28 = vld [vmem:[#allocation2 + $0x8] sm:$0xf]  ;;  %v3132_v29 = vld [vmem:[#allocation2 + $0x10] sm:$0xf]  ;;  %v313_v58 = vadd.f32 %v3052_v16, %v298_v33  ;;  %v502_v8 = vld [vmem:[#allocation2 + $0x3c] sm:$0x1] }
  0x2a   : > { %2693 = vmatprep.subr.bf16.mxu1 %v3081_v43  ;;  %2636 = vmatpush3.bf16.msra.mxu0 %v2880_v46  ;;  %v3134_v30 = vld [vmem:[#allocation2 + $0xc] sm:$0x1]  ;;  %v2250_v34 = vcombine.low %v3054_v17, %v3130_v28  ;;  %v3142_v35 = vld [vmem:[#allocation2 + $0x14] sm:$0x1]  ;;  %v565_v36 = vshrl.u32 %v3130_v28, 16  ;;  %v568_v37 = vshll.u32 %v3130_v28, 16  ;;  %v2467_v11 = vpack.c.bf16 %v320_v4, %v320_v4 }
  0x2b   : > { %2669 = vmatprep.subr.bf16.mxu0 %v3097_v56  ;;  %v574_v39 = vshll.u32 %v3134_v30, 16  ;;  %v579_v40 = vshrl.u32 %v3132_v29, 16  ;;  %v582_v41 = vshll.u32 %v3132_v29, 16  ;;  %v588_v42 = vshll.u32 %v3142_v35, 16 }
  0x2c   : > { %2661 = vmatprep.mubr.bf16.mxu1 %v2250_v34  ;;  %v3151_v44 = vld [vmem:[#allocation2 + $0x18] sm:$0xf]  ;;  %v567_v45 = vrot.slane %v565_v36, 4  ;;  %v570_v46 = vrot.slane %v568_v37, 5  ;;  %v3160_v53 = vld [vmem:[#allocation2 + $0x1c] sm:$0x1] }
  0x2d   : > { %v3155_v49 = vcombine.low %v3132_v29, %v3151_v44  ;;  %v581_v51 = vrot.slane %v579_v40, 4  ;;  %v576_v61 = vrot.slane %v574_v39, 5  ;;  %v584_v62 = vrot.slane %v582_v41, 5 }
  0x2e   : > { %v571_v60 = vor.u32 %v570_v46, %v567_v45  ;;  %v593_v63 = vshrl.u32 %v3151_v44, 16  ;;  %v590_v0 = vrot.slane %v588_v42, 5  ;;  %v596_v2 = vshll.u32 %v3151_v44, 16  ;;  %v2884_v46 = vld [vmem:[%s3682_s1 + $0xb0] sm:$0xff]  }
  0x2f   : > { %2662 = vmatmul.mubr.bf16.vlgmr.msra.gmra.mxu1 %v3155_v49  ;;  %v602_v3 = vshll.u32 %v3160_v53, 16  ;;  %v585_v6 = vor.u32 %v584_v62, %v581_v51  ;;  %v321_v19 = vmax.f32 %v313_v58, 0.0  ;;  %v409_v22 = vshrl.u32 %v2467_v11, 16  ;;  %v499_v62 = vld [vmem:[#allocation2 + $0x38] sm:$0xf] }
  0x30   : > { %2694 = vmatpush3.bf16.msra.mxu1 %v3081_v43  ;;  %v572_v5 = vrot.slane %v571_v60, 4  ;;  %v595_v7 = vrot.slane %v593_v63, 4  ;;  %v598_v9 = vrot.slane %v596_v2, 5  ;;  %v412_v23 = vshll.u32 %v2467_v11, 16 }
  0x31   : > { %2695 = vmatprep.subr.bf16.mxu1 %v2881_v50  ;;  %v604_v10 = vrot.slane %v602_v3, 5  ;;  %v586_v15 = vrot.slane %v585_v6, 4  ;;  %v2468_v33 = vpack.c.bf16 %v321_v19, %v321_v19  ;;  %v407_v34 = vrot.slane %v403_v47, 4 }
  0x32   : > { %v3175_v14 = vsel %vm3122_vm8, %v572_v5, %v576_v61  ;;  %v599_v20 = vor.u32 %v598_v9, %v595_v7  ;;  %v411_v37 = vrot.slane %v409_v22, 7  ;;  %v2469_v39 = vpack.c.bf16 %v322_v32, %v322_v32 }
  0x33   : > { %v2238_v43 = vcombine.low %v563_v31, %v3175_v14  ;;  %v3185_v36 = vsel %vm3122_vm8, %v586_v15, %v590_v0  ;;  %v417_v40 = vshrl.u32 %v2468_v33, 16  ;;  %v420_v41 = vshll.u32 %v2468_v33, 16  ;;  %v496_v0 = vld [vmem:[#allocation2 + $0x34] sm:$0x1] }
  0x34   : > { %2696 = vmatpush3.bf16.msra.mxu1 %v2881_v50  ;;  %v600_v31 = vrot.slane %v599_v20, 4  ;;  %v485_v42 = vsel %vm3101_vm5, %v407_v34, %v484_v25  ;;  %v414_v47 = vor.u32 %v412_v23, %v411_v37  ;;  %v415_v50 = vrot.slane %v411_v37, 4  ;;  %v2889_v15 = vld [vmem:[%s3682_s1 + $0xd0] sm:$0xff]   ;;  %v2888_v25 = vld [vmem:[%s3682_s1 + $0xa0] sm:$0xff]  }
  0x35   : > { %2637 = vmatprep.mubr.bf16.mxu0 %v2238_v43  ;;  %2697 = vmatprep.subr.bf16.mxu1 %v2883_v1  ;;  %486 = vst [vmem:[#allocation2 + $0x24] sm:$0x1] %v485_v42  ;;  %v419_v57 = vrot.slane %v417_v40, 7  ;;  %v425_v58 = vshrl.u32 %v2469_v39, 16  ;;  %v428_v60 = vshll.u32 %v2469_v39, 16  ;;  %v2486_v2 = vunpack.c.h.bf16 %v3128_v26  ;;  %v2886_v26 = vld [vmem:[%s3682_s1 + $0xa8] sm:$0xff]  }
  0x36   : > { %v3191_v45 = vsel %vm3122_vm8, %v600_v31, %v604_v10  ;;  %v488_v61 = vsel %vm3090_vm4, %v414_v47, %v487_v27  ;;  %v491_v63 = vsel %vm3101_vm5, %v415_v50, %v490_v38  ;;  %v958_v23 = vrot.slane %v3086_v52, 5  ;;  %v2891_v40 = vld [vmem:[%s3682_s1 + $0x98] sm:$0xff]   ;;  %v2899_v52 = vld [vmem:[%s3682_s1 + $0x170] sm:$0xff]  }
  0x37   : > { %v3198_v51 = vcombine.low %v3185_v36, %v3191_v45  ;;  %489 = vst [vmem:[#allocation2 + $0x28] sm:$0xf] %v488_v61  ;;  %v422_v3 = vor.u32 %v420_v41, %v419_v57  ;;  %v427_v4 = vrot.slane %v425_v58, 7  ;;  %492 = vst [vmem:[#allocation2 + $0x2c] sm:$0x1] %v491_v63  ;;  %v423_v5 = vrot.slane %v419_v57, 4 }
  0x38   : > { %2698 = vmatpush3.bf16.msra.mxu1 %v2883_v1  ;;  %v3209_v1 = vld [vmem:[#allocation2 + $0x20] sm:$0xf]  ;;  %v300_v43 = vmul.f32 %v2486_v2, %v3044_v12  ;;  %v2892_v12 = vld [vmem:[%s3682_s1 + $0xc8] sm:$0xff]   ;;  %v2264_v33 = vrot.slane %v3132_v29, 9  ;;  %v962_v34 = vrot.slane %v3134_v30, 5  ;;  %v2265_v47 = vrot.slane %v3151_v44, 9 }
  0x39   : > { %2699 = vmatprep.subr.bf16.mxu1 %v2885_v21  ;;  %2638 = vmatmul.mubr.bf16.vlgmr.msra.gmra.mxu0 %v3198_v51  ;;  %v607_v6 = vshrl.u32 %v3209_v1, 16  ;;  %v610_v7 = vshll.u32 %v3209_v1, 16  ;;  %v430_v9 = vor.u32 %v428_v60, %v427_v4  ;;  %v494_v10 = vsel %vm3090_vm4, %v422_v3, %v493_v48 }
  0x3a   : > { %2670 = vmatpush3.bf16.msra.mxu0 %v3097_v56  ;;  %v431_v11 = vrot.slane %v427_v4, 4  ;;  %v497_v13 = vsel %vm3101_vm5, %v423_v5, %v496_v0  ;;  %v2262_v56 = vrot.slane %v3054_v17, 9  ;;  %495 = vst [vmem:[#allocation2 + $0x30] sm:$0xf] %v494_v10  ;;  %v315_v38 = vadd.f32 %v3052_v16, %v300_v43  ;;  %v2895_v16 = vld [vmem:[%s3682_s1 + $0xc0] sm:$0xff]  }
  0x3b   : > { %2671 = vmatprep.subr.bf16.mxu0 %v2884_v46  ;;  %v609_v18 = vrot.slane %v607_v6, 4  ;;  %v612_v19 = vrot.slane %v610_v7, 5  ;;  %498 = vst [vmem:[#allocation2 + $0x34] sm:$0x1] %v497_v13  ;;  %v500_v20 = vsel %vm3090_vm4, %v430_v9, %v499_v62  ;;  %v966_v48 = vrot.slane %v3142_v35, 5 }
  0x3c   : > { %2700 = vmatpush3.bf16.msra.mxu1 %v2885_v21  ;;  %v3228_v21 = vld [vmem:[#allocation2 + $0x24] sm:$0x1]  ;;  %v503_v22 = vsel %vm3101_vm5, %v431_v11, %v502_v8  ;;  %501 = vst [vmem:[#allocation2 + $0x38] sm:$0xf] %v500_v20  ;;  %v2263_v0 = vrot.slane %v3130_v28, 9  ;;  %v323_v2 = vmax.f32 %v315_v38, 0.0  ;;  %v2314_v8 = vcombine.low %v3130_v28, %v3132_v29 }
  0x3d   : > { %2701 = vmatprep.subr.bf16.mxu1 %v2887_v55  ;;  %504 = vst [vmem:[#allocation2 + $0x3c] sm:$0x1] %v503_v22  ;;  %v613_v27 = vor.u32 %v612_v19, %v609_v18  ;;  %v616_v32 = vshll.u32 %v3228_v21, 16  ;;  %v2894_v19 = vld [vmem:[%s3682_s1 + $0x90] sm:$0xff]   ;;  %v2266_v17 = vrot.slane %v3209_v1, 9 }
  0x3e   : > { %2672 = vmatpush3.bf16.msra.mxu0 %v2884_v46  ;;  %v3242_v31 = vld [vmem:[#allocation2 + $0x28] sm:$0xf]  ;;  %v3244_v37 = vld [vmem:[#allocation2 + $0x2c] sm:$0x1] }
  0x3f   : > { %2673 = vmatprep.subr.bf16.mxu0 %v2886_v26  ;;  %v3249_v39 = vcombine.low %v3209_v1, %v3242_v31  ;;  %v621_v41 = vshrl.u32 %v3242_v31, 16  ;;  %v624_v42 = vshll.u32 %v3242_v31, 16  ;;  %v630_v46 = vshll.u32 %v3244_v37, 16 }
  0x40   : > { %2702 = vmatpush3.bf16.msra.mxu1 %v2887_v55  ;;  %v614_v55 = vrot.slane %v613_v27, 4  ;;  %v618_v57 = vrot.slane %v616_v32, 5 }
  0x41   : > { %2703 = vmatprep.subr.bf16.mxu1 %v2889_v15  ;;  %v3262_v50 = vld [vmem:[#allocation2 + $0x30] sm:$0xf]  ;;  %v623_v58 = vrot.slane %v621_v41, 4  ;;  %v626_v60 = vrot.slane %v624_v42, 5  ;;  %2665 = vmatprep.mubr.bf16.mxu1 %v3249_v39  ;;  %v632_v5 = vrot.slane %v630_v46, 5  ;;  %v2896_v41 = vld [vmem:[%s3682_s1 + $0x88] sm:$0xff]  }
  0x42   : > { %2674 = vmatpush3.bf16.msra.mxu0 %v2886_v26  ;;  %v3265_v61 = vld [vmem:[#allocation2 + $0x34] sm:$0x1]  ;;  %v635_v62 = vshrl.u32 %v3262_v50, 16  ;;  %v638_v63 = vshll.u32 %v3262_v50, 16  ;;  %v3284_v13 = vsel %vm3122_vm8, %v614_v55, %v618_v57  ;;  %v2470_v57 = vpack.c.bf16 %v323_v2, %v323_v2 }
  0x43   : > { %2675 = vmatprep.subr.bf16.mxu0 %v2888_v25  ;;  %v3270_v3 = vld [vmem:[#allocation2 + $0x38] sm:$0xf]  ;;  %v627_v4 = vor.u32 %v626_v60, %v623_v58  ;;  %v644_v7 = vshll.u32 %v3265_v61, 16  ;;  %v959_v58 = vsel %vm3293_vm11, %v2262_v56, %v958_v23  ;;  %v2315_v60 = vcombine.low %v3151_v44, %v3209_v1 }
  0x44   : > { %2704 = vmatpush3.bf16.msra.mxu1 %v2889_v15  ;;  %v3272_v6 = vld [vmem:[#allocation2 + $0x3c] sm:$0x1]  ;;  %v3279_v26 = vcombine.low %v3262_v50, %v3270_v3  ;;  %v637_v9 = vrot.slane %v635_v62, 4  ;;  %v640_v10 = vrot.slane %v638_v63, 5  ;;  %v649_v11 = vshrl.u32 %v3270_v3, 16 }
  0x45   : > { %2705 = vmatprep.subr.bf16.mxu1 %v2892_v12  ;;  %v628_v15 = vrot.slane %v627_v4, 4  ;;  %v652_v18 = vshll.u32 %v3270_v3, 16  ;;  %v658_v28 = vshll.u32 %v3272_v6, 16  ;;  %v646_v32 = vrot.slane %v644_v7, 5  ;;  %v505_v63 = vld [vmem:[#allocation2 + $0x40] sm:$0xf] }
  0x46   : > { %2676 = vmatpush3.bf16.msra.mxu0 %v2888_v25  ;;  %2666 = vmatmul.mubr.bf16.gmra.mxu1 %v3279_v26  ;;  %v641_v20 = vor.u32 %v640_v10, %v637_v9  ;;  %v651_v22 = vrot.slane %v649_v11, 4  ;;  %v2897_v25 = vld [vmem:[%s3682_s1 + $0x178] sm:$0xff]   ;;  %v436_v56 = vshll.u32 %v2470_v57, 16  ;;  %v2316_v62 = vcombine.low %v3242_v31, %v3262_v50  ;;  %v508_v10 = vld [vmem:[#allocation2 + $0x44] sm:$0x1] }
  0x47   : > { %2677 = vmatprep.subr.bf16.mxu0 %v2891_v40  ;;  %v3304_v27 = vsel %vm3122_vm8, %v628_v15, %v632_v5  ;;  %v654_v38 = vrot.slane %v652_v18, 5  ;;  %2709 = vmatprep.mubr.bf16.mxu1 %v2314_v8  ;;  %v660_v55 = vrot.slane %v658_v28, 5  ;;  %v2267_v1 = vrot.slane %v3242_v31, 9  ;;  %v2901_v31 = vld [vmem:[%s3682_s1 + $0x168] sm:$0xff]  }
  0x48   : > { %2706 = vmatpush3.bf16.msra.mxu1 %v2892_v12  ;;  %v970_v12 = vrot.slane %v3160_v53, 5  ;;  %v3311_v42 = vcombine.low %v3284_v13, %v3304_v27  ;;  %v642_v46 = vrot.slane %v641_v20, 4  ;;  %v978_v7 = vrot.slane %v3244_v37, 5  ;;  %v2902_v20 = vld [vmem:[%s3682_s1 + $0x130] sm:$0xff]  }
  0x49   : > { %2707 = vmatprep.subr.bf16.mxu1 %v2895_v16  ;;  %v655_v53 = vor.u32 %v654_v38, %v651_v22  ;;  %v967_v37 = vsel %vm3293_vm11, %v2264_v33, %v966_v48  ;;  %v2268_v33 = vrot.slane %v3262_v50, 9  ;;  %v2269_v28 = vrot.slane %v3270_v3, 9  ;;  %v2905_v50 = vld [vmem:[%s3682_s1 + $0x158] sm:$0xff]  }
  0x4a   : > { %2678 = vmatpush3.bf16.msra.mxu0 %v2891_v40  ;;  %v3323_v40 = vsel %vm3293_vm11, %v2263_v0, %v962_v34  ;;  %2641 = vmatprep.mubr.bf16.mxu0 %v3311_v42  ;;  %v3334_v30 = vsel %vm3122_vm8, %v642_v46, %v646_v32  ;;  %v974_v34 = vrot.slane %v3228_v21, 5  ;;  %v2898_v0 = vld [vmem:[%s3682_s1 + $0x80] sm:$0xff]   ;;  %v3371_v18 = vsel %vm3293_vm11, %v2265_v47, %v970_v12  ;;  %v2904_v32 = vld [vmem:[%s3682_s1 + $0x128] sm:$0xff]  }
  0x4b   : > { %2679 = vmatprep.subr.bf16.mxu0 %v2894_v19  ;;  %v656_v23 = vrot.slane %v655_v53, 4  ;;  %v2286_v5 = vcombine.low %v959_v58, %v3323_v40  ;;  %v3385_v35 = vsel %vm3293_vm11, %v2267_v1, %v978_v7  ;;  %v3388_v44 = vcombine.low %v967_v37, %v3371_v18  ;;  %v2913_v53 = vld [vmem:[%s3682_s1 + $0x1f8] sm:$0xff]  }
  0x4c   : > { %2708 = vmatpush3.bf16.msra.mxu1 %v2895_v16  ;;  %v433_v16 = vshrl.u32 %v2470_v57, 16  ;;  %v3381_v29 = vsel %vm3293_vm11, %v2266_v17, %v974_v34  ;;  %v982_v47 = vrot.slane %v3265_v61, 5  ;;  %v2371_v22 = vcombine.low %v3323_v40, %v967_v37  ;;  %v2910_v57 = vld [vmem:[%s3682_s1 + $0x110] sm:$0xff]  }
  0x4d   : > { %2741 = vmatprep.subr.bf16.mxu1 %v2897_v25  ;;  %v3345_v4 = vsel %vm3122_vm8, %v656_v23, %v660_v55  ;;  %v3394_v48 = vcombine.low %v3381_v29, %v3385_v35  ;;  %v2342_v46 = vcombine.low %v3175_v14, %v3185_v36  ;;  %v2909_v55 = vld [vmem:[%s3682_s1 + $0x148] sm:$0xff]   ;;  %v2908_v14 = vld [vmem:[%s3682_s1 + $0x118] sm:$0xff]   ;;  %v2911_v36 = vld [vmem:[%s3682_s1 + $0x140] sm:$0xff]  }
  0x4e   : > { %2680 = vmatpush3.bf16.msra.mxu0 %v2894_v19  ;;  %v435_v2 = vrot.slane %v433_v16, 7  ;;  %v3350_v21 = vcombine.low %v3334_v30, %v3345_v4  ;;  %v986_v19 = vrot.slane %v3272_v6, 5  ;;  %v983_v6 = vsel %vm3293_vm11, %v2268_v33, %v982_v47  ;;  %v2915_v34 = vld [vmem:[%s3682_s1 + $0x1f0] sm:$0xff]   ;;  %v2924_v33 = vld [vmem:[%s3682_s1 + $0x198] sm:$0xff]  }
  0x4f   : > { %2681 = vmatprep.subr.bf16.mxu0 %v2896_v41  ;;  %2710 = vmatmul.mubr.bf16.vlgmr.msra.gmra.mxu1 %v2315_v60  ;;  %v2372_v60 = vcombine.low %v3371_v18, %v3381_v29  ;;  %v2373_v16 = vcombine.low %v3385_v35, %v983_v6  ;;  %v2918_v18 = vld [vmem:[%s3682_s1 + $0x1b0] sm:$0xff]  }
  0x50   : > { %v438_v8 = vor.u32 %v436_v56, %v435_v2  ;;  %v439_v9 = vrot.slane %v435_v2, 4  ;;  %2742 = vmatpush3.bf16.msra.mxu1 %v2897_v25  ;;  %2713 = vmatprep.mubr.bf16.mxu1 %v2316_v62  ;;  %v3413_v25 = vsel %vm3293_vm11, %v2269_v28, %v986_v19  ;;  %v2917_v2 = vld [vmem:[%s3682_s1 + $0x1e8] sm:$0xff]  }
  0x51   : > { %2642 = vmatmul.mubr.bf16.gmra.mxu0 %v3350_v21  ;;  %2743 = vmatprep.subr.bf16.mxu1 %v2899_v52  ;;  %v3421_v38 = vcombine.low %v983_v6, %v3413_v25  ;;  %v3511_v19 = vld [vmem:[#allocation2 + $0x4c] sm:$0x1]  ;;  %v2929_v6 = vld [vmem:[%s3682_s1 + $0x238] sm:$0xff]  }
  0x52   : > { %v506_v11 = vsel %vm3090_vm4, %v438_v8, %v505_v63  ;;  %v509_v15 = vsel %vm3101_vm5, %v439_v9, %v508_v10  ;;  %2682 = vmatpush3.bf16.msra.mxu0 %v2896_v41  ;;  %2685 = vmatprep.mubr.bf16.mxu0 %v2286_v5  ;;  %v2907_v41 = vld [vmem:[%s3682_s1 + $0x150] sm:$0xff]   ;;  %v2916_v8 = vld [vmem:[%s3682_s1 + $0x1b8] sm:$0xff]   ;;  %v2343_v10 = vcombine.low %v3191_v45, %v3284_v13 }
  0x53   : > { %507 = vst [vmem:[#allocation2 + $0x40] sm:$0xf] %v506_v11  ;;  %510 = vst [vmem:[#allocation2 + $0x44] sm:$0x1] %v509_v15  ;;  %2683 = vmatprep.subr.bf16.mxu0 %v2898_v0  ;;  %v2344_v11 = vcombine.low %v3304_v27, %v3334_v30  ;;  %v2921_v45 = vld [vmem:[%s3682_s1 + $0x1d8] sm:$0xff]   ;;  %v2920_v27 = vld [vmem:[%s3682_s1 + $0x1a8] sm:$0xff]  }
  0x54   : > { %2744 = vmatpush3.bf16.msra.mxu1 %v2899_v52  ;;  %v2912_v52 = vld [vmem:[%s3682_s1 + $0x108] sm:$0xff]  }
  0x55   : > { %2745 = vmatprep.subr.bf16.mxu1 %v2901_v31 }
  0x56   : > { %2684 = vmatpush3.bf16.msra.mxu0 %v2898_v0  ;;  %v2914_v0 = vld [vmem:[%s3682_s1 + $0x100] sm:$0xff]  }
  0x57   : > { %2717 = vmatprep.subr.bf16.mxu0 %v2900_v54 }
  0x58   : > { %2746 = vmatpush3.bf16.msra.mxu1 %v2901_v31  ;;  %v2919_v31 = vld [vmem:[%s3682_s1 + $0x1e0] sm:$0xff]  }
  0x59   : > { %2686 = vmatmul.mubr.bf16.vlgmr.msra.gmra.mxu0 %v3388_v44  ;;  %2747 = vmatprep.subr.bf16.mxu1 %v2903_v59 }
  0x5a   : > { %v3405_v61 = vld [vmem:[#allocation2 + $0x40] sm:$0xf]  ;;  %2718 = vmatpush3.bf16.msra.mxu0 %v2900_v54  ;;  %2689 = vmatprep.mubr.bf16.mxu0 %v3394_v48  ;;  %v528_v17 = vld [vmem:[#allocation2 + $0x44] sm:$0x1]  ;;  %v2923_v54 = vld [vmem:[%s3682_s1 + $0x1d0] sm:$0xff]  }
  0x5b   : > { %v2317_v12 = vcombine.low %v3270_v3, %v3405_v61  ;;  %2719 = vmatprep.subr.bf16.mxu0 %v2902_v20  ;;  %v2906_v3 = vld [vmem:[%s3682_s1 + $0x120] sm:$0xff]   ;;  %v1291_v58 = vshrl.u32 %v3405_v61, 16  ;;  %v1294_v40 = vshll.u32 %v3405_v61, 16  ;;  %v2354_v56 = vrot.slane %v3405_v61, 9 }
  0x5c   : > { %2748 = vmatpush3.bf16.msra.mxu1 %v2903_v59  ;;  %v1454_v23 = vrot.slane %v528_v17, 5  ;;  %v1300_v7 = vshll.u32 %v528_v17, 16  ;;  %v2922_v59 = vld [vmem:[%s3682_s1 + $0x1a0] sm:$0xff]  }
  0x5d   : > { %2749 = vmatprep.subr.bf16.mxu1 %v2905_v50  ;;  %2714 = vmatmul.mubr.bf16.gmra.mxu1 %v2317_v12  ;;  %v1293_v62 = vrot.slane %v1291_v58, 4  ;;  %v1296_v63 = vrot.slane %v1294_v40, 5 }
  0x5e   : > { %2720 = vmatpush3.bf16.msra.mxu0 %v2902_v20  ;;  %2757 = vmatprep.mubr.bf16.mxu1 %v2371_v22  ;;  %v3464_v1 = vsel %vm3293_vm11, %v2354_v56, %v1454_v23  ;;  %v1302_v37 = vrot.slane %v1300_v7, 5  ;;  %v2927_v20 = vld [vmem:[%s3682_s1 + $0x1c0] sm:$0xff]   ;;  %v1755_v22 = vshll.u32 %v3511_v19, 16 }
  0x5f   : > { %2721 = vmatprep.subr.bf16.mxu0 %v2904_v32  ;;  %v1297_v5 = vor.u32 %v1296_v63, %v1293_v62  ;;  %v2374_v9 = vcombine.low %v3413_v25, %v3464_v1  ;;  %v2928_v25 = vld [vmem:[%s3682_s1 + $0x188] sm:$0xff]  }
  0x60   : > { %2750 = vmatpush3.bf16.msra.mxu1 %v2905_v50 }
  0x61   : > { %2690 = vmatmul.mubr.bf16.gmra.mxu0 %v3421_v38  ;;  %2751 = vmatprep.subr.bf16.mxu1 %v2907_v41  ;;  %v1298_v15 = vrot.slane %v1297_v5, 4 }
  0x62   : > { %2722 = vmatpush3.bf16.msra.mxu0 %v2904_v32  ;;  %2733 = vmatprep.mubr.bf16.mxu0 %v2342_v46  ;;  %v1757_v32 = vrot.slane %v1755_v22, 5  ;;  %v2930_v46 = vld [vmem:[%s3682_s1 + $0x180] sm:$0xff]  }
  0x63   : > { %2723 = vmatprep.subr.bf16.mxu0 %v2906_v3  ;;  %v1303_v13 = vsel %vm3122_vm8, %v1298_v15, %v1302_v37 }
  0x64   : > { %2752 = vmatpush3.bf16.msra.mxu1 %v2907_v41  ;;  %v2345_v30 = vcombine.low %v3345_v4, %v1303_v13  ;;  %v2925_v4 = vld [vmem:[%s3682_s1 + $0x1c8] sm:$0xff]   ;;  %v2931_v41 = vld [vmem:[%s3682_s1 + $0x230] sm:$0xff]  }
  0x65   : > { %2753 = vmatprep.subr.bf16.mxu1 %v2909_v55 }
  0x66   : > { %2724 = vmatpush3.bf16.msra.mxu0 %v2906_v3 }
  0x67   : > { %2725 = vmatprep.subr.bf16.mxu0 %v2908_v14 }
  0x68   : > { %2754 = vmatpush3.bf16.msra.mxu1 %v2909_v55  ;;  %v2932_v55 = vld [vmem:[%s3682_s1 + $0x228] sm:$0xff]  }
  0x69   : > { %2755 = vmatprep.subr.bf16.mxu1 %v2911_v36 }
  0x6a   : > { %2726 = vmatpush3.bf16.msra.mxu0 %v2908_v14 }
  0x6b   : > { %2727 = vmatprep.subr.bf16.mxu0 %v2910_v57 }
  0x6c   : > { %2756 = vmatpush3.bf16.msra.mxu1 %v2911_v36  ;;  %v2937_v36 = vld [vmem:[%s3682_s1 + $0x200] sm:$0xff]  }
  0x6d   : > { %2789 = vmatprep.subr.bf16.mxu1 %v2913_v53 }
  0x6e   : > { %2728 = vmatpush3.bf16.msra.mxu0 %v2910_v57 }
  0x6f   : > { %2729 = vmatprep.subr.bf16.mxu0 %v2912_v52  ;;  %2758 = vmatmul.mubr.bf16.vlgmr.msra.gmra.mxu1 %v2372_v60 }
  0x70   : > { %2790 = vmatpush3.bf16.msra.mxu1 %v2913_v53  ;;  %2761 = vmatprep.mubr.bf16.mxu1 %v2373_v16 }
  0x71   : > { %2791 = vmatprep.subr.bf16.mxu1 %v2915_v34 }
  0x72   : > { %2730 = vmatpush3.bf16.msra.mxu0 %v2912_v52 }
  0x73   : > { %2731 = vmatprep.subr.bf16.mxu0 %v2914_v0 }
  0x74   : > { %2792 = vmatpush3.bf16.msra.mxu1 %v2915_v34 }
  0x75   : > { %2793 = vmatprep.subr.bf16.mxu1 %v2917_v2 }
  0x76   : > { %2732 = vmatpush3.bf16.msra.mxu0 %v2914_v0 }
  0x77   : > { %2765 = vmatprep.subr.bf16.mxu0 %v2916_v8  ;;  %2762 = vmatmul.mubr.bf16.gmra.mxu1 %v2374_v9 }
  0x78   : > { %2794 = vmatpush3.bf16.msra.mxu1 %v2917_v2  ;;  %2805 = vmatprep.mubr.bf16.mxu1 %v3198_v51  ;;  %v3494_v51 = vld [vmem:[#allocation2 + $0x48] sm:$0xf] }
  0x79   : > { %2734 = vmatmul.mubr.bf16.vlgmr.msra.gmra.mxu0 %v2343_v10  ;;  %2795 = vmatprep.subr.bf16.mxu1 %v2919_v31  ;;  %v1746_v29 = vshrl.u32 %v3494_v51, 16  ;;  %v1749_v35 = vshll.u32 %v3494_v51, 16 }
  0x7a   : > { %2766 = vmatpush3.bf16.msra.mxu0 %v2916_v8  ;;  %2737 = vmatprep.mubr.bf16.mxu0 %v2344_v11 }
  0x7b   : > { %2767 = vmatprep.subr.bf16.mxu0 %v2918_v18  ;;  %v1748_v47 = vrot.slane %v1746_v29, 4  ;;  %v1751_v28 = vrot.slane %v1749_v35, 5 }
  0x7c   : > { %2796 = vmatpush3.bf16.msra.mxu1 %v2919_v31 }
  0x7d   : > { %2797 = vmatprep.subr.bf16.mxu1 %v2921_v45  ;;  %v1752_v50 = vor.u32 %v1751_v28, %v1748_v47 }
  0x7e   : > { %2768 = vmatpush3.bf16.msra.mxu0 %v2918_v18 }
  0x7f   : > { %2769 = vmatprep.subr.bf16.mxu0 %v2920_v27  ;;  %v1753_v12 = vrot.slane %v1752_v50, 4 }
  0x80   : > { %2798 = vmatpush3.bf16.msra.mxu1 %v2921_v45 }
  0x81   : > { %2738 = vmatmul.mubr.bf16.gmra.mxu0 %v2345_v30  ;;  %2799 = vmatprep.subr.bf16.mxu1 %v2923_v54  ;;  %v1758_v3 = vsel %vm3122_vm8, %v1753_v12, %v1757_v32 }
  0x82   : > { %2770 = vmatpush3.bf16.msra.mxu0 %v2920_v27  ;;  %2781 = vmatprep.mubr.bf16.mxu0 %v3155_v49  ;;  %v2926_v49 = vld [vmem:[%s3682_s1 + $0x190] sm:$0xff]   ;;  %v2424_v14 = vcombine.low %v1303_v13, %v1758_v3 }
  0x83   : > { %2771 = vmatprep.subr.bf16.mxu0 %v2922_v59 }
  0x84   : > { %2800 = vmatpush3.bf16.msra.mxu1 %v2923_v54 }
  0x85   : > { %2801 = vmatprep.subr.bf16.mxu1 %v2925_v4 }
  0x86   : > { %2772 = vmatpush3.bf16.msra.mxu0 %v2922_v59 }
  0x87   : > { %2773 = vmatprep.subr.bf16.mxu0 %v2924_v33 }
  0x88   : > { %2802 = vmatpush3.bf16.msra.mxu1 %v2925_v4 }
  0x89   : > { %2803 = vmatprep.subr.bf16.mxu1 %v2927_v20 }
  0x8a   : > { %2774 = vmatpush3.bf16.msra.mxu0 %v2924_v33 }
  0x8b   : > { %2775 = vmatprep.subr.bf16.mxu0 %v2926_v49 }
  0x8c   : > { %2804 = vmatpush3.bf16.msra.mxu1 %v2927_v20 }
  0x8d   : > { %2837 = vmatprep.subr.bf16.mxu1 %v2929_v6 }
  0x8e   : > { %2776 = vmatpush3.bf16.msra.mxu0 %v2926_v49 }
  0x8f   : > { %2777 = vmatprep.subr.bf16.mxu0 %v2928_v25  ;;  %2806 = vmatmul.mubr.bf16.vlgmr.msra.gmra.mxu1 %v3311_v42  ;;  %v2933_v42 = vld [vmem:[%s3682_s1 + $0x220] sm:$0xff]  }
  0x90   : > { %2845 = vmatpush3.bf16.msra.mxu1 %v2929_v6  ;;  %2809 = vmatprep.mubr.bf16.mxu1 %v3350_v21  ;;  %v2399_v21 = vcombine.low %v3405_v61, %v3494_v51  ;;  %v1903_v61 = vrot.slane %v3511_v19, 5 }
  0x91   : > { %2838 = vmatprep.subr.bf16.mxu1 %v2931_v41 }
  0x92   : > { %2778 = vmatpush3.bf16.msra.mxu0 %v2928_v25 }
  0x93   : > { %2779 = vmatprep.subr.bf16.mxu0 %v2930_v46 }
  0x94   : > { %2846 = vmatpush3.bf16.msra.mxu1 %v2931_v41 }
  0x95   : > { %2839 = vmatprep.subr.bf16.mxu1 %v2932_v55 }
  0x96   : > { %2780 = vmatpush3.bf16.msra.mxu0 %v2930_v46 }
  0x97   : > { %2813 = vmatprep.subr.bf16.mxu0 %v2929_v6  ;;  %2810 = vmatmul.mubr.bf16.gmra.mxu1 %v2424_v14 }
  0x98   : > { %2847 = vmatpush3.bf16.msra.mxu1 %v2932_v55  ;;  %2833 = vmatprep.mubr.bf16.mxu1 %v3421_v38  ;;  %v2935_v38 = vld [vmem:[%s3682_s1 + $0x210] sm:$0xff]  }
  0x99   : > { %2782 = vmatmul.mubr.bf16.vlgmr.msra.gmra.mxu0 %v3249_v39  ;;  %2840 = vmatprep.subr.bf16.mxu1 %v2933_v42  ;;  %v2936_v39 = vld [vmem:[%s3682_s1 + $0x208] sm:$0xff]  }
  0x9a   : > { %2814 = vmatpush3.bf16.msra.mxu0 %v2929_v6  ;;  %2785 = vmatprep.mubr.bf16.mxu0 %v3279_v26  ;;  %v2433_v26 = vrot.slane %v3494_v51, 9 }
  0x9b   : > { %2815 = vmatprep.subr.bf16.mxu0 %v2931_v41 }
  0x9c   : > { %2848 = vmatpush3.bf16.msra.mxu1 %v2933_v42  ;;  %v1904_v57 = vsel %vm3293_vm11, %v2433_v26, %v1903_v61 }
  0x9d   : > { %2841 = vmatprep.subr.bf16.mxu1 %v2934_v24 }
  0x9e   : > { %2816 = vmatpush3.bf16.msra.mxu0 %v2931_v41 }
  0x9f   : > { %2817 = vmatprep.subr.bf16.mxu0 %v2932_v55 }
  0xa0   : > { %2849 = vmatpush3.bf16.msra.mxu1 %v2934_v24 }
  0xa1   : > { %2786 = vmatmul.mubr.bf16.gmra.mxu0 %v2399_v21  ;;  %2842 = vmatprep.subr.bf16.mxu1 %v2935_v38 }
  0xa2   : > { %2818 = vmatpush3.bf16.msra.mxu0 %v2932_v55  ;;  %2829 = vmatprep.mubr.bf16.mxu0 %v3388_v44  ;;  %v2450_v44 = vcombine.low %v3464_v1, %v1904_v57 }
  0xa3   : > { %2819 = vmatprep.subr.bf16.mxu0 %v2933_v42 }
  0xa4   : > { %2850 = vmatpush3.bf16.msra.mxu1 %v2935_v38 }
  0xa5   : > { %2843 = vmatprep.subr.bf16.mxu1 %v2936_v39 }
  0xa6   : > { %2820 = vmatpush3.bf16.msra.mxu0 %v2933_v42 }
  0xa7   : > { %2821 = vmatprep.subr.bf16.mxu0 %v2934_v24 }
  0xa8   : > { %2851 = vmatpush3.bf16.msra.mxu1 %v2936_v39 }
  0xa9   : > { %2844 = vmatprep.subr.bf16.mxu1 %v2937_v36 }
  0xaa   : > { %2822 = vmatpush3.bf16.msra.mxu0 %v2934_v24 }
  0xab   : > { %2823 = vmatprep.subr.bf16.mxu0 %v2935_v38 }
  0xac   : > { %2852 = vmatpush3.bf16.msra.mxu1 %v2937_v36 }
  0xae   : > { %2824 = vmatpush3.bf16.msra.mxu0 %v2935_v38 }
  0xaf   : > { %2825 = vmatprep.subr.bf16.mxu0 %v2936_v39  ;;  %2834 = vmatmul.mubr.bf16.vlgmr.msra.gmra.mxu1 %v2450_v44 }
  0xb2   : > { %2826 = vmatpush3.bf16.msra.mxu0 %v2936_v39 }
  0xb3   : > { %2827 = vmatprep.subr.bf16.mxu0 %v2937_v36 }
  0xb6   : > { %2828 = vmatpush3.bf16.msra.mxu0 %v2937_v36 }
  0xb9   : > { %2830 = vmatmul.mubr.bf16.vlgmr.msra.gmra.mxu0 %v3394_v48 }
  0xef   : > { %v3566_v53 = vpop.f32.mrf.mxu1 }
  0xf1   : > { %v3568_v58 = vpop.f32.mrf.mxu1 }
  0xf3   : > { %v3570_v43 = vpop.f32.mrf.mxu1 }
  0xf5   : > { %v3574_v60 = vpop.f32.mrf.mxu1 }
  0xf9   : > { %v3572_v40 = vpop.f32.mrf.mxu0 }
  0xfb   : > { %v3576_v52 = vpop.f32.mrf.mxu0 }
  0xfd   : > { %v3578_v16 = vpop.f32.mrf.mxu0 }
  0xff   : > { %v3580_v23 = vpop.f32.mrf.mxu0 }
 0x106   : > { %v2667_v17 = vpop.f32.mrf.mxu1 }
 0x108   : > { %v930_v56 = vpop.f32.mrf.mxu1 }
 0x10a   : > { %v2668_v34 = vpop.f32.mrf.mxu1 }
 0x10c   : > { %v933_v63 = vpop.f32.mrf.mxu1 }
 0x10f   : > { %v3582_v0 = vpop.f32.mrf.mxu1 }
 0x111   : > { %v2643_v48 = vpop.f32.mrf.mxu0  ;;  %v3584_v2 = vpop.f32.mrf.mxu1 }
 0x112   : > { %v939_v21 = vadd.f32 %v2667_v17, %v2643_v48  ;;  %v923_v17 = vadd.f32 %v3566_v53, %v3572_v40 }
 0x113   : > { %v793_v62 = vpop.f32.mrf.mxu0  ;;  %v3588_v8 = vpop.f32.mrf.mxu1 }
 0x114   : > { %v931_v61 = vadd.f32 %v930_v56, %v793_v62  ;;  %v926_v62 = vadd.f32 %v3570_v43, %v3578_v16 }
 0x115   : > { %v2644_v1 = vpop.f32.mrf.mxu0  ;;  %v3592_v10 = vpop.f32.mrf.mxu1 }
 0x116   : > { %v942_v38 = vadd.f32 %v2668_v34, %v2644_v1  ;;  %v915_v34 = vadd.f32 %v3568_v58, %v3576_v52 }
 0x117   : > { %v796_v5 = vpop.f32.mrf.mxu0 }
 0x118   : > { %v934_v36 = vadd.f32 %v933_v63, %v796_v5  ;;  %v918_v5 = vadd.f32 %v3574_v60, %v3580_v23 }
 0x119   : > { %v3586_v7 = vpop.f32.mrf.mxu0 }
 0x11b   : > { %v3590_v9 = vpop.f32.mrf.mxu0 }
 0x11d   : > { %v2688_v31 = vpop.f32.mrf.mxu0  ;;  %v2715_v11 = vpop.f32.mrf.mxu1 }
 0x11f   : > { %v3594_v15 = vpop.f32.mrf.mxu0  ;;  %v1267_v37 = vpop.f32.mrf.mxu1 }
 0x120   : > { %v1135_v40 = vadd.f32 %v3594_v15, %v918_v5 }
 0x121   : > { %v2691_v18 = vpop.f32.mrf.mxu0  ;;  %v2716_v45 = vpop.f32.mrf.mxu1 }
 0x122   : > { %v1140_v57 = vadd.f32 %v2691_v18, %v939_v21  ;;  %v1137_v18 = vadd.f32 %v2688_v31, %v926_v62  ;;  %v1283_v31 = vadd.f32 %v3592_v10, %v1135_v40 }
 0x123   : > { %v1119_v13 = vpop.f32.mrf.mxu0  ;;  %v1270_v27 = vpop.f32.mrf.mxu1 }
 0x124   : > { %v1285_v23 = vadd.f32 %v3588_v8, %v1137_v18 }
 0x125   : > { %v2692_v51 = vpop.f32.mrf.mxu0 }
 0x126   : > { %v1141_v44 = vadd.f32 %v2692_v51, %v942_v38 }
 0x127   : > { %v1122_v59 = vpop.f32.mrf.mxu0 }
 0x12f   : > { %v3596_v30 = vpop.f32.mrf.mxu1 }
 0x131   : > { %v3598_v54 = vpop.f32.mrf.mxu1 }
 0x132   : > { %3697 = vst [vmem:[#allocation3_spill] sm:$0xff] %v3598_v54 }
 0x133   : > { %v3602_v35 = vpop.f32.mrf.mxu1 }
 0x134   : > { %3698 = vst [vmem:[#allocation4_spill] sm:$0xff] %v3602_v35 }
 0x135   : > { %v3606_v33 = vpop.f32.mrf.mxu1 }
 0x136   : > { %3699 = vst [vmem:[#allocation5_spill] sm:$0xff] %v3606_v33  ;;  %v1288_v33 = vadd.f32 %v2715_v11, %v1140_v57  ;;  %v1136_v11 = vadd.f32 %v3586_v7, %v923_v17 }
 0x137   : > { %v2763_v28 = vpop.f32.mrf.mxu1 }
 0x138   : > { %v1284_v16 = vadd.f32 %v3582_v0, %v1136_v11 }
 0x139   : > { %v3600_v29 = vpop.f32.mrf.mxu0  ;;  %v1580_v20 = vpop.f32.mrf.mxu1 }
 0x13a   : > { %v1445_v15 = vadd.f32 %v3600_v29, %v1284_v16 }
 0x13b   : > { %v3604_v4 = vpop.f32.mrf.mxu0  ;;  %v2764_v50 = vpop.f32.mrf.mxu1 }
 0x13d   : > { %v3608_v47 = vpop.f32.mrf.mxu0  ;;  %v1583_v6 = vpop.f32.mrf.mxu1 }
 0x13f   : > { %v3610_v19 = vpop.f32.mrf.mxu0 }
 0x140   : > { %v1444_v0 = vadd.f32 %v3610_v19, %v1283_v31 }
 0x141   : > { %v2739_v49 = vpop.f32.mrf.mxu0 }
 0x142   : > { %v1449_v54 = vadd.f32 %v2739_v49, %v1288_v33  ;;  %v1446_v33 = vadd.f32 %v3608_v47, %v1285_v23 }
 0x143   : > { %v1428_v22 = vpop.f32.mrf.mxu0 }
 0x145   : > { %v2740_v12 = vpop.f32.mrf.mxu0 }
 0x147   : > { %v1431_v41 = vpop.f32.mrf.mxu0 }
 0x14f   : > { %v3612_v25 = vpop.f32.mrf.mxu1 }
 0x150   : > { %3700 = vst [vmem:[#allocation6_spill] sm:$0xff] %v3612_v25  ;;  %v1139_v25 = vadd.f32 %v1122_v59, %v934_v36 }
 0x151   : > { %v3614_v32 = vpop.f32.mrf.mxu1 }
 0x152   : > { %3701 = vst [vmem:[#allocation7_spill] sm:$0xff] %v3614_v32  ;;  %v1138_v32 = vadd.f32 %v1119_v13, %v931_v61 }
 0x153   : > { %v3618_v3 = vpop.f32.mrf.mxu1 }
 0x154   : > { %3703 = vst [vmem:[#allocation9_spill] sm:$0xff] %v3618_v3  ;;  %v1286_v35 = vadd.f32 %v1267_v37, %v1138_v32  ;;  %v1134_v37 = vadd.f32 %v3590_v9, %v915_v34 }
 0x155   : > { %v3624_v42 = vpop.f32.mrf.mxu1 }
 0x156   : > { %3706 = vst [vmem:[#allocation12_spill] sm:$0xff] %v3624_v42  ;;  %v1447_v63 = vadd.f32 %v1428_v22, %v1286_v35  ;;  %v1282_v59 = vadd.f32 %v3584_v2, %v1134_v37 }
 0x157   : > { %v2811_v26 = vpop.f32.mrf.mxu1  ;;  %v3713_v36 = vld [vmem:[#allocation6_spill] sm:$0xff] }
 0x158   : > { %v1599_v13 = vadd.f32 %v1580_v20, %v1447_v63 }
 0x159   : > { %v3616_v46 = vpop.f32.mrf.mxu0  ;;  %v1877_v3 = vpop.f32.mrf.mxu1 }
 0x15a   : > { %3702 = vst [vmem:[#allocation8_spill] sm:$0xff] %v3616_v46 }
 0x15b   : > { %v3620_v55 = vpop.f32.mrf.mxu0  ;;  %v2812_v48 = vpop.f32.mrf.mxu1  ;;  %v3715_v34 = vld [vmem:[#allocation9_spill] sm:$0xff] }
 0x15c   : > { %3704 = vst [vmem:[#allocation10_spill] sm:$0xff] %v3620_v55  ;;  %v1289_v55 = vadd.f32 %v2716_v45, %v1141_v44  ;;  %v1601_v45 = vadd.f32 %v2763_v28, %v1449_v54  ;;  %v1443_v54 = vadd.f32 %v3604_v4, %v1282_v59  ;;  %v3708_v4 = vld [vmem:[#allocation4_spill] sm:$0xff]  ;;  %v3714_v44 = vld [vmem:[#allocation7_spill] sm:$0xff] }
 0x15d   : > { %v3622_v14 = vpop.f32.mrf.mxu0  ;;  %v1880_v52 = vpop.f32.mrf.mxu1  ;;  %v1598_v47 = vadd.f32 %v3708_v4, %v1446_v33  ;;  %v3716_v62 = vld [vmem:[#allocation12_spill] sm:$0xff] }
 0x15e   : > { %3705 = vst [vmem:[#allocation11_spill] sm:$0xff] %v3622_v14  ;;  %v1287_v14 = vadd.f32 %v1270_v27, %v1139_v25  ;;  %v1450_v42 = vadd.f32 %v2740_v12, %v1289_v55  ;;  %v3707_v25 = vld [vmem:[#allocation3_spill] sm:$0xff] }
 0x15f   : > { %v3626_v24 = vpop.f32.mrf.mxu0  ;;  %v1595_v10 = vadd.f32 %v3707_v25, %v1443_v54 }
 0x160   : > { %v1448_v1 = vadd.f32 %v1431_v41, %v1287_v14  ;;  %v1602_v53 = vadd.f32 %v2764_v50, %v1450_v42  ;;  %v3709_v41 = vld [vmem:[#allocation5_spill] sm:$0xff] }
 0x161   : > { %v2787_v39 = vpop.f32.mrf.mxu0 }
 0x162   : > { %v1600_v27 = vadd.f32 %v1583_v6, %v1448_v1  ;;  %v1743_v51 = vadd.f32 %v2787_v39, %v1601_v45  ;;  %v1597_v6 = vadd.f32 %v3596_v30, %v1445_v15 }
 0x163   : > { %v1722_v46 = vpop.f32.mrf.mxu0  ;;  %v3711_v55 = vld [vmem:[#allocation10_spill] sm:$0xff] }
 0x164   : > { %v1741_v7 = vadd.f32 %v1722_v46, %v1599_v13  ;;  %v1898_v28 = vadd.f32 %v2811_v26, %v1743_v51  ;;  %v1596_v46 = vadd.f32 %v3709_v41, %v1444_v0  ;;  %v1737_v14 = vadd.f32 %v3711_v55, %v1595_v10 }
 0x165   : > { %v2788_v56 = vpop.f32.mrf.mxu0  ;;  %v3712_v42 = vld [vmem:[#allocation11_spill] sm:$0xff] }
 0x166   : > { %v1744_v43 = vadd.f32 %v2788_v56, %v1602_v53  ;;  %v1896_v49 = vadd.f32 %v1877_v3, %v1741_v7  ;;  %v3710_v3 = vld [vmem:[#allocation8_spill] sm:$0xff]  ;;  %v1740_v21 = vadd.f32 %v3712_v42, %v1598_v47  ;;  %v1738_v26 = vadd.f32 %v3626_v24, %v1596_v46 }
 0x167   : > { %v1725_v58 = vpop.f32.mrf.mxu0  ;;  %v1739_v30 = vadd.f32 %v3710_v3, %v1597_v6  ;;  %v1892_v17 = vadd.f32 %v3714_v44, %v1737_v14 }
 0x168   : > { %v1742_v9 = vadd.f32 %v1725_v58, %v1600_v27  ;;  %v1899_v20 = vadd.f32 %v2812_v48, %v1744_v43  ;;  %v1895_v56 = vadd.f32 %v3715_v34, %v1740_v21  ;;  %v1893_v63 = vadd.f32 %v3716_v62, %v1738_v26 }
 0x169   : > { %v1894_v57 = vadd.f32 %v3713_v36, %v1739_v30 }
 0x16a   : > { %v1897_v50 = vadd.f32 %v1880_v52, %v1742_v9 }
 0x16f   : > { %v2835_v60 = vpop.f32.mrf.mxu1 }
 0x170   : > { %v2044_v8 = vadd.f32 %v2835_v60, %v1898_v28 }
 0x171   : > { %v2023_v35 = vpop.f32.mrf.mxu1 }
 0x172   : > { %v2042_v19 = vadd.f32 %v2023_v35, %v1896_v49  ;;  %v2082_v15 = vmul.f32 %v2044_v8, %v2044_v8 }
 0x173   : > { %v2836_v2 = vpop.f32.mrf.mxu1 }
 0x174   : > { %v2045_v22 = vadd.f32 %v2836_v2, %v1899_v20  ;;  %v2080_v59 = vmul.f32 %v2042_v19, %v2042_v19 }
 0x175   : > { %v2026_v29 = vpop.f32.mrf.mxu1 }
 0x176   : > { %v2505_v12 = vpack.c.bf16 %v2045_v22, %v2044_v8  ;;  %v2043_v32 = vadd.f32 %v2026_v29, %v1897_v50  ;;  %v2083_v33 = vmul.f32 %v2045_v22, %v2045_v22 }
 0x178   : > { %2512 = vst [vmem:[%s3654_s30 + $0x18] sm:$0xff] %v2505_v12   ;;  %v2500_v38 = vpack.c.bf16 %v2043_v32, %v2042_v19  ;;  %v2081_v7 = vmul.f32 %v2043_v32, %v2043_v32 }
 0x179   : > { %v2831_v39 = vpop.f32.mrf.mxu0 }
 0x17a   : > { %2511 = vst [vmem:[%s3654_s30 + $0x10] sm:$0xff] %v2500_v38   ;;  %v2040_v1 = vadd.f32 %v2831_v39, %v1894_v57 }
 0x17b   : > { %v2007_v61 = vpop.f32.mrf.mxu0 }
 0x17c   : > { %v2038_v5 = vadd.f32 %v2007_v61, %v1892_v17  ;;  %v2078_v52 = vmul.f32 %v2040_v1, %v2040_v1 }
 0x17d   : > { %v2832_v48 = vpop.f32.mrf.mxu0 }
 0x17e   : > { %v2041_v11 = vadd.f32 %v2832_v48, %v1895_v56  ;;  %v2076_v53 = vmul.f32 %v2038_v5, %v2038_v5 }
 0x17f   : > { %v2010_v37 = vpop.f32.mrf.mxu0 }
 0x180   : > { %v2495_v18 = vpack.c.bf16 %v2041_v11, %v2040_v1  ;;  %v2039_v45 = vadd.f32 %v2010_v37, %v1893_v63  ;;  %v2079_v51 = vmul.f32 %v2041_v11, %v2041_v11 }
 0x182   : > { %2510 = vst [vmem:[%s3654_s30 + $0x8] sm:$0xff] %v2495_v18   ;;  %v2490_v24 = vpack.c.bf16 %v2039_v45, %v2038_v5  ;;  %v2062_v40 = vadd.f32 %v2039_v45, %v2038_v5  ;;  %v2077_v58 = vmul.f32 %v2039_v45, %v2039_v45 }
 0x184   : > { %2491 = vst [vmem:[%s3654_s30] sm:$0xff] %v2490_v24   ;;  %v2063_v13 = vadd.f32 %v2062_v40, %v2040_v1  ;;  %v2084_v27 = vadd.f32 %v2077_v58, %v2076_v53 }
 0x186   : > { %v2064_v43 = vadd.f32 %v2063_v13, %v2041_v11  ;;  %v2085_v16 = vadd.f32 %v2084_v27, %v2078_v52 }
 0x188   : > { %v2065_v60 = vadd.f32 %v2064_v43, %v2042_v19  ;;  %v2086_v23 = vadd.f32 %v2085_v16, %v2079_v51 }
 0x18a   : > { %v2066_v9 = vadd.f32 %v2065_v60, %v2043_v32  ;;  %v2087_v31 = vadd.f32 %v2086_v23, %v2080_v59 }
 0x18c   : > { %v2067_v54 = vadd.f32 %v2066_v9, %v2044_v8  ;;  %v2088_v35 = vadd.f32 %v2087_v31, %v2081_v7 }
 0x18e   : > { %v2068_v28 = vadd.f32 %v2067_v54, %v2045_v22  ;;  %v2089_v20 = vadd.f32 %v2088_v35, %v2082_v15 }
 0x190   : > { %v2069_v0 = vrot.slane %v2068_v28, 4  ;;  %v2090_v2 = vadd.f32 %v2089_v20, %v2083_v33 }
 0x192   : > { %v2070_v49 = vadd.f32 %v2069_v0, %v2068_v28  ;;  %v2091_v50 = vrot.slane %v2090_v2, 4 }
 0x194   : > { %v2071_v6 = vrot.slane %v2070_v49, 2  ;;  %v2092_v25 = vadd.f32 %v2091_v50, %v2090_v2 }
 0x196   : > { %v2072_v10 = vadd.f32 %v2071_v6, %v2070_v49  ;;  %v2093_v29 = vrot.slane %v2092_v25, 2 }
 0x198   : > { %v2073_v4 = vrot.slane %v2072_v10, 1  ;;  %v2094_v47 = vadd.f32 %v2093_v29, %v2092_v25 }
 0x19a   : > { %v2074_v8 = vadd.f32 %v2073_v4, %v2072_v10  ;;  %v2095_v19 = vrot.slane %v2094_v47, 1 }
 0x19c   : > { %2075 = vst [vmem:[%s265_s8] sm:$0x1] %v2074_v8  ;;  %v2096_v22 = vadd.f32 %v2095_v19, %v2094_v47 }
 0x19e   : > { %2097 = vst [vmem:[%s268_s11] sm:$0x1] %v2096_v22 }
 0x19f PF: > { %s17_s21 = sadd.s32 1, %s2944_s21  }
 0x1a0   : > { %p14_p4 = scmp.ge.s32.totalorder %s17_s21, 4  }
 0x1a2   :  { %16 = sbr.rel (!%p14_p4) target bundleno = 1 (0x1), region = 99 }

</bundles_post_ra>
